<compile_context>
chip_gen: v5e
topology: v5e:2x2
jax: 0.10.0
libtpu: 0.0.40
codegen_flags: <defaults>
</compile_context>

<pallas_src>
import functools

import numpy as np
import jax
import jax.numpy as jnp
from jax import lax
from jax.experimental import pallas as pl
from jax.experimental.pallas import tpu as pltpu

_TILE_N = 2  # samples per grid step (per-tile gather tables are O(TILE_N^2))


def _round_up(v, m):
    return (v + m - 1) // m * m


# -----------------------------------------------------------------------------
# Fused kernel (factory closes over the static per-tile geometry)
# -----------------------------------------------------------------------------
def _build_kernel(K1, K2, W_img, NHW, L1, B2, LF, P2, C1P, C2, DH, DE, S2):
    KK1 = K1 * K1          # 16 conv1 kernel offsets
    KK2 = K2 * K2          # 9  conv2 kernel offsets

    def kernel(x_ref, w_ref, b_ref, cmp_ref, tab_ref, o_ref,
               xs_ref, x2_ref, xfc_ref):
        f32 = jnp.float32
        xin = x_ref[0]                                           # (8, NHW+pad)

        # ---- ConvBlock 1: Conv2d(3->36,k4) + ReLU + MaxPool(2,2) -------------
        # Stack the 16 shifted input copies along sublanes (8-row blocks) so the
        # whole convolution is ONE MXU push with K=128 (vs 16 pushes with K=3).
        for ki in range(K1):
            for kj in range(K1):
                kk = ki * K1 + kj
                off = ki * W_img + kj
                xs_ref[kk * 8:(kk + 1) * 8, :] = xin[:, off:off + NHW]
        y1 = jnp.dot(w_ref[0:C1P, 0:KK1 * 8], xs_ref[...],
                     preferred_element_type=f32)                 # (48, NHW)
        # MaxPool(2,2): window members sit at lane offsets {0,1,W,W+1};
        # two lane rolls + max (XLU) instead of strided sub-vreg slices.
        m = jnp.maximum(y1, jnp.roll(y1, -1, axis=1))
        m = jnp.maximum(m, jnp.roll(m, -W_img, axis=1))
        # Compact the strided pooled lanes to one dense 128-lane slab via a
        # constant 0/1 gather matmul, then bias + ReLU.
        # relu(maxpool(y)+b) == maxpool(relu(y+b)): per-channel bias, monotone ReLU.
        a1 = jnp.maximum(
            jnp.dot(m, cmp_ref[...], preferred_element_type=f32) + b_ref[0:C1P, :],
            0.0)                                                 # (48, L1)

        # ---- ConvBlock 2: Conv2d(36->48,k3) + ReLU + MaxPool(2,2) ------------
        # im2col as ONE gather GEMM (128-lane blocks per kernel offset), restack
        # the 9 blocks along sublanes, then ONE K=432 MXU push.
        g2 = jnp.dot(a1, tab_ref[:, 0:KK2 * B2],
                     preferred_element_type=f32)                 # (48, 9*B2)
        for kk in range(KK2):
            x2_ref[kk * C1P:(kk + 1) * C1P, :] = g2[:, kk * B2:(kk + 1) * B2]
        acc = jnp.dot(w_ref[C1P:C1P + C2, 0:KK2 * C1P], x2_ref[...],
                      preferred_element_type=f32)                # (48, B2)
        # MaxPool(2,2): the four pool-phase slabs sit P2 lanes apart -> 2 rolls.
        t = jnp.maximum(acc, jnp.roll(acc, -2 * P2, axis=1))
        t = jnp.maximum(t, jnp.roll(t, -P2, axis=1))
        a2 = jnp.maximum(t + b_ref[C1P:C1P + C2, :], 0.0)        # (48, B2)

        # ---- flatten + Linear(192->64)+ReLU + Linear(64->32)+ReLU ------------
        # torch's .view(N,-1) flatten == gather GEMM into S2 batch-on-lanes
        # slabs, restacked along sublanes so FC1 is ONE K=192 MXU push.
        gf = jnp.dot(a2, tab_ref[:, KK2 * B2:KK2 * B2 + S2 * LF],
                     preferred_element_type=f32)                 # (48, S2*LF)
        for s in range(S2):
            xfc_ref[s * C2:(s + 1) * C2, :] = gf[:, s * LF:(s + 1) * LF]
        h = jnp.dot(w_ref[C1P + C2:C1P + C2 + DH, 0:S2 * C2], xfc_ref[...],
                    preferred_element_type=f32)                  # (64, LF)
        h = jnp.maximum(h + b_ref[C1P + C2:C1P + C2 + DH, :], 0.0)
        # TODO(synk): Dropout has no inference-time compute; it is the identity.
        o = jnp.dot(w_ref[C1P + C2 + DH:C1P + C2 + DH + DE, 0:DH], h,
                    preferred_element_type=f32)                  # (32, LF)
        o_ref[0] = jnp.maximum(o + b_ref[C1P + C2 + DH:C1P + C2 + DH + DE, :], 0.0)

    return kernel


# -----------------------------------------------------------------------------
# Constant 0/1 gather tables (trace-time numpy; fixed size per batch tile)
# -----------------------------------------------------------------------------
def _compact_table(NT, H, W, PH1, PW1, L1):
    """(NT*H*W, L1): select the max-pooled conv1 base lanes into a dense slab."""
    C = np.zeros((NT * H * W, L1), np.float32)
    for n in range(NT):
        for ph in range(PH1):
            for pw in range(PW1):
                C[n * H * W + 2 * ph * W + 2 * pw,
                  n * PH1 * PW1 + ph * PW1 + pw] = 1.0
    return C


def _conv2_gather_table(NT, PH1, PW1, K2, PH2, PW2, L1, B2):
    """(L1, 9*B2): conv2 im2col columns, one 128-lane block per kernel offset,
    with the four 2x2 pool-window positions P2 lanes apart inside each block."""
    P2 = NT * PH2 * PW2
    S = np.zeros((L1, K2 * K2 * B2), np.float32)
    for ki in range(K2):
        for kj in range(K2):
            kk = ki * K2 + kj
            for qi in range(2):
                for qj in range(2):
                    q = 2 * qi + qj
                    for n in range(NT):
                        for ph in range(PH2):
                            for pw in range(PW2):
                                src = (n * PH1 * PW1
                                       + (2 * ph + qi + ki) * PW1
                                       + (2 * pw + qj + kj))
                                dst = kk * B2 + q * P2 + n * PH2 * PW2 + ph * PW2 + pw
                                S[src, dst] = 1.0
    return S


def _flatten_gather_table(NT, S2, B2, LF):
    """(B2, S2*LF): regroup the pooled conv2 columns into S2 batch-on-lanes slabs."""
    M = np.zeros((B2, S2 * LF), np.float32)
    for s in range(S2):
        for n in range(NT):
            M[n * S2 + s, s * LF + n] = 1.0
    return M


# -----------------------------------------------------------------------------
# Forward
# -----------------------------------------------------------------------------
@jax.jit
def dgr_encoder_forward(x, params):
    N, C_in, H, W = x.shape
    cw1, cb1 = params["cw1"], params["cb1"]        # (36,3,4,4), (36,)
    cw2, cb2 = params["cw2"], params["cb2"]        # (48,36,3,3), (48,)
    fw1, fb1 = params["fw1"], params["fb1"]        # (192,64), (64,)
    fw2, fb2 = params["fw2"], params["fb2"]        # (64,32),  (32,)

    C1, _, K1, _ = cw1.shape                        # 36, 3, 4
    C2, _, K2, _ = cw2.shape                        # 48, 36, 3
    DH, DE = fw1.shape[1], fw2.shape[1]             # 64, 32
    C1P = _round_up(C1, 48)                         # pad conv1 out-ch 36 -> 48

    # per-tile geometry
    NT = _TILE_N
    G = pl.cdiv(N, NT)
    PH1, PW1 = (H - K1 + 1) // 2, (W - K1 + 1) // 2          # 6, 6
    PH2, PW2 = (PH1 - K2 + 1) // 2, (PW1 - K2 + 1) // 2      # 2, 2
    S2 = PH2 * PW2                                            # 4
    NHW = NT * H * W                                          # 512
    XL = _round_up(NHW + (K1 - 1) * W + (K1 - 1), 128)        # 640
    L1 = _round_up(NT * PH1 * PW1, 128)                       # 128
    P2 = NT * PH2 * PW2                                       # 8
    B2 = _round_up(4 * P2, 128)                               # 128
    LF = _round_up(NT, 128)                                   # 128
    WL = max(K1 * K1 * 8, K2 * K2 * C1P, S2 * C2, DH)         # 432
    assert C_in <= 8 and L1 == B2 == LF == 128, "increase lane slabs for this tile_n"

    # ---- weights / biases packed into 2 DMA slabs (f32, MXU-friendly layouts)
    w1r = jnp.pad(cw1.transpose(0, 2, 3, 1),
                  ((0, C1P - C1), (0, 0), (0, 0), (0, 8 - C_in))
                  ).reshape(C1P, K1 * K1 * 8)                        # (48, 128)
    w2p = jnp.pad(cw2.transpose(0, 2, 3, 1),
                  ((0, 0), (0, 0), (0, 0), (0, C1P - C1))
                  ).reshape(C2, K2 * K2 * C1P)                       # (48, 432)
    fw1r = fw1.reshape(C2, S2, DH).transpose(1, 0, 2).reshape(S2 * C2, DH).T  # (64,192)
    fw2t = fw2.T                                                      # (32, 64)

    def _lp(w):  # pad lanes to the common slab width
        return jnp.pad(w, ((0, 0), (0, WL - w.shape[1])))

    w_all = jnp.concatenate([_lp(w1r), _lp(w2p), _lp(fw1r), _lp(fw2t)],
                            axis=0).astype(jnp.float32)              # (192, 432)
    b_all = jnp.concatenate([jnp.pad(cb1, (0, C1P - C1)), cb2, fb1, fb2]
                            ).reshape(-1, 1).astype(jnp.float32)      # (192, 1)

    # ---- constant gather tables (per-tile, independent of total batch N)
    cmp_t = jnp.asarray(_compact_table(NT, H, W, PH1, PW1, L1))       # (512, 128)
    tab = jnp.asarray(np.concatenate(
        [_conv2_gather_table(NT, PH1, PW1, K2, PH2, PW2, L1, B2),
         _flatten_gather_table(NT, S2, B2, LF)], axis=1))             # (128, 1664)

    # ---- input: one reshape per tile, read once, no im2col duplication on host
    xp = x.astype(jnp.float32)
    if G * NT != N:
        xp = jnp.pad(xp, ((0, G * NT - N), (0, 0), (0, 0), (0, 0)))
    xf = xp.reshape(G, NT, C_in, H * W).transpose(0, 2, 1, 3).reshape(G, C_in, NHW)
    xf = jnp.pad(xf, ((0, 0), (0, 8 - C_in), (0, XL - NHW)))          # (G, 8, 640)

    kernel = _build_kernel(K1, K2, W, NHW, L1, B2, LF, P2, C1P, C2, DH, DE, S2)

    flops = 2 * G * (C1P * (K1 * K1 * 8) * NHW      # conv1
                     + C1P * NHW * L1               # pool compaction gather
                     + C1P * L1 * (K2 * K2 * B2)    # conv2 im2col gather
                     + C2 * (K2 * K2 * C1P) * B2    # conv2
                     + C2 * B2 * (S2 * LF)          # flatten gather
                     + DH * (S2 * C2) * LF          # fc1
                     + DE * DH * LF)                # fc2
    bytes_accessed = 4 * (xf.size + w_all.size + b_all.size
                          + cmp_t.size + tab.size + G * DE * LF)

    out = pl.pallas_call(
        kernel,
        out_shape=jax.ShapeDtypeStruct((G, DE, LF), jnp.float32),
        grid=(G,),
        in_specs=[
            pl.BlockSpec((1, 8, XL), lambda g: (g, 0, 0)),
            pl.BlockSpec(w_all.shape, lambda g: (0, 0)),
            pl.BlockSpec(b_all.shape, lambda g: (0, 0)),
            pl.BlockSpec(cmp_t.shape, lambda g: (0, 0)),
            pl.BlockSpec(tab.shape, lambda g: (0, 0)),
        ],
        out_specs=pl.BlockSpec((1, DE, LF), lambda g: (g, 0, 0)),
        scratch_shapes=[
            pltpu.VMEM((K1 * K1 * 8, NHW), jnp.float32),   # conv1 shifted stack
            pltpu.VMEM((K2 * K2 * C1P, B2), jnp.float32),  # conv2 K=432 stack
            pltpu.VMEM((S2 * C2, LF), jnp.float32),        # fc1   K=192 stack
        ],
        compiler_params=pltpu.CompilerParams(
            dimension_semantics=("parallel",),             # v7x: 2 TCs split tiles
            vmem_limit_bytes=32 * 1024 * 1024,
        ),
        cost_estimate=pl.CostEstimate(flops=flops, transcendentals=0,
                                      bytes_accessed=bytes_accessed),
    )(xf, w_all, b_all, cmp_t, tab)

    # drop padded batch lanes, return PyTorch's (N, d_enc) orientation
    return out.transpose(0, 2, 1)[:, :NT, :].reshape(G * NT, DE)[:N]


# -----------------------------------------------------------------------------
# Pure-JAX f32 reference (correctness check only)
# -----------------------------------------------------------------------------
def _ref_forward(x, p):
    def convblock(z, w, b):
        z = lax.conv_general_dilated(z, w, (1, 1), "VALID",
                                     dimension_numbers=("NCHW", "OIHW", "NCHW"))
        z = jnp.maximum(z + b[None, :, None, None], 0.0)
        z = lax.reduce_window(z, -jnp.inf, lax.max, (1, 1, 2, 2), (1, 1, 2, 2), "VALID")
        return z

    z = convblock(x, p["cw1"], p["cb1"])
    z = convblock(z, p["cw2"], p["cb2"])
    z = z.reshape(z.shape[0], -1)
    z = jnp.maximum(z @ p["fw1"] + p["fb1"], 0.0)
    z = jnp.maximum(z @ p["fw2"] + p["fb2"], 0.0)
    return z


# -----------------------------------------------------------------------------
if __name__ == "__main__":
    # Shapes implied by the module: instances (2,3,16,16) -> conv1 -> (2,36,6,6)
    # -> conv2 -> (2,48,2,2); d_in = 192, ds_enc_hid = (64,), d_enc = 32.
    key = jax.random.PRNGKey(0)
    ks = jax.random.split(key, 9)
    x = jax.random.normal(ks[0], (2, 3, 16, 16), jnp.float32)

    params = {
        "cw1": jax.random.normal(ks[1], (36, 3, 4, 4), jnp.float32) * 0.10,
        "cb1": jax.random.normal(ks[2], (36,), jnp.float32) * 0.10,
        "cw2": jax.random.normal(ks[3], (48, 36, 3, 3), jnp.float32) * 0.05,
        "cb2": jax.random.normal(ks[4], (48,), jnp.float32) * 0.05,
        "fw1": jax.random.normal(ks[5], (192, 64), jnp.float32) * 0.05,
        "fb1": jax.random.normal(ks[6], (64,), jnp.float32) * 0.05,
        "fw2": jax.random.normal(ks[7], (64, 32), jnp.float32) * 0.05,
        "fb2": jax.random.normal(ks[8], (32,), jnp.float32) * 0.05,
    }

    out = jax.block_until_ready(dgr_encoder_forward(x, params))
    ref = jax.block_until_ready(_ref_forward(x, params))

    err = float(jnp.max(jnp.abs(out - ref)))
    assert out.shape == (2, 32), out.shape
    # All math is f32; an indexing / layout bug would produce errors O(0.1-1).
    if err < 2e-2:
        print("KERNEL_OK")
    else:
        print(f"MISMATCH max_abs_err={err}")
</pallas_src>

<mosaic_0001>
module attributes {stable_mosaic.version = 11 : i64} {
  func.func @kernel(%arg0: i32, %arg1: memref<1x8x640xf32, #tpu.memory_space<vmem>>, %arg2: memref<192x432xf32, #tpu.memory_space<vmem>>, %arg3: memref<192x1xf32, #tpu.memory_space<vmem>>, %arg4: memref<512x128xf32, #tpu.memory_space<vmem>>, %arg5: memref<128x1664xf32, #tpu.memory_space<vmem>>, %arg6: memref<1x32x128xf32, #tpu.memory_space<vmem>>, %arg7: memref<128x512xf32, #tpu.memory_space<vmem>>, %arg8: memref<432x128xf32, #tpu.memory_space<vmem>>, %arg9: memref<192x128xf32, #tpu.memory_space<vmem>>) attributes {dimension_semantics = [#tpu.dimension_semantics<parallel>], iteration_bounds = array<i64: 1>, scalar_prefetch = 0 : i64, scratch_operands = 3 : i64, tpu.core_type = #tpu.core_type<tc>, window_params = [{transform_indices = @transform_0, window_bounds = array<i64: 1, 8, 640>}, {pipeline_mode = #tpu.pipeline_mode<synchronous>, transform_indices = @transform_1, window_bounds = array<i64: 192, 432>}, {pipeline_mode = #tpu.pipeline_mode<synchronous>, transform_indices = @transform_2, window_bounds = array<i64: 192, 1>}, {pipeline_mode = #tpu.pipeline_mode<synchronous>, transform_indices = @transform_3, window_bounds = array<i64: 512, 128>}, {pipeline_mode = #tpu.pipeline_mode<synchronous>, transform_indices = @transform_4, window_bounds = array<i64: 128, 1664>}, {transform_indices = @transform_5, window_bounds = array<i64: 1, 32, 128>}]} {
    %c0 = arith.constant 0 : index
    %c0_0 = arith.constant 0 : index
    %c0_1 = arith.constant 0 : index
    %0 = vector.load %arg1[%c0, %c0_0, %c0_1] : memref<1x8x640xf32, #tpu.memory_space<vmem>>, vector<1x8x640xf32>
    %1 = vector.shape_cast %0 : vector<1x8x640xf32> to vector<8x640xf32>
    %2 = vector.extract_strided_slice %1 {offsets = [0, 0], sizes = [8, 512], strides = [1, 1]} : vector<8x640xf32> to vector<8x512xf32>
    %c0_2 = arith.constant 0 : index
    %c0_3 = arith.constant 0 : index
    %3 = vector.load %arg7[%c0_2, %c0_3] : memref<128x512xf32, #tpu.memory_space<vmem>>, vector<8x512xf32>
    tpu.vector_store %arg7[%c0_2, %c0_3], %2 {strides = array<i32>} : memref<128x512xf32, #tpu.memory_space<vmem>>, vector<8x512xf32>,
    %4 = vector.extract_strided_slice %1 {offsets = [0, 1], sizes = [8, 512], strides = [1, 1]} : vector<8x640xf32> to vector<8x512xf32>
    %c8 = arith.constant 8 : index
    %c0_4 = arith.constant 0 : index
    %5 = vector.load %arg7[%c8, %c0_4] : memref<128x512xf32, #tpu.memory_space<vmem>>, vector<8x512xf32>
    tpu.vector_store %arg7[%c8, %c0_4], %4 {strides = array<i32>} : memref<128x512xf32, #tpu.memory_space<vmem>>, vector<8x512xf32>,
    %6 = vector.extract_strided_slice %1 {offsets = [0, 2], sizes = [8, 512], strides = [1, 1]} : vector<8x640xf32> to vector<8x512xf32>
    %c16 = arith.constant 16 : index
    %c0_5 = arith.constant 0 : index
    %7 = vector.load %arg7[%c16, %c0_5] : memref<128x512xf32, #tpu.memory_space<vmem>>, vector<8x512xf32>
    tpu.vector_store %arg7[%c16, %c0_5], %6 {strides = array<i32>} : memref<128x512xf32, #tpu.memory_space<vmem>>, vector<8x512xf32>,
    %8 = vector.extract_strided_slice %1 {offsets = [0, 3], sizes = [8, 512], strides = [1, 1]} : vector<8x640xf32> to vector<8x512xf32>
    %c24 = arith.constant 24 : index
    %c0_6 = arith.constant 0 : index
    %9 = vector.load %arg7[%c24, %c0_6] : memref<128x512xf32, #tpu.memory_space<vmem>>, vector<8x512xf32>
    tpu.vector_store %arg7[%c24, %c0_6], %8 {strides = array<i32>} : memref<128x512xf32, #tpu.memory_space<vmem>>, vector<8x512xf32>,
    %10 = vector.extract_strided_slice %1 {offsets = [0, 16], sizes = [8, 512], strides = [1, 1]} : vector<8x640xf32> to vector<8x512xf32>
    %c32 = arith.constant 32 : index
    %c0_7 = arith.constant 0 : index
    %11 = vector.load %arg7[%c32, %c0_7] : memref<128x512xf32, #tpu.memory_space<vmem>>, vector<8x512xf32>
    tpu.vector_store %arg7[%c32, %c0_7], %10 {strides = array<i32>} : memref<128x512xf32, #tpu.memory_space<vmem>>, vector<8x512xf32>,
    %12 = vector.extract_strided_slice %1 {offsets = [0, 17], sizes = [8, 512], strides = [1, 1]} : vector<8x640xf32> to vector<8x512xf32>
    %c40 = arith.constant 40 : index
    %c0_8 = arith.constant 0 : index
    %13 = vector.load %arg7[%c40, %c0_8] : memref<128x512xf32, #tpu.memory_space<vmem>>, vector<8x512xf32>
    tpu.vector_store %arg7[%c40, %c0_8], %12 {strides = array<i32>} : memref<128x512xf32, #tpu.memory_space<vmem>>, vector<8x512xf32>,
    %14 = vector.extract_strided_slice %1 {offsets = [0, 18], sizes = [8, 512], strides = [1, 1]} : vector<8x640xf32> to vector<8x512xf32>
    %c48 = arith.constant 48 : index
    %c0_9 = arith.constant 0 : index
    %15 = vector.load %arg7[%c48, %c0_9] : memref<128x512xf32, #tpu.memory_space<vmem>>, vector<8x512xf32>
    tpu.vector_store %arg7[%c48, %c0_9], %14 {strides = array<i32>} : memref<128x512xf32, #tpu.memory_space<vmem>>, vector<8x512xf32>,
    %16 = vector.extract_strided_slice %1 {offsets = [0, 19], sizes = [8, 512], strides = [1, 1]} : vector<8x640xf32> to vector<8x512xf32>
    %c56 = arith.constant 56 : index
    %c0_10 = arith.constant 0 : index
    %17 = vector.load %arg7[%c56, %c0_10] : memref<128x512xf32, #tpu.memory_space<vmem>>, vector<8x512xf32>
    tpu.vector_store %arg7[%c56, %c0_10], %16 {strides = array<i32>} : memref<128x512xf32, #tpu.memory_space<vmem>>, vector<8x512xf32>,
    %18 = vector.extract_strided_slice %1 {offsets = [0, 32], sizes = [8, 512], strides = [1, 1]} : vector<8x640xf32> to vector<8x512xf32>
    %c64 = arith.constant 64 : index
    %c0_11 = arith.constant 0 : index
    %19 = vector.load %arg7[%c64, %c0_11] : memref<128x512xf32, #tpu.memory_space<vmem>>, vector<8x512xf32>
    tpu.vector_store %arg7[%c64, %c0_11], %18 {strides = array<i32>} : memref<128x512xf32, #tpu.memory_space<vmem>>, vector<8x512xf32>,
    %20 = vector.extract_strided_slice %1 {offsets = [0, 33], sizes = [8, 512], strides = [1, 1]} : vector<8x640xf32> to vector<8x512xf32>
    %c72 = arith.constant 72 : index
    %c0_12 = arith.constant 0 : index
    %21 = vector.load %arg7[%c72, %c0_12] : memref<128x512xf32, #tpu.memory_space<vmem>>, vector<8x512xf32>
    tpu.vector_store %arg7[%c72, %c0_12], %20 {strides = array<i32>} : memref<128x512xf32, #tpu.memory_space<vmem>>, vector<8x512xf32>,
    %22 = vector.extract_strided_slice %1 {offsets = [0, 34], sizes = [8, 512], strides = [1, 1]} : vector<8x640xf32> to vector<8x512xf32>
    %c80 = arith.constant 80 : index
    %c0_13 = arith.constant 0 : index
    %23 = vector.load %arg7[%c80, %c0_13] : memref<128x512xf32, #tpu.memory_space<vmem>>, vector<8x512xf32>
    tpu.vector_store %arg7[%c80, %c0_13], %22 {strides = array<i32>} : memref<128x512xf32, #tpu.memory_space<vmem>>, vector<8x512xf32>,
    %24 = vector.extract_strided_slice %1 {offsets = [0, 35], sizes = [8, 512], strides = [1, 1]} : vector<8x640xf32> to vector<8x512xf32>
    %c88 = arith.constant 88 : index
    %c0_14 = arith.constant 0 : index
    %25 = vector.load %arg7[%c88, %c0_14] : memref<128x512xf32, #tpu.memory_space<vmem>>, vector<8x512xf32>
    tpu.vector_store %arg7[%c88, %c0_14], %24 {strides = array<i32>} : memref<128x512xf32, #tpu.memory_space<vmem>>, vector<8x512xf32>,
    %26 = vector.extract_strided_slice %1 {offsets = [0, 48], sizes = [8, 512], strides = [1, 1]} : vector<8x640xf32> to vector<8x512xf32>
    %c96 = arith.constant 96 : index
    %c0_15 = arith.constant 0 : index
    %27 = vector.load %arg7[%c96, %c0_15] : memref<128x512xf32, #tpu.memory_space<vmem>>, vector<8x512xf32>
    tpu.vector_store %arg7[%c96, %c0_15], %26 {strides = array<i32>} : memref<128x512xf32, #tpu.memory_space<vmem>>, vector<8x512xf32>,
    %28 = vector.extract_strided_slice %1 {offsets = [0, 49], sizes = [8, 512], strides = [1, 1]} : vector<8x640xf32> to vector<8x512xf32>
    %c104 = arith.constant 104 : index
    %c0_16 = arith.constant 0 : index
    %29 = vector.load %arg7[%c104, %c0_16] : memref<128x512xf32, #tpu.memory_space<vmem>>, vector<8x512xf32>
    tpu.vector_store %arg7[%c104, %c0_16], %28 {strides = array<i32>} : memref<128x512xf32, #tpu.memory_space<vmem>>, vector<8x512xf32>,
    %30 = vector.extract_strided_slice %1 {offsets = [0, 50], sizes = [8, 512], strides = [1, 1]} : vector<8x640xf32> to vector<8x512xf32>
    %c112 = arith.constant 112 : index
    %c0_17 = arith.constant 0 : index
    %31 = vector.load %arg7[%c112, %c0_17] : memref<128x512xf32, #tpu.memory_space<vmem>>, vector<8x512xf32>
    tpu.vector_store %arg7[%c112, %c0_17], %30 {strides = array<i32>} : memref<128x512xf32, #tpu.memory_space<vmem>>, vector<8x512xf32>,
    %32 = vector.extract_strided_slice %1 {offsets = [0, 51], sizes = [8, 512], strides = [1, 1]} : vector<8x640xf32> to vector<8x512xf32>
    %c120 = arith.constant 120 : index
    %c0_18 = arith.constant 0 : index
    %33 = vector.load %arg7[%c120, %c0_18] : memref<128x512xf32, #tpu.memory_space<vmem>>, vector<8x512xf32>
    tpu.vector_store %arg7[%c120, %c0_18], %32 {strides = array<i32>} : memref<128x512xf32, #tpu.memory_space<vmem>>, vector<8x512xf32>,
    %c0_19 = arith.constant 0 : index
    %c0_20 = arith.constant 0 : index
    %34 = vector.load %arg2[%c0_19, %c0_20] : memref<192x432xf32, #tpu.memory_space<vmem>>, vector<48x128xf32>
    %c0_21 = arith.constant 0 : index
    %c0_22 = arith.constant 0 : index
    %35 = vector.load %arg7[%c0_21, %c0_22] : memref<128x512xf32, #tpu.memory_space<vmem>>, vector<128x512xf32>
    %cst = arith.constant dense<0.000000e+00> : vector<48x512xf32>
    %36 = tpu.matmul %34, %35, %cst {dimension_numbers = #tpu.dot_dimension_numbers<[1], [0], [0], [1], [0, 0, 1, 1], [], []>} : vector<48x128xf32>, vector<128x512xf32>, vector<48x512xf32> -> vector<48x512xf32>
    %37 = vector.extract_strided_slice %36 {offsets = [0, 1], sizes = [48, 511], strides = [1, 1]} : vector<48x512xf32> to vector<48x511xf32>
    %38 = vector.extract_strided_slice %36 {offsets = [0, 0], sizes = [48, 1], strides = [1, 1]} : vector<48x512xf32> to vector<48x1xf32>
    %39 = tpu.concatenate %37, %38 in 1 : vector<48x511xf32>, vector<48x1xf32> -> vector<48x512xf32>
    %40 = arith.maximumf %36, %39 : vector<48x512xf32>
    %41 = vector.extract_strided_slice %40 {offsets = [0, 16], sizes = [48, 496], strides = [1, 1]} : vector<48x512xf32> to vector<48x496xf32>
    %42 = vector.extract_strided_slice %40 {offsets = [0, 0], sizes = [48, 16], strides = [1, 1]} : vector<48x512xf32> to vector<48x16xf32>
    %43 = tpu.concatenate %41, %42 in 1 : vector<48x496xf32>, vector<48x16xf32> -> vector<48x512xf32>
    %44 = arith.maximumf %40, %43 : vector<48x512xf32>
    %c0_23 = arith.constant 0 : index
    %c0_24 = arith.constant 0 : index
    %45 = vector.load %arg4[%c0_23, %c0_24] : memref<512x128xf32, #tpu.memory_space<vmem>>, vector<512x128xf32>
    %cst_25 = arith.constant dense<0.000000e+00> : vector<48x128xf32>
    %46 = tpu.matmul %44, %45, %cst_25 {dimension_numbers = #tpu.dot_dimension_numbers<[1], [0], [0], [1], [0, 0, 1, 1], [], []>} : vector<48x512xf32>, vector<512x128xf32>, vector<48x128xf32> -> vector<48x128xf32>
    %c0_26 = arith.constant 0 : index
    %c0_27 = arith.constant 0 : index
    %47 = vector.load %arg3[%c0_26, %c0_27] : memref<192x1xf32, #tpu.memory_space<vmem>>, vector<48x1xf32>
    %48 = vector.broadcast %47 : vector<48x1xf32> to vector<48x128xf32>
    %49 = arith.addf %46, %48 : vector<48x128xf32>
    %cst_28 = arith.constant 0.000000e+00 : f32
    %50 = vector.broadcast %cst_28 : f32 to vector<48x128xf32>
    %51 = arith.maximumf %49, %50 : vector<48x128xf32>
    %c0_29 = arith.constant 0 : index
    %c0_30 = arith.constant 0 : index
    %52 = vector.load %arg5[%c0_29, %c0_30] : memref<128x1664xf32, #tpu.memory_space<vmem>>, vector<128x1152xf32>
    %cst_31 = arith.constant dense<0.000000e+00> : vector<48x1152xf32>
    %53 = tpu.matmul %51, %52, %cst_31 {dimension_numbers = #tpu.dot_dimension_numbers<[1], [0], [0], [1], [0, 0, 1, 1], [], []>} : vector<48x128xf32>, vector<128x1152xf32>, vector<48x1152xf32> -> vector<48x1152xf32>
    %54 = vector.extract_strided_slice %53 {offsets = [0, 0], sizes = [48, 128], strides = [1, 1]} : vector<48x1152xf32> to vector<48x128xf32>
    %c0_32 = arith.constant 0 : index
    %c0_33 = arith.constant 0 : index
    %55 = vector.load %arg8[%c0_32, %c0_33] : memref<432x128xf32, #tpu.memory_space<vmem>>, vector<48x128xf32>
    tpu.vector_store %arg8[%c0_32, %c0_33], %54 {strides = array<i32>} : memref<432x128xf32, #tpu.memory_space<vmem>>, vector<48x128xf32>,
    %56 = vector.extract_strided_slice %53 {offsets = [0, 128], sizes = [48, 128], strides = [1, 1]} : vector<48x1152xf32> to vector<48x128xf32>
    %c48_34 = arith.constant 48 : index
    %c0_35 = arith.constant 0 : index
    %57 = vector.load %arg8[%c48_34, %c0_35] : memref<432x128xf32, #tpu.memory_space<vmem>>, vector<48x128xf32>
    tpu.vector_store %arg8[%c48_34, %c0_35], %56 {strides = array<i32>} : memref<432x128xf32, #tpu.memory_space<vmem>>, vector<48x128xf32>,
    %58 = vector.extract_strided_slice %53 {offsets = [0, 256], sizes = [48, 128], strides = [1, 1]} : vector<48x1152xf32> to vector<48x128xf32>
    %c96_36 = arith.constant 96 : index
    %c0_37 = arith.constant 0 : index
    %59 = vector.load %arg8[%c96_36, %c0_37] : memref<432x128xf32, #tpu.memory_space<vmem>>, vector<48x128xf32>
    tpu.vector_store %arg8[%c96_36, %c0_37], %58 {strides = array<i32>} : memref<432x128xf32, #tpu.memory_space<vmem>>, vector<48x128xf32>,
    %60 = vector.extract_strided_slice %53 {offsets = [0, 384], sizes = [48, 128], strides = [1, 1]} : vector<48x1152xf32> to vector<48x128xf32>
    %c144 = arith.constant 144 : index
    %c0_38 = arith.constant 0 : index
    %61 = vector.load %arg8[%c144, %c0_38] : memref<432x128xf32, #tpu.memory_space<vmem>>, vector<48x128xf32>
    tpu.vector_store %arg8[%c144, %c0_38], %60 {strides = array<i32>} : memref<432x128xf32, #tpu.memory_space<vmem>>, vector<48x128xf32>,
    %62 = vector.extract_strided_slice %53 {offsets = [0, 512], sizes = [48, 128], strides = [1, 1]} : vector<48x1152xf32> to vector<48x128xf32>
    %c192 = arith.constant 192 : index
    %c0_39 = arith.constant 0 : index
    %63 = vector.load %arg8[%c192, %c0_39] : memref<432x128xf32, #tpu.memory_space<vmem>>, vector<48x128xf32>
    tpu.vector_store %arg8[%c192, %c0_39], %62 {strides = array<i32>} : memref<432x128xf32, #tpu.memory_space<vmem>>, vector<48x128xf32>,
    %64 = vector.extract_strided_slice %53 {offsets = [0, 640], sizes = [48, 128], strides = [1, 1]} : vector<48x1152xf32> to vector<48x128xf32>
    %c240 = arith.constant 240 : index
    %c0_40 = arith.constant 0 : index
    %65 = vector.load %arg8[%c240, %c0_40] : memref<432x128xf32, #tpu.memory_space<vmem>>, vector<48x128xf32>
    tpu.vector_store %arg8[%c240, %c0_40], %64 {strides = array<i32>} : memref<432x128xf32, #tpu.memory_space<vmem>>, vector<48x128xf32>,
    %66 = vector.extract_strided_slice %53 {offsets = [0, 768], sizes = [48, 128], strides = [1, 1]} : vector<48x1152xf32> to vector<48x128xf32>
    %c288 = arith.constant 288 : index
    %c0_41 = arith.constant 0 : index
    %67 = vector.load %arg8[%c288, %c0_41] : memref<432x128xf32, #tpu.memory_space<vmem>>, vector<48x128xf32>
    tpu.vector_store %arg8[%c288, %c0_41], %66 {strides = array<i32>} : memref<432x128xf32, #tpu.memory_space<vmem>>, vector<48x128xf32>,
    %68 = vector.extract_strided_slice %53 {offsets = [0, 896], sizes = [48, 128], strides = [1, 1]} : vector<48x1152xf32> to vector<48x128xf32>
    %c336 = arith.constant 336 : index
    %c0_42 = arith.constant 0 : index
    %69 = vector.load %arg8[%c336, %c0_42] : memref<432x128xf32, #tpu.memory_space<vmem>>, vector<48x128xf32>
    tpu.vector_store %arg8[%c336, %c0_42], %68 {strides = array<i32>} : memref<432x128xf32, #tpu.memory_space<vmem>>, vector<48x128xf32>,
    %70 = vector.extract_strided_slice %53 {offsets = [0, 1024], sizes = [48, 128], strides = [1, 1]} : vector<48x1152xf32> to vector<48x128xf32>
    %c384 = arith.constant 384 : index
    %c0_43 = arith.constant 0 : index
    %71 = vector.load %arg8[%c384, %c0_43] : memref<432x128xf32, #tpu.memory_space<vmem>>, vector<48x128xf32>
    tpu.vector_store %arg8[%c384, %c0_43], %70 {strides = array<i32>} : memref<432x128xf32, #tpu.memory_space<vmem>>, vector<48x128xf32>,
    %c48_44 = arith.constant 48 : index
    %c0_45 = arith.constant 0 : index
    %72 = vector.load %arg2[%c48_44, %c0_45] : memref<192x432xf32, #tpu.memory_space<vmem>>, vector<48x432xf32>
    %c0_46 = arith.constant 0 : index
    %c0_47 = arith.constant 0 : index
    %73 = vector.load %arg8[%c0_46, %c0_47] : memref<432x128xf32, #tpu.memory_space<vmem>>, vector<432x128xf32>
    %cst_48 = arith.constant dense<0.000000e+00> : vector<48x128xf32>
    %74 = tpu.matmul %72, %73, %cst_48 {dimension_numbers = #tpu.dot_dimension_numbers<[1], [0], [0], [1], [0, 0, 1, 1], [], []>} : vector<48x432xf32>, vector<432x128xf32>, vector<48x128xf32> -> vector<48x128xf32>
    %75 = vector.extract_strided_slice %74 {offsets = [0, 16], sizes = [48, 112], strides = [1, 1]} : vector<48x128xf32> to vector<48x112xf32>
    %76 = vector.extract_strided_slice %74 {offsets = [0, 0], sizes = [48, 16], strides = [1, 1]} : vector<48x128xf32> to vector<48x16xf32>
    %77 = tpu.concatenate %75, %76 in 1 : vector<48x112xf32>, vector<48x16xf32> -> vector<48x128xf32>
    %78 = arith.maximumf %74, %77 : vector<48x128xf32>
    %79 = vector.extract_strided_slice %78 {offsets = [0, 8], sizes = [48, 120], strides = [1, 1]} : vector<48x128xf32> to vector<48x120xf32>
    %80 = vector.extract_strided_slice %78 {offsets = [0, 0], sizes = [48, 8], strides = [1, 1]} : vector<48x128xf32> to vector<48x8xf32>
    %81 = tpu.concatenate %79, %80 in 1 : vector<48x120xf32>, vector<48x8xf32> -> vector<48x128xf32>
    %82 = arith.maximumf %78, %81 : vector<48x128xf32>
    %c48_49 = arith.constant 48 : index
    %c0_50 = arith.constant 0 : index
    %83 = vector.load %arg3[%c48_49, %c0_50] : memref<192x1xf32, #tpu.memory_space<vmem>>, vector<48x1xf32>
    %84 = vector.broadcast %83 : vector<48x1xf32> to vector<48x128xf32>
    %85 = arith.addf %82, %84 : vector<48x128xf32>
    %cst_51 = arith.constant 0.000000e+00 : f32
    %86 = vector.broadcast %cst_51 : f32 to vector<48x128xf32>
    %87 = arith.maximumf %85, %86 : vector<48x128xf32>
    %c0_52 = arith.constant 0 : index
    %c1152 = arith.constant 1152 : index
    %88 = vector.load %arg5[%c0_52, %c1152] : memref<128x1664xf32, #tpu.memory_space<vmem>>, vector<128x512xf32>
    %cst_53 = arith.constant dense<0.000000e+00> : vector<48x512xf32>
    %89 = tpu.matmul %87, %88, %cst_53 {dimension_numbers = #tpu.dot_dimension_numbers<[1], [0], [0], [1], [0, 0, 1, 1], [], []>} : vector<48x128xf32>, vector<128x512xf32>, vector<48x512xf32> -> vector<48x512xf32>
    %90 = vector.extract_strided_slice %89 {offsets = [0, 0], sizes = [48, 128], strides = [1, 1]} : vector<48x512xf32> to vector<48x128xf32>
    %c0_54 = arith.constant 0 : index
    %c0_55 = arith.constant 0 : index
    %91 = vector.load %arg9[%c0_54, %c0_55] : memref<192x128xf32, #tpu.memory_space<vmem>>, vector<48x128xf32>
    tpu.vector_store %arg9[%c0_54, %c0_55], %90 {strides = array<i32>} : memref<192x128xf32, #tpu.memory_space<vmem>>, vector<48x128xf32>,
    %92 = vector.extract_strided_slice %89 {offsets = [0, 128], sizes = [48, 128], strides = [1, 1]} : vector<48x512xf32> to vector<48x128xf32>
    %c48_56 = arith.constant 48 : index
    %c0_57 = arith.constant 0 : index
    %93 = vector.load %arg9[%c48_56, %c0_57] : memref<192x128xf32, #tpu.memory_space<vmem>>, vector<48x128xf32>
    tpu.vector_store %arg9[%c48_56, %c0_57], %92 {strides = array<i32>} : memref<192x128xf32, #tpu.memory_space<vmem>>, vector<48x128xf32>,
    %94 = vector.extract_strided_slice %89 {offsets = [0, 256], sizes = [48, 128], strides = [1, 1]} : vector<48x512xf32> to vector<48x128xf32>
    %c96_58 = arith.constant 96 : index
    %c0_59 = arith.constant 0 : index
    %95 = vector.load %arg9[%c96_58, %c0_59] : memref<192x128xf32, #tpu.memory_space<vmem>>, vector<48x128xf32>
    tpu.vector_store %arg9[%c96_58, %c0_59], %94 {strides = array<i32>} : memref<192x128xf32, #tpu.memory_space<vmem>>, vector<48x128xf32>,
    %96 = vector.extract_strided_slice %89 {offsets = [0, 384], sizes = [48, 128], strides = [1, 1]} : vector<48x512xf32> to vector<48x128xf32>
    %c144_60 = arith.constant 144 : index
    %c0_61 = arith.constant 0 : index
    %97 = vector.load %arg9[%c144_60, %c0_61] : memref<192x128xf32, #tpu.memory_space<vmem>>, vector<48x128xf32>
    tpu.vector_store %arg9[%c144_60, %c0_61], %96 {strides = array<i32>} : memref<192x128xf32, #tpu.memory_space<vmem>>, vector<48x128xf32>,
    %c96_62 = arith.constant 96 : index
    %c0_63 = arith.constant 0 : index
    %98 = vector.load %arg2[%c96_62, %c0_63] : memref<192x432xf32, #tpu.memory_space<vmem>>, vector<64x192xf32>
    %c0_64 = arith.constant 0 : index
    %c0_65 = arith.constant 0 : index
    %99 = vector.load %arg9[%c0_64, %c0_65] : memref<192x128xf32, #tpu.memory_space<vmem>>, vector<192x128xf32>
    %cst_66 = arith.constant dense<0.000000e+00> : vector<64x128xf32>
    %100 = tpu.matmul %98, %99, %cst_66 {dimension_numbers = #tpu.dot_dimension_numbers<[1], [0], [0], [1], [0, 0, 1, 1], [], []>} : vector<64x192xf32>, vector<192x128xf32>, vector<64x128xf32> -> vector<64x128xf32>
    %c96_67 = arith.constant 96 : index
    %c0_68 = arith.constant 0 : index
    %101 = vector.load %arg3[%c96_67, %c0_68] : memref<192x1xf32, #tpu.memory_space<vmem>>, vector<64x1xf32>
    %102 = vector.broadcast %101 : vector<64x1xf32> to vector<64x128xf32>
    %103 = arith.addf %100, %102 : vector<64x128xf32>
    %cst_69 = arith.constant 0.000000e+00 : f32
    %104 = vector.broadcast %cst_69 : f32 to vector<64x128xf32>
    %105 = arith.maximumf %103, %104 : vector<64x128xf32>
    %c160 = arith.constant 160 : index
    %c0_70 = arith.constant 0 : index
    %106 = vector.load %arg2[%c160, %c0_70] : memref<192x432xf32, #tpu.memory_space<vmem>>, vector<32x64xf32>
    %cst_71 = arith.constant dense<0.000000e+00> : vector<32x128xf32>
    %107 = tpu.matmul %106, %105, %cst_71 {dimension_numbers = #tpu.dot_dimension_numbers<[1], [0], [0], [1], [0, 0, 1, 1], [], []>} : vector<32x64xf32>, vector<64x128xf32>, vector<32x128xf32> -> vector<32x128xf32>
    %c160_72 = arith.constant 160 : index
    %c0_73 = arith.constant 0 : index
    %108 = vector.load %arg3[%c160_72, %c0_73] : memref<192x1xf32, #tpu.memory_space<vmem>>, vector<32x1xf32>
    %109 = vector.broadcast %108 : vector<32x1xf32> to vector<32x128xf32>
    %110 = arith.addf %107, %109 : vector<32x128xf32>
    %cst_74 = arith.constant 0.000000e+00 : f32
    %111 = vector.broadcast %cst_74 : f32 to vector<32x128xf32>
    %112 = arith.maximumf %110, %111 : vector<32x128xf32>
    %c0_75 = arith.constant 0 : index
    %c0_76 = arith.constant 0 : index
    %c0_77 = arith.constant 0 : index
    %113 = vector.load %arg6[%c0_75, %c0_76, %c0_77] : memref<1x32x128xf32, #tpu.memory_space<vmem>>, vector<1x32x128xf32>
    %114 = vector.shape_cast %113 : vector<1x32x128xf32> to vector<32x128xf32>
    %115 = vector.shape_cast %112 : vector<32x128xf32> to vector<1x32x128xf32>
    tpu.vector_store %arg6[%c0_75, %c0_76, %c0_77], %115 {strides = array<i32>} : memref<1x32x128xf32, #tpu.memory_space<vmem>>, vector<1x32x128xf32>,
    return
  }
  func.func @transform_0(%arg0: i32) -> (i32, i32, i32) {
    %c0_i32 = arith.constant 0 : i32
    %c0_i32_0 = arith.constant 0 : i32
    %c0_i32_1 = arith.constant 0 : i32
    return %arg0, %c0_i32, %c0_i32_0 : i32, i32, i32
  }
  func.func @transform_1(%arg0: i32) -> (i32, i32) {
    %c0_i32 = arith.constant 0 : i32
    %c0_i32_0 = arith.constant 0 : i32
    %c0_i32_1 = arith.constant 0 : i32
    return %c0_i32, %c0_i32_0 : i32, i32
  }
  func.func @transform_2(%arg0: i32) -> (i32, i32) {
    %c0_i32 = arith.constant 0 : i32
    %c0_i32_0 = arith.constant 0 : i32
    %c0_i32_1 = arith.constant 0 : i32
    return %c0_i32, %c0_i32_0 : i32, i32
  }
  func.func @transform_3(%arg0: i32) -> (i32, i32) {
    %c0_i32 = arith.constant 0 : i32
    %c0_i32_0 = arith.constant 0 : i32
    %c0_i32_1 = arith.constant 0 : i32
    return %c0_i32, %c0_i32_0 : i32, i32
  }
  func.func @transform_4(%arg0: i32) -> (i32, i32) {
    %c0_i32 = arith.constant 0 : i32
    %c0_i32_0 = arith.constant 0 : i32
    %c0_i32_1 = arith.constant 0 : i32
    return %c0_i32, %c0_i32_0 : i32, i32
  }
  func.func @transform_5(%arg0: i32) -> (i32, i32, i32) {
    %c0_i32 = arith.constant 0 : i32
    %c0_i32_0 = arith.constant 0 : i32
    %c0_i32_1 = arith.constant 0 : i32
    return %arg0, %c0_i32, %c0_i32_0 : i32, i32, i32
  }
}

</mosaic_0001>

<bundles_post_ra>
// kernel: dgr_encoder_forward.1
= control target key start
LH: loop header
LB: loop body
LE: loop exit
PB: predicated region body
PF: predicated region fallthrough
CT: control target
= control target key end

     0   :  { %s2813_s22 = smov 79   ;;  %s2814_s23 = smov 78   ;;  %vm366_vm0 = vcmask 629760   ;;  %vm343_vm1 = vcmask 637952   ;;  %vm320_vm2 = vcmask 646144   ;;  %vm297_vm3 = vcmask 654336   ;;  %s4377_s0 = inlined_call_operand.vmem [shape: f32[1,8,640], index: 0, kind: input, shape index: {}]   ;;  %s4378_s1 = inlined_call_operand.vmem [shape: f32[192,432], index: 1, kind: input, shape index: {}]   ;;  %s4379_s3 = inlined_call_operand.vmem [shape: f32[512,128], index: 3, kind: input, shape index: {}]   ;;  %s4380_s2 = inlined_call_operand.vmem [shape: f32[192,1], index: 2, kind: input, shape index: {}]   ;;  %s4381_s4 = inlined_call_operand.vmem [shape: f32[128,1664], index: 4, kind: input, shape index: {}]   ;;  %s4382_s5 = inlined_call_operand.vmem [shape: f32[1,32,128], index: 5, kind: output, shape index: {}]  }
   0x1   :  { %v2863_v0 = vld [vmem:[%s4377_s0 + $0x10] sm:$0xff]  ;;  %v2868_v1 = vld [vmem:[%s4377_s0 + $0x18] sm:$0xff]  ;;  %s2815_s24 = smov 77   ;;  %v2875_v3 = vld [vmem:[%s4377_s0] sm:$0xff]  ;;  %s2816_s6 = smov 80   ;;  %vm274_vm4 = vcmask 760832  }
   0x2   :  { %v2560_v2 = vpack.i.bf16 %v2868_v1, %v2863_v0  ;;  %v24_v4 = vld [vmem:[%s4377_s0 + $0x20] sm:$0xff]  ;;  %v2884_v6 = vld [vmem:[%s4377_s0 + $0x8] sm:$0xff]  ;;  %s2817_s7 = smov 93   ;;  %s2818_s8 = smov 94   ;;  %vm251_vm5 = vcmask 769024   ;;  %vm228_vm6 = vcmask 777216  }
   0x3   :  { %v2565_v5 = vpack.i.bf16 %v2875_v3, %v24_v4  ;;  %s2819_s9 = smov 95   ;;  %s2820_s0 = smov 96   ;;  %v2685_v10 = vpack.i.bf16 %v2884_v6, %v2875_v3  ;;  %vm205_vm7 = vcmask 785408   ;;  %vm182_vm8 = vcmask 891904  }
   0x4   :  { %2561 = vrot.lane.b32.xlu2 %v2560_v2, %s2813_s22  ;;  %2551 = vrot.lane.b32.xlu1 %v2560_v2, %s2814_s23  ;;  %s2821_s10 = smov 109   ;;  %s2822_s11 = smov 110   ;;  %vm159_vm9 = vcmask 900096   ;;  %vm136_vm10 = vcmask 908288   ;;  %vm113_vm11 = vcmask 916480   ;;  %vm90_vm12 = vcmask 1022976  }
   0x5   :  { %2541 = vrot.lane.b32.xlu0 %v2560_v2, %s2815_s24  ;;  %s2823_s12 = smov 111   ;;  %s2824_s13 = smov 112   ;;  %vm67_vm13 = vcmask 1031168   ;;  %vm44_vm14 = vcmask 1039360   ;;  %vm1726_vm15 = vcmask 392192  }
   0x6   :  { %s2825_s14 = smov 125   ;;  %s2826_s15 = smov 126  }
   0x7   :  { %s2827_s16 = smov 127   ;;  %s2829_s18 = smov 120  }
   0xc   :  { %2566 = vrot.lane.b32.xlu2 %v2565_v5, %s2813_s22  ;;  %2556 = vrot.lane.b32.xlu1 %v2565_v5, %s2814_s23 }
   0xd   :  { %2546 = vrot.lane.b32.xlu0 %v2565_v5, %s2815_s24 }
  0x14   :  { %358 = vrot.lane.b32.xlu2 %v2884_v6, %s2815_s24  ;;  %2576 = vrot.lane.b32.xlu1 %v2565_v5, %s2816_s6 }
  0x15   :  { %2571 = vrot.lane.b32.xlu0 %v2560_v2, %s2816_s6 }
  0x1c   :  { %335 = vrot.lane.b32.xlu2 %v2884_v6, %s2814_s23  ;;  %2586 = vrot.lane.b32.xlu1 %v2565_v5, %s2817_s7 }
  0x1d   :  { %2581 = vrot.lane.b32.xlu0 %v2560_v2, %s2817_s7 }
  0x24   :  { %312 = vrot.lane.b32.xlu2 %v2884_v6, %s2813_s22  ;;  %2596 = vrot.lane.b32.xlu1 %v2565_v5, %s2818_s8 }
  0x25   :  { %2591 = vrot.lane.b32.xlu0 %v2560_v2, %s2818_s8 }
  0x2c   :  { %2606 = vrot.lane.b32.xlu1 %v2565_v5, %s2819_s9  ;;  %289 = vrot.lane.b32.xlu2 %v2884_v6, %s2816_s6 }
  0x2d   :  { %2601 = vrot.lane.b32.xlu0 %v2560_v2, %s2819_s9 }
  0x34   :  { %2616 = vrot.lane.b32.xlu1 %v2565_v5, %s2820_s0  ;;  %266 = vrot.lane.b32.xlu2 %v2884_v6, %s2817_s7 }
  0x35   :  { %2611 = vrot.lane.b32.xlu0 %v2560_v2, %s2820_s0 }
  0x3c   :  { %2626 = vrot.lane.b32.xlu1 %v2565_v5, %s2821_s10  ;;  %243 = vrot.lane.b32.xlu2 %v2884_v6, %s2818_s8 }
  0x3d   :  { %2621 = vrot.lane.b32.xlu0 %v2560_v2, %s2821_s10 }
  0x44   :  { %2636 = vrot.lane.b32.xlu1 %v2565_v5, %s2822_s11  ;;  %220 = vrot.lane.b32.xlu2 %v2884_v6, %s2819_s9 }
  0x45   :  { %2631 = vrot.lane.b32.xlu0 %v2560_v2, %s2822_s11 }
  0x4c   :  { %2646 = vrot.lane.b32.xlu1 %v2565_v5, %s2823_s12  ;;  %197 = vrot.lane.b32.xlu2 %v2884_v6, %s2820_s0 }
  0x4d   :  { %2641 = vrot.lane.b32.xlu0 %v2560_v2, %s2823_s12 }
  0x54   :  { %2656 = vrot.lane.b32.xlu1 %v2565_v5, %s2824_s13  ;;  %174 = vrot.lane.b32.xlu2 %v2884_v6, %s2821_s10 }
  0x55   :  { %2651 = vrot.lane.b32.xlu0 %v2560_v2, %s2824_s13 }
  0x5c   :  { %2666 = vrot.lane.b32.xlu1 %v2565_v5, %s2825_s14  ;;  %151 = vrot.lane.b32.xlu2 %v2884_v6, %s2822_s11 }
  0x5d   :  { %2661 = vrot.lane.b32.xlu0 %v2560_v2, %s2825_s14 }
  0x5e   :  { %v2562_v7 = vpop.permute.xlu2 %2561 }
  0x5f   :  { %v2564_v18 = vunpack.i.h.bf16 %v2562_v7  ;;  %v2563_v19 = vunpack.i.l.bf16 %v2562_v7 }
  0x61   :  { %v323_v24 = vsel %vm320_vm2, %v2563_v19, %v2564_v18 }
  0x64   :  { %2676 = vrot.lane.b32.xlu1 %v2565_v5, %s2826_s15  ;;  %128 = vrot.lane.b32.xlu2 %v2884_v6, %s2823_s12 }
  0x65   :  { %2671 = vrot.lane.b32.xlu0 %v2560_v2, %s2826_s15 }
  0x66   :  { %v2567_v8 = vpop.permute.xlu2 %2566 }
  0x67   :  { %v2569_v33 = vunpack.i.h.bf16 %v2567_v8  ;;  %v2568_v34 = vunpack.i.l.bf16 %v2567_v8 }
  0x69   :  { %v324_v41 = vsel %vm320_vm2, %v2564_v18, %v2568_v34 }
  0x6c   :  { %42 = vrot.lane.b32.xlu1 %v24_v4, %s2827_s16  ;;  %105 = vrot.lane.b32.xlu2 %v2884_v6, %s2824_s13 }
  0x6d   :  { %2681 = vrot.lane.b32.xlu0 %v2560_v2, %s2827_s16 }
  0x6e   :  { %v359_v9 = vpop.permute.xlu2 %358 }
  0x74   :  { %59 = vrot.lane.b32.xlu1 %v2884_v6, %s2826_s15  ;;  %2686 = vrot.lane.b32.xlu2 %v2685_v10, %s2827_s16 }
  0x75   :  { %82 = vrot.lane.b32.xlu0 %v2884_v6, %s2825_s14 }
  0x76   :  { %v2552_v11 = vpop.permute.xlu1 %2551  ;;  %v336_v12 = vpop.permute.xlu2 %335 }
  0x77   :  { %v2554_v13 = vunpack.i.h.bf16 %v2552_v11  ;;  %v2553_v14 = vunpack.i.l.bf16 %v2552_v11  ;;  %v2542_v15 = vpop.permute.xlu0 %2541 }
  0x78   :  { %v2544_v16 = vunpack.i.h.bf16 %v2542_v15  ;;  %v2543_v17 = vunpack.i.l.bf16 %v2542_v15 }
  0x79   :  { %v345_v22 = vsel %vm343_vm1, %v336_v12, %v2553_v14  ;;  %v346_v23 = vsel %vm343_vm1, %v2553_v14, %v2554_v13 }
  0x7a   :  { %v368_v20 = vsel %vm366_vm0, %v359_v9, %v2543_v17  ;;  %v369_v21 = vsel %vm366_vm0, %v2543_v17, %v2544_v16 }
  0x7b   :  { %484 = vmatpush.msra.mxu1 %v368_v20  ;;  %519 = vmatpush.msra.mxu2 %v369_v21 }
  0x7d   :  { %485 = vmatpush.msra.mxu1 %v345_v22  ;;  %520 = vmatpush.msra.mxu2 %v346_v23 }
  0x7e   :  { %v313_v25 = vpop.permute.xlu2 %312  ;;  %v2557_v26 = vpop.permute.xlu1 %2556 }
  0x7f   :  { %521 = vmatpush.msra.mxu2 %v323_v24  ;;  %v2559_v27 = vunpack.i.h.bf16 %v2557_v26  ;;  %v2547_v28 = vpop.permute.xlu0 %2546  ;;  %v322_v29 = vsel %vm320_vm2, %v313_v25, %v2563_v19  ;;  %v2558_v30 = vunpack.i.l.bf16 %v2557_v26  ;;  %v321_v40 = vsel %vm320_vm2, %v2569_v33, %v313_v25 }
  0x80   :  { %v2549_v31 = vunpack.i.h.bf16 %v2547_v28  ;;  %v2548_v32 = vunpack.i.l.bf16 %v2547_v28  ;;  %486 = vmatpush.msra.mxu1 %v322_v29 }
  0x81   :  { %v344_v37 = vsel %vm343_vm1, %v2559_v27, %v336_v12  ;;  %v347_v38 = vsel %vm343_vm1, %v2554_v13, %v2558_v30 }
  0x82   :  { %v367_v35 = vsel %vm366_vm0, %v2549_v31, %v359_v9  ;;  %v370_v36 = vsel %vm366_vm0, %v2544_v16, %v2548_v32  ;;  %vm2309_vm0 = vcmask 523264  }
  0x83   :  { %449 = vmatpush.msra.mxu0 %v367_v35  ;;  %554 = vmatpush.msra.mxu3 %v370_v36 }
  0x85   :  { %450 = vmatpush.msra.mxu0 %v344_v37  ;;  %555 = vmatpush.msra.mxu3 %v347_v38 }
  0x86   :  { %v2577_v39 = vpop.permute.xlu1 %2576  ;;  %v290_v42 = vpop.permute.xlu2 %289 }
  0x87   :  { %v2579_v43 = vunpack.i.h.bf16 %v2577_v39  ;;  %v2578_v44 = vunpack.i.l.bf16 %v2577_v39  ;;  %v2572_v45 = vpop.permute.xlu0 %2571  ;;  %451 = vmatpush.msra.mxu0 %v321_v40  ;;  %556 = vmatpush.msra.mxu3 %v324_v41 }
  0x88   :  { %v2574_v46 = vunpack.i.h.bf16 %v2572_v45  ;;  %v2573_v47 = vunpack.i.l.bf16 %v2572_v45 }
  0x89   :  { %v298_v48 = vsel %vm297_vm3, %v2579_v43, %v290_v42 }
  0x8a   :  { %v299_v49 = vsel %vm297_vm3, %v290_v42, %v2573_v47  ;;  %v300_v50 = vsel %vm297_vm3, %v2573_v47, %v2574_v46  ;;  %v301_v51 = vsel %vm297_vm3, %v2574_v46, %v2578_v44  ;;  %452 = vmatpush.msra.mxu0 %v298_v48 }
  0x8b   :  { %487 = vmatpush.msra.mxu1 %v299_v49  ;;  %522 = vmatpush.msra.mxu2 %v300_v50 }
  0x8c   :  { %557 = vmatpush.msra.mxu3 %v301_v51 }
  0x8e   :  { %v2587_v52 = vpop.permute.xlu1 %2586  ;;  %v267_v53 = vpop.permute.xlu2 %266 }
  0x8f   :  { %v2589_v54 = vunpack.i.h.bf16 %v2587_v52  ;;  %v2588_v55 = vunpack.i.l.bf16 %v2587_v52  ;;  %v2582_v56 = vpop.permute.xlu0 %2581 }
  0x90   :  { %v2584_v57 = vunpack.i.h.bf16 %v2582_v56  ;;  %v2583_v58 = vunpack.i.l.bf16 %v2582_v56 }
  0x91   :  { %v275_v59 = vsel %vm274_vm4, %v2589_v54, %v267_v53 }
  0x92   :  { %v276_v60 = vsel %vm274_vm4, %v267_v53, %v2583_v58  ;;  %v277_v61 = vsel %vm274_vm4, %v2583_v58, %v2584_v57  ;;  %v278_v62 = vsel %vm274_vm4, %v2584_v57, %v2588_v55  ;;  %453 = vmatpush.msra.mxu0 %v275_v59 }
  0x93   :  { %488 = vmatpush.msra.mxu1 %v276_v60  ;;  %523 = vmatpush.msra.mxu2 %v277_v61 }
  0x94   :  { %558 = vmatpush.msra.mxu3 %v278_v62 }
  0x96   :  { %v2597_v63 = vpop.permute.xlu1 %2596  ;;  %v244_v2 = vpop.permute.xlu2 %243 }
  0x97   :  { %v2599_v4 = vunpack.i.h.bf16 %v2597_v63  ;;  %v2598_v5 = vunpack.i.l.bf16 %v2597_v63  ;;  %v2592_v7 = vpop.permute.xlu0 %2591 }
  0x98   :  { %v2594_v8 = vunpack.i.h.bf16 %v2592_v7  ;;  %v2593_v9 = vunpack.i.l.bf16 %v2592_v7 }
  0x99   :  { %v252_v10 = vsel %vm251_vm5, %v2599_v4, %v244_v2 }
  0x9a   :  { %v253_v11 = vsel %vm251_vm5, %v244_v2, %v2593_v9  ;;  %v254_v12 = vsel %vm251_vm5, %v2593_v9, %v2594_v8  ;;  %v255_v13 = vsel %vm251_vm5, %v2594_v8, %v2598_v5  ;;  %454 = vmatpush.msra.mxu0 %v252_v10 }
  0x9b   :  { %489 = vmatpush.msra.mxu1 %v253_v11  ;;  %524 = vmatpush.msra.mxu2 %v254_v12 }
  0x9c   :  { %559 = vmatpush.msra.mxu3 %v255_v13 }
  0x9e   :  { %v2607_v14 = vpop.permute.xlu1 %2606  ;;  %v221_v15 = vpop.permute.xlu2 %220 }
  0x9f   :  { %v2609_v16 = vunpack.i.h.bf16 %v2607_v14  ;;  %v2608_v17 = vunpack.i.l.bf16 %v2607_v14  ;;  %v2602_v18 = vpop.permute.xlu0 %2601 }
  0xa0   :  { %v2604_v19 = vunpack.i.h.bf16 %v2602_v18  ;;  %v2603_v20 = vunpack.i.l.bf16 %v2602_v18 }
  0xa1   :  { %v229_v21 = vsel %vm228_vm6, %v2609_v16, %v221_v15 }
  0xa2   :  { %v230_v22 = vsel %vm228_vm6, %v221_v15, %v2603_v20  ;;  %v231_v23 = vsel %vm228_vm6, %v2603_v20, %v2604_v19  ;;  %v232_v24 = vsel %vm228_vm6, %v2604_v19, %v2608_v17  ;;  %455 = vmatpush.msra.mxu0 %v229_v21 }
  0xa3   :  { %490 = vmatpush.msra.mxu1 %v230_v22  ;;  %525 = vmatpush.msra.mxu2 %v231_v23 }
  0xa4   :  { %560 = vmatpush.msra.mxu3 %v232_v24 }
  0xa6   :  { %v2617_v25 = vpop.permute.xlu1 %2616  ;;  %v198_v26 = vpop.permute.xlu2 %197 }
  0xa7   :  { %v2619_v27 = vunpack.i.h.bf16 %v2617_v25  ;;  %v2618_v28 = vunpack.i.l.bf16 %v2617_v25  ;;  %v2612_v29 = vpop.permute.xlu0 %2611 }
  0xa8   :  { %v2614_v30 = vunpack.i.h.bf16 %v2612_v29  ;;  %v2613_v31 = vunpack.i.l.bf16 %v2612_v29 }
  0xa9   :  { %v206_v32 = vsel %vm205_vm7, %v2619_v27, %v198_v26 }
  0xaa   :  { %v207_v33 = vsel %vm205_vm7, %v198_v26, %v2613_v31  ;;  %v208_v34 = vsel %vm205_vm7, %v2613_v31, %v2614_v30  ;;  %v209_v35 = vsel %vm205_vm7, %v2614_v30, %v2618_v28  ;;  %456 = vmatpush.msra.mxu0 %v206_v32 }
  0xab   :  { %491 = vmatpush.msra.mxu1 %v207_v33  ;;  %526 = vmatpush.msra.mxu2 %v208_v34 }
  0xac   :  { %561 = vmatpush.msra.mxu3 %v209_v35 }
  0xae   :  { %v2627_v36 = vpop.permute.xlu1 %2626  ;;  %v175_v37 = vpop.permute.xlu2 %174 }
  0xaf   :  { %v2629_v38 = vunpack.i.h.bf16 %v2627_v36  ;;  %v2628_v39 = vunpack.i.l.bf16 %v2627_v36  ;;  %v2622_v40 = vpop.permute.xlu0 %2621 }
  0xb0   :  { %v2624_v41 = vunpack.i.h.bf16 %v2622_v40  ;;  %v2623_v42 = vunpack.i.l.bf16 %v2622_v40  ;;  %v379_v40 = vld [vmem:[%s4378_s1] sm:$0xff] }
  0xb1   :  { %v183_v43 = vsel %vm182_vm8, %v2629_v38, %v175_v37 }
  0xb2   :  { %v184_v44 = vsel %vm182_vm8, %v175_v37, %v2623_v42  ;;  %v185_v45 = vsel %vm182_vm8, %v2623_v42, %v2624_v41  ;;  %v186_v46 = vsel %vm182_vm8, %v2624_v41, %v2628_v39  ;;  %457 = vmatpush.msra.mxu0 %v183_v43 }
  0xb3   :  { %492 = vmatpush.msra.mxu1 %v184_v44  ;;  %527 = vmatpush.msra.mxu2 %v185_v45 }
  0xb4   :  { %562 = vmatpush.msra.mxu3 %v186_v46 }
  0xb6   :  { %v2637_v47 = vpop.permute.xlu1 %2636  ;;  %v152_v48 = vpop.permute.xlu2 %151 }
  0xb7   :  { %v2639_v49 = vunpack.i.h.bf16 %v2637_v47  ;;  %v2638_v50 = vunpack.i.l.bf16 %v2637_v47  ;;  %v2632_v51 = vpop.permute.xlu0 %2631 }
  0xb8   :  { %v2634_v52 = vunpack.i.h.bf16 %v2632_v51  ;;  %v2633_v53 = vunpack.i.l.bf16 %v2632_v51  ;;  %v380_v51 = vld [vmem:[%s4378_s1 + $0x20] sm:$0xff] }
  0xb9   :  { %v160_v54 = vsel %vm159_vm9, %v2639_v49, %v152_v48 }
  0xba   :  { %v161_v55 = vsel %vm159_vm9, %v152_v48, %v2633_v53  ;;  %v162_v56 = vsel %vm159_vm9, %v2633_v53, %v2634_v52  ;;  %v163_v57 = vsel %vm159_vm9, %v2634_v52, %v2638_v50  ;;  %458 = vmatpush.msra.mxu0 %v160_v54  ;;  %v381_v53 = vld [vmem:[%s4378_s1 + $0x40] sm:$0xff] }
  0xbb   :  { %493 = vmatpush.msra.mxu1 %v161_v55  ;;  %528 = vmatpush.msra.mxu2 %v162_v56  ;;  %v382_v54 = vld [vmem:[%s4378_s1 + $0x60] sm:$0xff] }
  0xbc   :  { %563 = vmatpush.msra.mxu3 %v163_v57 }
  0xbe   :  { %v2647_v58 = vpop.permute.xlu1 %2646  ;;  %v129_v59 = vpop.permute.xlu2 %128 }
  0xbf   :  { %v2649_v60 = vunpack.i.h.bf16 %v2647_v58  ;;  %v2648_v61 = vunpack.i.l.bf16 %v2647_v58  ;;  %v2642_v62 = vpop.permute.xlu0 %2641 }
  0xc0   :  { %v2644_v63 = vunpack.i.h.bf16 %v2642_v62  ;;  %v2643_v2 = vunpack.i.l.bf16 %v2642_v62 }
  0xc1   :  { %v137_v4 = vsel %vm136_vm10, %v2649_v60, %v129_v59 }
  0xc2   :  { %v138_v5 = vsel %vm136_vm10, %v129_v59, %v2643_v2  ;;  %v139_v7 = vsel %vm136_vm10, %v2643_v2, %v2644_v63  ;;  %v140_v8 = vsel %vm136_vm10, %v2644_v63, %v2648_v61  ;;  %459 = vmatpush.msra.mxu0 %v137_v4 }
  0xc3   :  { %494 = vmatpush.msra.mxu1 %v138_v5  ;;  %529 = vmatpush.msra.mxu2 %v139_v7 }
  0xc4   :  { %564 = vmatpush.msra.mxu3 %v140_v8 }
  0xc6   :  { %v2657_v9 = vpop.permute.xlu1 %2656  ;;  %v106_v13 = vpop.permute.xlu2 %105 }
  0xc7   :  { %v2659_v10 = vunpack.i.h.bf16 %v2657_v9  ;;  %v2658_v11 = vunpack.i.l.bf16 %v2657_v9  ;;  %v2652_v12 = vpop.permute.xlu0 %2651 }
  0xc8   :  { %v2654_v14 = vunpack.i.h.bf16 %v2652_v12  ;;  %v2653_v15 = vunpack.i.l.bf16 %v2652_v12 }
  0xc9   :  { %v114_v16 = vsel %vm113_vm11, %v2659_v10, %v106_v13 }
  0xca   :  { %v115_v17 = vsel %vm113_vm11, %v106_v13, %v2653_v15  ;;  %v116_v18 = vsel %vm113_vm11, %v2653_v15, %v2654_v14  ;;  %v117_v19 = vsel %vm113_vm11, %v2654_v14, %v2658_v11  ;;  %460 = vmatpush.msra.mxu0 %v114_v16 }
  0xcb   :  { %495 = vmatpush.msra.mxu1 %v115_v17  ;;  %530 = vmatpush.msra.mxu2 %v116_v18 }
  0xcc   :  { %565 = vmatpush.msra.mxu3 %v117_v19 }
  0xce   :  { %v2667_v20 = vpop.permute.xlu1 %2666  ;;  %v2687_v41 = vpop.permute.xlu2 %2686 }
  0xcf   :  { %v2668_v21 = vunpack.i.l.bf16 %v2667_v20  ;;  %v2662_v22 = vpop.permute.xlu0 %2661  ;;  %v2669_v42 = vunpack.i.h.bf16 %v2667_v20  ;;  %v2688_v43 = vunpack.i.l.bf16 %v2687_v41  ;;  %v2689_v47 = vunpack.i.h.bf16 %v2687_v41 }
  0xd0   :  { %v2664_v23 = vunpack.i.h.bf16 %v2662_v22  ;;  %v2663_v24 = vunpack.i.l.bf16 %v2662_v22 }
  0xd2   :  { %v93_v25 = vsel %vm90_vm12, %v2663_v24, %v2664_v23  ;;  %v94_v26 = vsel %vm90_vm12, %v2664_v23, %v2668_v21 }
  0xd3   :  { %531 = vmatpush.msra.mxu2 %v93_v25  ;;  %566 = vmatpush.msra.mxu3 %v94_v26 }
  0xd6   :  { %v2677_v27 = vpop.permute.xlu1 %2676 }
  0xd7   :  { %v2678_v28 = vunpack.i.l.bf16 %v2677_v27  ;;  %v2672_v29 = vpop.permute.xlu0 %2671  ;;  %v2679_v46 = vunpack.i.h.bf16 %v2677_v27 }
  0xd8   :  { %v2674_v30 = vunpack.i.h.bf16 %v2672_v29  ;;  %v2673_v31 = vunpack.i.l.bf16 %v2672_v29 }
  0xda   :  { %v70_v32 = vsel %vm67_vm13, %v2673_v31, %v2674_v30  ;;  %v71_v33 = vsel %vm67_vm13, %v2674_v30, %v2678_v28 }
  0xdb   :  { %532 = vmatpush.msra.mxu2 %v70_v32  ;;  %567 = vmatpush.msra.mxu3 %v71_v33 }
  0xde   :  { %v43_v34 = vpop.permute.xlu1 %42 }
  0xdf   :  { %v2682_v35 = vpop.permute.xlu0 %2681 }
  0xe0   :  { %v2684_v36 = vunpack.i.h.bf16 %v2682_v35  ;;  %v2683_v37 = vunpack.i.l.bf16 %v2682_v35 }
  0xe2   :  { %v47_v38 = vsel %vm44_vm14, %v2683_v37, %v2684_v36  ;;  %v48_v39 = vsel %vm44_vm14, %v2684_v36, %v43_v34  ;;  %v46_v52 = vsel %vm44_vm14, %v2689_v47, %v2683_v37 }
  0xe3   :  { %533 = vmatpush.msra.mxu2 %v47_v38  ;;  %568 = vmatpush.msra.mxu3 %v48_v39 }
  0xe5   :  { %534 = vmatpush.msra.mxu2 %v2863_v0  ;;  %569 = vmatpush.msra.mxu3 %v2868_v1  ;;  %v45_v1 = vsel %vm44_vm14, %v2688_v43, %v2689_v47 }
  0xe6   :  { %535 = vmatmul.f32.vlgmr.msra.gmra.mxu2 %v379_v40  ;;  %570 = vmatmul.f32.vlgmr.msra.gmra.mxu3 %v379_v40  ;;  %v60_v44 = vpop.permute.xlu1 %59 }
  0xe7   :  { %v83_v45 = vpop.permute.xlu0 %82  ;;  %v68_v50 = vsel %vm67_vm13, %v2679_v46, %v60_v44  ;;  %v69_v0 = vsel %vm67_vm13, %v60_v44, %v2673_v31 }
  0xe8   :  { %v91_v48 = vsel %vm90_vm12, %v2669_v42, %v83_v45  ;;  %v92_v49 = vsel %vm90_vm12, %v83_v45, %v2663_v24 }
  0xe9   :  { %461 = vmatpush.msra.mxu0 %v91_v48  ;;  %496 = vmatpush.msra.mxu1 %v92_v49 }
  0xeb   :  { %462 = vmatpush.msra.mxu0 %v68_v50  ;;  %497 = vmatpush.msra.mxu1 %v69_v0 }
  0xed   :  { %463 = vmatpush.msra.mxu0 %v45_v1  ;;  %498 = vmatpush.msra.mxu1 %v46_v52 }
  0xee   :  { %538 = vmatmul.f32.gmra.mxu2 %v380_v51  ;;  %573 = vmatmul.f32.gmra.mxu3 %v380_v51 }
  0xef   :  { %464 = vmatpush.msra.mxu0 %v2875_v3  ;;  %499 = vmatpush.msra.mxu1 %v2884_v6  ;;  %v383_v3 = vld [vmem:[%s4378_s1 + $0x80] sm:$0xff] }
  0xf0   :  { %465 = vmatmul.f32.vlgmr.msra.gmra.mxu0 %v379_v40  ;;  %500 = vmatmul.f32.vlgmr.msra.gmra.mxu1 %v379_v40  ;;  %v384_v6 = vld [vmem:[%s4378_s1 + $0xa0] sm:$0xff] }
  0xf6   :  { %541 = vmatmul.f32.gmra.mxu2 %v381_v53  ;;  %576 = vmatmul.f32.gmra.mxu3 %v381_v53 }
  0xf8   :  { %468 = vmatmul.f32.gmra.mxu0 %v380_v51  ;;  %503 = vmatmul.f32.gmra.mxu1 %v380_v51 }
  0xfe   :  { %544 = vmatmul.f32.gmra.mxu2 %v382_v54  ;;  %579 = vmatmul.f32.gmra.mxu3 %v382_v54 }
 0x100   :  { %471 = vmatmul.f32.gmra.mxu0 %v381_v53  ;;  %506 = vmatmul.f32.gmra.mxu1 %v381_v53 }
 0x106   :  { %547 = vmatmul.f32.gmra.mxu2 %v383_v3  ;;  %582 = vmatmul.f32.gmra.mxu3 %v383_v3 }
 0x108   :  { %474 = vmatmul.f32.gmra.mxu0 %v382_v54  ;;  %509 = vmatmul.f32.gmra.mxu1 %v382_v54 }
 0x10e   :  { %550 = vmatmul.f32.gmra.mxu2 %v384_v6  ;;  %585 = vmatmul.f32.gmra.mxu3 %v384_v6 }
 0x110   :  { %477 = vmatmul.f32.gmra.mxu0 %v383_v3  ;;  %512 = vmatmul.f32.gmra.mxu1 %v383_v3 }
 0x118   :  { %480 = vmatmul.f32.gmra.mxu0 %v384_v6  ;;  %515 = vmatmul.f32.gmra.mxu1 %v384_v6 }
 0x169   :  { %v536_v55 = vpop.f32.mrf.mxu2  ;;  %v571_v56 = vpop.f32.mrf.mxu3 }
 0x16d   :  { %v466_v57 = vpop.f32.mrf.mxu0  ;;  %v501_v58 = vpop.f32.mrf.mxu1 }
 0x16e   :  { %v2690_v59 = vpack.i.bf16 %v536_v55, %v466_v57  ;;  %v2695_v60 = vpack.i.bf16 %v501_v58, %v571_v56 }
 0x170   :  { %2691 = vrot.lane.b32.xlu0 %v2690_v59, %s2827_s16  ;;  %2696 = vrot.lane.b32.xlu1 %v2695_v60, %s2827_s16 }
 0x171   :  { %v2960_v61 = vpop.f32.mrf.mxu2  ;;  %v2962_v62 = vpop.f32.mrf.mxu3 }
 0x175   :  { %v2964_v63 = vpop.f32.mrf.mxu0  ;;  %v2966_v2 = vpop.f32.mrf.mxu1 }
 0x176   :  { %v2700_v4 = vpack.i.bf16 %v2960_v61, %v2964_v63  ;;  %v2705_v5 = vpack.i.bf16 %v2966_v2, %v2962_v62 }
 0x178   :  { %2701 = vrot.lane.b32.xlu2 %v2700_v4, %s2827_s16  ;;  %2706 = vrot.lane.b32.xlu0 %v2705_v5, %s2827_s16 }
 0x179   :  { %v2974_v7 = vpop.f32.mrf.mxu2  ;;  %v2976_v8 = vpop.f32.mrf.mxu3 }
 0x17d   :  { %v2978_v9 = vpop.f32.mrf.mxu0  ;;  %v2980_v10 = vpop.f32.mrf.mxu1 }
 0x17e   :  { %v2710_v11 = vpack.i.bf16 %v2974_v7, %v2978_v9  ;;  %v2715_v12 = vpack.i.bf16 %v2980_v10, %v2976_v8 }
 0x180   :  { %2711 = vrot.lane.b32.xlu1 %v2710_v11, %s2827_s16  ;;  %2716 = vrot.lane.b32.xlu2 %v2715_v12, %s2827_s16  ;;  %v936_v11 = vld [vmem:[%s4379_s3 + $0x178] sm:$0xff] }
 0x181   :  { %v2988_v13 = vpop.f32.mrf.mxu2  ;;  %v2990_v14 = vpop.f32.mrf.mxu3  ;;  %v952_v12 = vld [vmem:[%s4379_s3 + $0x1f8] sm:$0xff]  ;;  %1059 = vmatpush.msrb.mxu2 %v936_v11 }
 0x182   :  { %1094 = vmatpush.msrb.mxu3 %v952_v12 }
 0x185   :  { %v2992_v15 = vpop.f32.mrf.mxu0  ;;  %v2994_v16 = vpop.f32.mrf.mxu1 }
 0x186   :  { %v2720_v17 = vpack.i.bf16 %v2988_v13, %v2992_v15  ;;  %v2725_v18 = vpack.i.bf16 %v2994_v16, %v2990_v14 }
 0x188   :  { %2721 = vrot.lane.b32.xlu0 %v2720_v17, %s2827_s16  ;;  %2726 = vrot.lane.b32.xlu1 %v2725_v18, %s2827_s16  ;;  %v903_v17 = vld [vmem:[%s4379_s3 + $0x70] sm:$0xff] }
 0x189   :  { %v3002_v19 = vpop.f32.mrf.mxu2  ;;  %v3004_v20 = vpop.f32.mrf.mxu3  ;;  %v919_v18 = vld [vmem:[%s4379_s3 + $0xf0] sm:$0xff] }
 0x18d   :  { %v3006_v21 = vpop.f32.mrf.mxu0  ;;  %v3008_v22 = vpop.f32.mrf.mxu1 }
 0x18e   :  { %v2730_v23 = vpack.i.bf16 %v3002_v19, %v3006_v21  ;;  %v2735_v24 = vpack.i.bf16 %v3008_v22, %v3004_v20 }
 0x190   :  { %2731 = vrot.lane.b32.xlu2 %v2730_v23, %s2827_s16  ;;  %2736 = vrot.lane.b32.xlu0 %v2735_v24, %s2827_s16  ;;  %v935_v23 = vld [vmem:[%s4379_s3 + $0x170] sm:$0xff] }
 0x191   :  { %v3016_v25 = vpop.f32.mrf.mxu2  ;;  %v3018_v26 = vpop.f32.mrf.mxu3  ;;  %v951_v24 = vld [vmem:[%s4379_s3 + $0x1f0] sm:$0xff]  ;;  %1060 = vmatpush.msrb.mxu2 %v935_v23 }
 0x192   :  { %1095 = vmatpush.msrb.mxu3 %v951_v24 }
 0x195   :  { %v3020_v27 = vpop.f32.mrf.mxu0  ;;  %v3022_v28 = vpop.f32.mrf.mxu1 }
 0x196   :  { %v2740_v29 = vpack.i.bf16 %v3016_v25, %v3020_v27  ;;  %v2745_v30 = vpack.i.bf16 %v3022_v28, %v3018_v26 }
 0x198   :  { %2741 = vrot.lane.b32.xlu1 %v2740_v29, %s2827_s16  ;;  %2746 = vrot.lane.b32.xlu2 %v2745_v30, %s2827_s16 }
 0x1d2   :  { %v2702_v41 = vpop.permute.xlu2 %2701 }
 0x1d3   :  { %v2704_v49 = vunpack.i.h.bf16 %v2702_v41  ;;  %v2703_v50 = vunpack.i.l.bf16 %v2702_v41  ;;  %v933_v41 = vld [vmem:[%s4379_s3 + $0x160] sm:$0xff] }
 0x1e2   :  { %v2692_v31 = vpop.permute.xlu0 %2691  ;;  %v2697_v32 = vpop.permute.xlu1 %2696 }
 0x1e3   :  { %v2694_v33 = vunpack.i.h.bf16 %v2692_v31  ;;  %v2693_v34 = vunpack.i.l.bf16 %v2692_v31  ;;  %v2699_v35 = vunpack.i.h.bf16 %v2697_v32  ;;  %v2698_v36 = vunpack.i.l.bf16 %v2697_v32 }
 0x1e5   :  { %v661_v37 = vsel %vm44_vm14, %v2693_v34, %v2699_v35  ;;  %v662_v38 = vsel %vm44_vm14, %v2699_v35, %v2694_v33  ;;  %v663_v39 = vsel %vm44_vm14, %v2694_v33, %v2698_v36  ;;  %v709_v40 = vsel %vm44_vm14, %v2698_v36, %v2693_v34  ;;  %v902_v33 = vld [vmem:[%s4379_s3 + $0x68] sm:$0xff] }
 0x1e6   :  { %v3034_v42 = vmax.f32 %v466_v57, %v661_v37  ;;  %v3036_v43 = vmax.f32 %v501_v58, %v662_v38  ;;  %v3038_v44 = vmax.f32 %v536_v55, %v663_v39  ;;  %v3040_v45 = vmax.f32 %v571_v56, %v709_v40  ;;  %v2717_v57 = vpop.permute.xlu2 %2716  ;;  %v918_v34 = vld [vmem:[%s4379_s3 + $0xe8] sm:$0xff] }
 0x1e7   :  { %v934_v39 = vld [vmem:[%s4379_s3 + $0x168] sm:$0xff] }
 0x1e8   :  { %v2755_v46 = vpack.i.bf16 %v3036_v43, %v3034_v42  ;;  %v2750_v47 = vpack.i.bf16 %v3040_v45, %v3038_v44  ;;  %v950_v40 = vld [vmem:[%s4379_s3 + $0x1e8] sm:$0xff]  ;;  %1061 = vmatpush.msrb.mxu2 %v934_v39 }
 0x1e9   :  { %1096 = vmatpush.msrb.mxu3 %v950_v40 }
 0x1ea   :  { %v2707_v48 = vpop.permute.xlu0 %2706  ;;  %2756 = vrot.lane.b32.xlu1 %v2755_v46, %s2824_s13  ;;  %2751 = vrot.lane.b32.xlu0 %v2750_v47, %s2824_s13  ;;  %v949_v46 = vld [vmem:[%s4379_s3 + $0x1e0] sm:$0xff] }
 0x1eb   :  { %v2709_v0 = vunpack.i.h.bf16 %v2707_v48  ;;  %v2708_v1 = vunpack.i.l.bf16 %v2707_v48  ;;  %1062 = vmatpush.msrb.mxu2 %v933_v41  ;;  %1097 = vmatpush.msrb.mxu3 %v949_v46 }
 0x1ed   :  { %v664_v51 = vsel %vm44_vm14, %v2703_v50, %v2709_v0  ;;  %v665_v52 = vsel %vm44_vm14, %v2709_v0, %v2704_v49  ;;  %v666_v53 = vsel %vm44_vm14, %v2704_v49, %v2708_v1  ;;  %v710_v54 = vsel %vm44_vm14, %v2708_v1, %v2703_v50  ;;  %v900_v49 = vld [vmem:[%s4379_s3 + $0x58] sm:$0xff] }
 0x1ee   :  { %v3053_v3 = vmax.f32 %v2964_v63, %v664_v51  ;;  %v3056_v6 = vmax.f32 %v2966_v2, %v665_v52  ;;  %v3059_v55 = vmax.f32 %v2960_v61, %v666_v53  ;;  %v3062_v56 = vmax.f32 %v2962_v62, %v710_v54  ;;  %v904_v61 = vld [vmem:[%s4379_s3 + $0x78] sm:$0xff] }
 0x1ef   :  { %v920_v62 = vld [vmem:[%s4379_s3 + $0xf8] sm:$0xff]  ;;  %v2719_v63 = vunpack.i.h.bf16 %v2717_v57  ;;  %v2718_v2 = vunpack.i.l.bf16 %v2717_v57  ;;  %989 = vmatpush.msrb.mxu0 %v904_v61  ;;  %v2732_v61 = vpop.permute.xlu2 %2731 }
 0x1f0   :  { %v2765_v58 = vpack.i.bf16 %v3056_v6, %v3053_v3  ;;  %v2760_v59 = vpack.i.bf16 %v3062_v56, %v3059_v55  ;;  %1024 = vmatpush.msrb.mxu1 %v920_v62  ;;  %v916_v52 = vld [vmem:[%s4379_s3 + $0xd8] sm:$0xff] }
 0x1f1   :  { %990 = vmatpush.msrb.mxu0 %v903_v17  ;;  %v932_v53 = vld [vmem:[%s4379_s3 + $0x158] sm:$0xff] }
 0x1f2   :  { %v2712_v60 = vpop.permute.xlu1 %2711  ;;  %2766 = vrot.lane.b32.xlu0 %v2765_v58, %s2824_s13  ;;  %2761 = vrot.lane.b32.xlu2 %v2760_v59, %s2824_s13  ;;  %v948_v54 = vld [vmem:[%s4379_s3 + $0x1d8] sm:$0xff] }
 0x1f3   :  { %v2714_v4 = vunpack.i.h.bf16 %v2712_v60  ;;  %v2713_v5 = vunpack.i.l.bf16 %v2712_v60  ;;  %1025 = vmatpush.msrb.mxu1 %v919_v18  ;;  %991 = vmatpush.msrb.mxu0 %v902_v33 }
 0x1f4   :  { %1063 = vmatpush.msrb.mxu2 %v932_v53  ;;  %1098 = vmatpush.msrb.mxu3 %v948_v54  ;;  %v897_v53 = vld [vmem:[%s4379_s3 + $0x40] sm:$0xff] }
 0x1f5   :  { %v667_v29 = vsel %vm44_vm14, %v2713_v5, %v2719_v63  ;;  %v668_v30 = vsel %vm44_vm14, %v2719_v63, %v2714_v4  ;;  %v669_v31 = vsel %vm44_vm14, %v2714_v4, %v2718_v2  ;;  %v711_v32 = vsel %vm44_vm14, %v2718_v2, %v2713_v5  ;;  %1026 = vmatpush.msrb.mxu1 %v918_v34  ;;  %v913_v54 = vld [vmem:[%s4379_s3 + $0xc0] sm:$0xff] }
 0x1f6   :  { %v3105_v35 = vmax.f32 %v2974_v7, %v669_v31  ;;  %v3108_v36 = vmax.f32 %v2976_v8, %v711_v32  ;;  %v3111_v37 = vmax.f32 %v2978_v9, %v667_v29  ;;  %v3114_v38 = vmax.f32 %v2980_v10, %v668_v30  ;;  %v901_v9 = vld [vmem:[%s4379_s3 + $0x60] sm:$0xff] }
 0x1f7   :  { %v917_v10 = vld [vmem:[%s4379_s3 + $0xe0] sm:$0xff]  ;;  %992 = vmatpush.msrb.mxu0 %v901_v9  ;;  %v2747_v33 = vpop.permute.xlu2 %2746 }
 0x1f8   :  { %v2770_v7 = vpack.i.bf16 %v3108_v36, %v3105_v35  ;;  %v2775_v8 = vpack.i.bf16 %v3114_v38, %v3111_v37  ;;  %1027 = vmatpush.msrb.mxu1 %v917_v10  ;;  %v2749_v40 = vunpack.i.h.bf16 %v2747_v33 }
 0x1f9   :  { %993 = vmatpush.msrb.mxu0 %v900_v49 }
 0x1fa   :  { %v2722_v47 = vpop.permute.xlu0 %2721  ;;  %2771 = vrot.lane.b32.xlu1 %v2770_v7, %s2824_s13  ;;  %v2727_v48 = vpop.permute.xlu1 %2726  ;;  %2776 = vrot.lane.b32.xlu2 %v2775_v8, %s2824_s13  ;;  %v2748_v7 = vunpack.i.l.bf16 %v2747_v33  ;;  %v925_v33 = vld [vmem:[%s4379_s3 + $0x120] sm:$0xff] }
 0x1fb   :  { %v2724_v50 = vunpack.i.h.bf16 %v2722_v47  ;;  %v2723_v0 = vunpack.i.l.bf16 %v2722_v47  ;;  %v2729_v1 = vunpack.i.h.bf16 %v2727_v48  ;;  %v2728_v51 = vunpack.i.l.bf16 %v2727_v48  ;;  %1028 = vmatpush.msrb.mxu1 %v916_v52  ;;  %v946_v52 = vld [vmem:[%s4379_s3 + $0x1c8] sm:$0xff] }
 0x1fd   :  { %v670_v57 = vsel %vm44_vm14, %v2723_v0, %v2729_v1  ;;  %v671_v58 = vsel %vm44_vm14, %v2729_v1, %v2724_v50  ;;  %v672_v59 = vsel %vm44_vm14, %v2724_v50, %v2728_v51  ;;  %v712_v60 = vsel %vm44_vm14, %v2728_v51, %v2723_v0  ;;  %v898_v0 = vld [vmem:[%s4379_s3 + $0x48] sm:$0xff] }
 0x1fe   :  { %v3157_v62 = vmax.f32 %v2992_v15, %v670_v57  ;;  %v3160_v63 = vmax.f32 %v2994_v16, %v671_v58  ;;  %v3163_v2 = vmax.f32 %v2988_v13, %v672_v59  ;;  %v3166_v4 = vmax.f32 %v2990_v14, %v712_v60  ;;  %v914_v1 = vld [vmem:[%s4379_s3 + $0xc8] sm:$0xff]  ;;  %v929_v57 = vld [vmem:[%s4379_s3 + $0x140] sm:$0xff]  ;;  %v896_v59 = vld [vmem:[%s4379_s3 + $0x38] sm:$0xff] }
 0x1ff   :  { %v2734_v16 = vunpack.i.h.bf16 %v2732_v61  ;;  %v2733_v13 = vunpack.i.l.bf16 %v2732_v61  ;;  %v930_v51 = vld [vmem:[%s4379_s3 + $0x148] sm:$0xff]  ;;  %v945_v58 = vld [vmem:[%s4379_s3 + $0x1c0] sm:$0xff]  ;;  %v912_v60 = vld [vmem:[%s4379_s3 + $0xb8] sm:$0xff] }
 0x200   :  { %v2785_v5 = vpack.i.bf16 %v3160_v63, %v3157_v62  ;;  %v2780_v11 = vpack.i.bf16 %v3166_v4, %v3163_v2  ;;  %v928_v61 = vld [vmem:[%s4379_s3 + $0x138] sm:$0xff] }
 0x202   :  { %2786 = vrot.lane.b32.xlu1 %v2785_v5, %s2824_s13  ;;  %2781 = vrot.lane.b32.xlu0 %v2780_v11, %s2824_s13  ;;  %v2737_v15 = vpop.permute.xlu0 %2736  ;;  %v944_v5 = vld [vmem:[%s4379_s3 + $0x1b8] sm:$0xff]  ;;  %v895_v11 = vld [vmem:[%s4379_s3 + $0x30] sm:$0xff] }
 0x203   :  { %v2739_v12 = vunpack.i.h.bf16 %v2737_v15  ;;  %v2738_v17 = vunpack.i.l.bf16 %v2737_v15  ;;  %v911_v15 = vld [vmem:[%s4379_s3 + $0xb0] sm:$0xff] }
 0x205   :  { %v673_v14 = vsel %vm44_vm14, %v2733_v13, %v2739_v12  ;;  %v674_v18 = vsel %vm44_vm14, %v2739_v12, %v2734_v16  ;;  %v675_v23 = vsel %vm44_vm14, %v2734_v16, %v2738_v17  ;;  %v713_v24 = vsel %vm44_vm14, %v2738_v17, %v2733_v13  ;;  %v927_v16 = vld [vmem:[%s4379_s3 + $0x130] sm:$0xff]  ;;  %v894_v12 = vld [vmem:[%s4379_s3 + $0x28] sm:$0xff] }
 0x206   :  { %v3179_v29 = vmax.f32 %v3006_v21, %v673_v14  ;;  %v3182_v30 = vmax.f32 %v3008_v22, %v674_v18  ;;  %v3185_v31 = vmax.f32 %v3002_v19, %v675_v23  ;;  %v3188_v32 = vmax.f32 %v3004_v20, %v713_v24  ;;  %v943_v13 = vld [vmem:[%s4379_s3 + $0x1b0] sm:$0xff]  ;;  %v910_v17 = vld [vmem:[%s4379_s3 + $0xa8] sm:$0xff]  ;;  %v893_v23 = vld [vmem:[%s4379_s3 + $0x20] sm:$0xff] }
 0x207   :  { %v926_v14 = vld [vmem:[%s4379_s3 + $0x128] sm:$0xff]  ;;  %v909_v24 = vld [vmem:[%s4379_s3 + $0xa0] sm:$0xff] }
 0x208   :  { %v2795_v34 = vpack.i.bf16 %v3182_v30, %v3179_v29  ;;  %v2790_v39 = vpack.i.bf16 %v3188_v32, %v3185_v31  ;;  %v942_v18 = vld [vmem:[%s4379_s3 + $0x1a8] sm:$0xff] }
 0x20a   :  { %v2742_v21 = vpop.permute.xlu1 %2741  ;;  %2796 = vrot.lane.b32.xlu0 %v2795_v34, %s2824_s13  ;;  %2791 = vrot.lane.b32.xlu2 %v2790_v39, %s2824_s13  ;;  %v941_v34 = vld [vmem:[%s4379_s3 + $0x1a0] sm:$0xff]  ;;  %v892_v39 = vld [vmem:[%s4379_s3 + $0x18] sm:$0xff] }
 0x20b   :  { %v2744_v22 = vunpack.i.h.bf16 %v2742_v21  ;;  %v2743_v19 = vunpack.i.l.bf16 %v2742_v21  ;;  %v940_v21 = vld [vmem:[%s4379_s3 + $0x198] sm:$0xff] }
 0x20d   :  { %v676_v8 = vsel %vm44_vm14, %v2743_v19, %v2749_v40  ;;  %v677_v20 = vsel %vm44_vm14, %v2749_v40, %v2744_v22  ;;  %v678_v9 = vsel %vm44_vm14, %v2744_v22, %v2748_v7  ;;  %v714_v10 = vsel %vm44_vm14, %v2748_v7, %v2743_v19  ;;  %v908_v40 = vld [vmem:[%s4379_s3 + $0x98] sm:$0xff]  ;;  %v891_v22 = vld [vmem:[%s4379_s3 + $0x10] sm:$0xff] }
 0x20e   :  { %v3201_v41 = vmax.f32 %v3020_v27, %v676_v8  ;;  %v3204_v46 = vmax.f32 %v3022_v28, %v677_v20  ;;  %v3207_v47 = vmax.f32 %v3016_v25, %v678_v9  ;;  %v3210_v48 = vmax.f32 %v3018_v26, %v714_v10  ;;  %v899_v27 = vld [vmem:[%s4379_s3 + $0x50] sm:$0xff]  ;;  %v924_v7 = vld [vmem:[%s4379_s3 + $0x118] sm:$0xff]  ;;  %v890_v9 = vld [vmem:[%s4379_s3 + $0x8] sm:$0xff] }
 0x20f   :  { %v915_v25 = vld [vmem:[%s4379_s3 + $0xd0] sm:$0xff]  ;;  %994 = vmatpush.msrb.mxu0 %v899_v27  ;;  %v906_v10 = vld [vmem:[%s4379_s3 + $0x88] sm:$0xff]  ;;  %v889_v27 = vld [vmem:[%s4379_s3] sm:$0xff] }
 0x210   :  { %v2805_v49 = vpack.i.bf16 %v3204_v46, %v3201_v41  ;;  %v2800_v50 = vpack.i.bf16 %v3210_v48, %v3207_v47  ;;  %v931_v26 = vld [vmem:[%s4379_s3 + $0x150] sm:$0xff]  ;;  %1029 = vmatpush.msrb.mxu1 %v915_v25  ;;  %v905_v25 = vld [vmem:[%s4379_s3 + $0x80] sm:$0xff] }
 0x211   :  { %v947_v28 = vld [vmem:[%s4379_s3 + $0x1d0] sm:$0xff]  ;;  %1064 = vmatpush.msrb.mxu2 %v931_v26  ;;  %995 = vmatpush.msrb.mxu0 %v898_v0  ;;  %v921_v26 = vld [vmem:[%s4379_s3 + $0x100] sm:$0xff] }
 0x212   :  { %2806 = vrot.lane.b32.xlu2 %v2805_v49, %s2824_s13  ;;  %2801 = vrot.lane.b32.xlu1 %v2800_v50, %s2824_s13  ;;  %v907_v19 = vld [vmem:[%s4379_s3 + $0x90] sm:$0xff]  ;;  %v922_v49 = vld [vmem:[%s4379_s3 + $0x108] sm:$0xff] }
 0x213   :  { %1099 = vmatpush.msrb.mxu3 %v947_v28  ;;  %1030 = vmatpush.msrb.mxu1 %v914_v1  ;;  %v923_v8 = vld [vmem:[%s4379_s3 + $0x110] sm:$0xff]  ;;  %v938_v50 = vld [vmem:[%s4379_s3 + $0x188] sm:$0xff]  ;;  %v937_v28 = vld [vmem:[%s4379_s3 + $0x180] sm:$0xff]  ;;  %v2828_v1 = vmov 0  }
 0x214   :  { %1065 = vmatpush.msrb.mxu2 %v930_v51  ;;  %996 = vmatpush.msrb.mxu0 %v897_v53  ;;  %v939_v20 = vld [vmem:[%s4379_s3 + $0x190] sm:$0xff]  ;;  %v953_v0 = vld [vmem:[%s4380_s2] sm:$0xff]  ;;  %v958_v51 = vld [vmem:[%s4380_s2 + $0x28] sm:$0xff] }
 0x215   :  { %1100 = vmatpush.msrb.mxu3 %v946_v52  ;;  %1031 = vmatpush.msrb.mxu1 %v913_v54  ;;  %v954_v52 = vld [vmem:[%s4380_s2 + $0x8] sm:$0xff]  ;;  %v956_v53 = vld [vmem:[%s4380_s2 + $0x18] sm:$0xff] }
 0x216   :  { %1066 = vmatpush.msrb.mxu2 %v929_v57  ;;  %997 = vmatpush.msrb.mxu0 %v896_v59 }
 0x217   :  { %1101 = vmatpush.msrb.mxu3 %v945_v58  ;;  %1032 = vmatpush.msrb.mxu1 %v912_v60 }
 0x218   :  { %1067 = vmatpush.msrb.mxu2 %v928_v61  ;;  %998 = vmatpush.msrb.mxu0 %v895_v11 }
 0x219   :  { %1102 = vmatpush.msrb.mxu3 %v944_v5  ;;  %1033 = vmatpush.msrb.mxu1 %v911_v15 }
 0x21a   :  { %1068 = vmatpush.msrb.mxu2 %v927_v16  ;;  %999 = vmatpush.msrb.mxu0 %v894_v12 }
 0x21b   :  { %1103 = vmatpush.msrb.mxu3 %v943_v13  ;;  %1034 = vmatpush.msrb.mxu1 %v910_v17 }
 0x21c   :  { %1069 = vmatpush.msrb.mxu2 %v926_v14  ;;  %1000 = vmatpush.msrb.mxu0 %v893_v23 }
 0x21d   :  { %1104 = vmatpush.msrb.mxu3 %v942_v18  ;;  %1035 = vmatpush.msrb.mxu1 %v909_v24 }
 0x21e   :  { %1070 = vmatpush.msrb.mxu2 %v925_v33  ;;  %1001 = vmatpush.msrb.mxu0 %v892_v39 }
 0x21f   :  { %1105 = vmatpush.msrb.mxu3 %v941_v34  ;;  %1036 = vmatpush.msrb.mxu1 %v908_v40 }
 0x220   :  { %1071 = vmatpush.msrb.mxu2 %v924_v7  ;;  %1002 = vmatpush.msrb.mxu0 %v891_v22 }
 0x221   :  { %1106 = vmatpush.msrb.mxu3 %v940_v21  ;;  %1037 = vmatpush.msrb.mxu1 %v907_v19 }
 0x222   :  { %1072 = vmatpush.msrb.mxu2 %v923_v8  ;;  %1003 = vmatpush.msrb.mxu0 %v890_v9  ;;  %v955_v9 = vld [vmem:[%s4380_s2 + $0x10] sm:$0xff] }
 0x223   :  { %1107 = vmatpush.msrb.mxu3 %v939_v20  ;;  %1038 = vmatpush.msrb.mxu1 %v906_v10 }
 0x224   :  { %1073 = vmatpush.msrb.mxu2 %v922_v49  ;;  %1004 = vmatpush.msrb.mxu0 %v889_v27 }
 0x225   :  { %1108 = vmatpush.msrb.mxu3 %v938_v50  ;;  %1039 = vmatpush.msrb.mxu1 %v905_v25  ;;  %v1261_v25 = vld [vmem:[%s4381_s4 + $0x5b0] sm:$0xff] }
 0x226   :  { %1074 = vmatpush.msrb.mxu2 %v921_v26  ;;  %2810 = vset.pattern.permute.xlu0 %v2828_v1  ;;  %v1262_v26 = vld [vmem:[%s4381_s4 + $0x5b8] sm:$0xff] }
 0x227   :  { %1109 = vmatpush.msrb.mxu3 %v937_v28  ;;  %2811 = vset.pattern.permute.xlu1 %v2828_v1  ;;  %v1263_v28 = vld [vmem:[%s4381_s4 + $0x5c0] sm:$0xff] }
 0x228   :  { %961 = vperm.xlu0 %2810, %v953_v0   ;;  %2812 = vset.pattern.permute.xlu2 %v2828_v1  ;;  %v1264_v0 = vld [vmem:[%s4381_s4 + $0x5c8] sm:$0xff] }
 0x229   :  { %966 = vperm.xlu1 %2811, %v954_v52   ;;  %971 = vperm.xlu2 %2812, %v955_v9   ;;  %v1252_v1 = vld [vmem:[%s4381_s4 + $0x548] sm:$0xff]  ;;  %v1217_v9 = vld [vmem:[%s4381_s4 + $0x3b0] sm:$0xff] }
 0x230   :  { %986 = vperm.xlu0 %2810, %v958_v51  }
 0x231   :  { %976 = vperm.xlu1 %2811, %v956_v53  }
 0x24c   :  { %v2762_v54 = vpop.permute.xlu2 %2761 }
 0x24d   :  { %v2764_v23 = vunpack.i.h.bf16 %v2762_v54  ;;  %v2763_v24 = vunpack.i.l.bf16 %v2762_v54 }
 0x24f   :  { %v816_v7 = vsel %vm113_vm11, %v2763_v24, %v2764_v23 }
 0x250   :  { %v871_v20 = vmax.f32 %v3059_v55, %v816_v7  ;;  %v1272_v55 = vld [vmem:[%s4381_s4 + $0x628] sm:$0xff] }
 0x251   :  { %1349 = vmatpush.msra.mxu2 %v1272_v55  ;;  %v1219_v55 = vld [vmem:[%s4381_s4 + $0x3c0] sm:$0xff] }
 0x253   :  { %1350 = vmatpush.msra.mxu2 %v1263_v28 }
 0x254   :  { %v2777_v40 = vpop.permute.xlu2 %2776 }
 0x255   :  { %v2779_v19 = vunpack.i.h.bf16 %v2777_v40  ;;  %v2778_v8 = vunpack.i.l.bf16 %v2777_v40 }
 0x257   :  { %v817_v27 = vsel %vm113_vm11, %v2778_v8, %v2779_v19 }
 0x258   :  { %v873_v54 = vmax.f32 %v3111_v37, %v817_v27  ;;  %v1254_v37 = vld [vmem:[%s4381_s4 + $0x558] sm:$0xff] }
 0x259   :  { %1351 = vmatpush.msra.mxu2 %v1254_v37  ;;  %v1207_v37 = vld [vmem:[%s4381_s4 + $0x340] sm:$0xff] }
 0x25c   :  { %v2757_v57 = vpop.permute.xlu1 %2756  ;;  %v2752_v58 = vpop.permute.xlu0 %2751 }
 0x25d   :  { %v2759_v59 = vunpack.i.h.bf16 %v2757_v57  ;;  %v2758_v60 = vunpack.i.l.bf16 %v2757_v57  ;;  %v2754_v61 = vunpack.i.h.bf16 %v2752_v58  ;;  %v2753_v5 = vunpack.i.l.bf16 %v2752_v58 }
 0x25f   :  { %v811_v11 = vsel %vm113_vm11, %v2758_v60, %v2759_v59  ;;  %v812_v15 = vsel %vm113_vm11, %v2759_v59, %v2753_v5  ;;  %v813_v16 = vsel %vm113_vm11, %v2753_v5, %v2754_v61  ;;  %v859_v13 = vsel %vm113_vm11, %v2754_v61, %v2758_v60  ;;  %v957_v60 = vld [vmem:[%s4380_s2 + $0x20] sm:$0xff]  ;;  %v1253_v61 = vld [vmem:[%s4381_s4 + $0x550] sm:$0xff]  ;;  %v1244_v5 = vld [vmem:[%s4381_s4 + $0x4e8] sm:$0xff] }
 0x260   :  { %v865_v12 = vmax.f32 %v3034_v42, %v811_v11  ;;  %v866_v17 = vmax.f32 %v3036_v43, %v812_v15  ;;  %v867_v14 = vmax.f32 %v3038_v44, %v813_v16  ;;  %v868_v18 = vmax.f32 %v3040_v45, %v859_v13  ;;  %981 = vperm.xlu2 %2812, %v957_v60   ;;  %v1245_v16 = vld [vmem:[%s4381_s4 + $0x4f0] sm:$0xff] }
 0x261   :  { %1352 = vmatpush.msra.mxu2 %v1245_v16  ;;  %v1192_v16 = vld [vmem:[%s4381_s4 + $0x288] sm:$0xff] }
 0x262   :  { %1005 = vmatmul.f32.vlgmr.msrb.gmra.mxu0 %v865_v12  ;;  %1040 = vmatmul.f32.vlgmr.msrb.gmra.mxu1 %v866_v17 }
 0x263   :  { %1075 = vmatmul.f32.vlgmr.msrb.gmra.mxu2 %v867_v14  ;;  %1110 = vmatmul.f32.vlgmr.msrb.gmra.mxu3 %v868_v18  ;;  %v1246_v18 = vld [vmem:[%s4381_s4 + $0x4f8] sm:$0xff] }
 0x264   :  { %v2767_v33 = vpop.permute.xlu0 %2766 }
 0x265   :  { %v2769_v34 = vunpack.i.h.bf16 %v2767_v33  ;;  %v2768_v39 = vunpack.i.l.bf16 %v2767_v33 }
 0x267   :  { %v814_v42 = vsel %vm113_vm11, %v2768_v39, %v2769_v34  ;;  %v815_v43 = vsel %vm113_vm11, %v2769_v34, %v2763_v24  ;;  %v860_v44 = vsel %vm113_vm11, %v2764_v23, %v2768_v39  ;;  %v1234_v23 = vld [vmem:[%s4381_s4 + $0x478] sm:$0xff]  ;;  %v1235_v24 = vld [vmem:[%s4381_s4 + $0x480] sm:$0xff] }
 0x268   :  { %v869_v45 = vmax.f32 %v3053_v3, %v814_v42  ;;  %v870_v21 = vmax.f32 %v3056_v6, %v815_v43  ;;  %v872_v22 = vmax.f32 %v3062_v56, %v860_v44  ;;  %v1270_v3 = vld [vmem:[%s4381_s4 + $0x618] sm:$0xff]  ;;  %v1271_v6 = vld [vmem:[%s4381_s4 + $0x620] sm:$0xff]  ;;  %v1273_v56 = vld [vmem:[%s4381_s4 + $0x630] sm:$0xff] }
 0x269   :  { %1279 = vmatpush.msra.mxu0 %v1270_v3  ;;  %1314 = vmatpush.msra.mxu1 %v1271_v6  ;;  %v1218_v6 = vld [vmem:[%s4381_s4 + $0x3b8] sm:$0xff] }
 0x26a   :  { %1008 = vmatmul.f32.gmra.mxu0 %v869_v45  ;;  %1043 = vmatmul.f32.gmra.mxu1 %v870_v21  ;;  %v1236_v45 = vld [vmem:[%s4381_s4 + $0x488] sm:$0xff]  ;;  %v1237_v21 = vld [vmem:[%s4381_s4 + $0x490] sm:$0xff] }
 0x26b   :  { %1078 = vmatmul.f32.gmra.mxu2 %v871_v20  ;;  %1113 = vmatmul.f32.gmra.mxu3 %v872_v22  ;;  %v1216_v20 = vld [vmem:[%s4381_s4 + $0x3a8] sm:$0xff] }
 0x26c   :  { %v2772_v10 = vpop.permute.xlu1 %2771  ;;  %1384 = vmatpush.msra.mxu3 %v1273_v56  ;;  %1280 = vmatpush.msra.mxu0 %v1261_v25 }
 0x26d   :  { %v2774_v49 = vunpack.i.h.bf16 %v2772_v10  ;;  %v2773_v50 = vunpack.i.l.bf16 %v2772_v10  ;;  %1315 = vmatpush.msra.mxu1 %v1262_v26  ;;  %1353 = vmatpush.msra.mxu2 %v1236_v45  ;;  %v1156_v45 = vld [vmem:[%s4381_s4 + $0xe8] sm:$0xff] }
 0x26e   :  { %1385 = vmatpush.msra.mxu3 %v1264_v0  ;;  %1281 = vmatpush.msra.mxu0 %v1252_v1 }
 0x26f   :  { %v818_v51 = vsel %vm113_vm11, %v2779_v19, %v2773_v50  ;;  %v819_v52 = vsel %vm113_vm11, %v2773_v50, %v2774_v49  ;;  %v861_v53 = vsel %vm113_vm11, %v2774_v49, %v2778_v8  ;;  %1316 = vmatpush.msra.mxu1 %v1253_v61  ;;  %v1228_v19 = vld [vmem:[%s4381_s4 + $0x428] sm:$0xff] }
 0x270   :  { %v874_v57 = vmax.f32 %v3114_v38, %v818_v51  ;;  %v875_v58 = vmax.f32 %v3105_v35, %v819_v52  ;;  %v876_v59 = vmax.f32 %v3108_v36, %v861_v53  ;;  %v1255_v35 = vld [vmem:[%s4381_s4 + $0x560] sm:$0xff]  ;;  %v3428_v36 = vpop.permute.xlu2 %2791 }
 0x271   :  { %v1243_v38 = vld [vmem:[%s4381_s4 + $0x4e0] sm:$0xff]  ;;  %1386 = vmatpush.msra.mxu3 %v1255_v35  ;;  %1317 = vmatpush.msra.mxu1 %v1244_v5  ;;  %v2794_v22 = vunpack.i.h.bf16 %v3428_v36  ;;  %v1208_v35 = vld [vmem:[%s4381_s4 + $0x348] sm:$0xff]  ;;  %v1189_v5 = vld [vmem:[%s4381_s4 + $0x270] sm:$0xff] }
 0x272   :  { %1011 = vmatmul.f32.gmra.mxu0 %v873_v54  ;;  %1046 = vmatmul.f32.gmra.mxu1 %v874_v57 }
 0x273   :  { %1081 = vmatmul.f32.gmra.mxu2 %v875_v58  ;;  %1116 = vmatmul.f32.gmra.mxu3 %v876_v59 }
 0x274   :  { %v2787_v11 = vpop.permute.xlu1 %2786  ;;  %v2782_v15 = vpop.permute.xlu0 %2781  ;;  %1282 = vmatpush.msra.mxu0 %v1243_v38  ;;  %1387 = vmatpush.msra.mxu3 %v1246_v18  ;;  %v1201_v38 = vld [vmem:[%s4381_s4 + $0x2f0] sm:$0xff]  ;;  %v1171_v18 = vld [vmem:[%s4381_s4 + $0x1a0] sm:$0xff] }
 0x275   :  { %v2789_v13 = vunpack.i.h.bf16 %v2787_v11  ;;  %v2788_v12 = vunpack.i.l.bf16 %v2787_v11  ;;  %v2784_v17 = vunpack.i.h.bf16 %v2782_v15  ;;  %v2783_v14 = vunpack.i.l.bf16 %v2782_v15  ;;  %1318 = vmatpush.msra.mxu1 %v1235_v24  ;;  %v1190_v11 = vld [vmem:[%s4381_s4 + $0x278] sm:$0xff]  ;;  %v1191_v15 = vld [vmem:[%s4381_s4 + $0x280] sm:$0xff]  ;;  %v1173_v24 = vld [vmem:[%s4381_s4 + $0x1b0] sm:$0xff] }
 0x276   :  { %1283 = vmatpush.msra.mxu0 %v1234_v23  ;;  %1388 = vmatpush.msra.mxu3 %v1237_v21  ;;  %v1172_v23 = vld [vmem:[%s4381_s4 + $0x1a8] sm:$0xff] }
 0x277   :  { %v820_v33 = vsel %vm113_vm11, %v2788_v12, %v2789_v13  ;;  %v821_v34 = vsel %vm113_vm11, %v2789_v13, %v2783_v14  ;;  %v822_v39 = vsel %vm113_vm11, %v2783_v14, %v2784_v17  ;;  %v862_v40 = vsel %vm113_vm11, %v2784_v17, %v2788_v12  ;;  %v1180_v13 = vld [vmem:[%s4381_s4 + $0x208] sm:$0xff]  ;;  %v1181_v12 = vld [vmem:[%s4381_s4 + $0x210] sm:$0xff]  ;;  %v1182_v17 = vld [vmem:[%s4381_s4 + $0x218] sm:$0xff] }
 0x278   :  { %v877_v7 = vmax.f32 %v3157_v62, %v820_v33  ;;  %v878_v42 = vmax.f32 %v3160_v63, %v821_v34  ;;  %v879_v43 = vmax.f32 %v3163_v2, %v822_v39  ;;  %v880_v44 = vmax.f32 %v3166_v4, %v862_v40  ;;  %v1225_v63 = vld [vmem:[%s4381_s4 + $0x410] sm:$0xff]  ;;  %v1226_v2 = vld [vmem:[%s4381_s4 + $0x418] sm:$0xff]  ;;  %v1227_v4 = vld [vmem:[%s4381_s4 + $0x420] sm:$0xff]  ;;  %v2807_v56 = vpop.permute.xlu2 %2806  ;;  %1389 = vmatpush.msra.mxu3 %v1228_v19 }
 0x279   :  { %v2793_v62 = vunpack.i.l.bf16 %v3428_v36  ;;  %1284 = vmatpush.msra.mxu0 %v1225_v63  ;;  %1319 = vmatpush.msra.mxu1 %v1226_v2  ;;  %v2809_v1 = vunpack.i.h.bf16 %v2807_v56  ;;  %v2808_v51 = vunpack.i.l.bf16 %v2807_v56  ;;  %v1200_v36 = vld [vmem:[%s4381_s4 + $0x2e8] sm:$0xff]  ;;  %v1183_v14 = vld [vmem:[%s4381_s4 + $0x220] sm:$0xff]  ;;  %v1174_v33 = vld [vmem:[%s4381_s4 + $0x1b8] sm:$0xff] }
 0x27a   :  { %1014 = vmatmul.f32.gmra.mxu0 %v877_v7  ;;  %1049 = vmatmul.f32.gmra.mxu1 %v878_v42  ;;  %v1162_v34 = vld [vmem:[%s4381_s4 + $0x138] sm:$0xff]  ;;  %v1163_v39 = vld [vmem:[%s4381_s4 + $0x140] sm:$0xff]  ;;  %v1164_v40 = vld [vmem:[%s4381_s4 + $0x148] sm:$0xff] }
 0x27b   :  { %1084 = vmatmul.f32.gmra.mxu2 %v879_v43  ;;  %1119 = vmatmul.f32.gmra.mxu3 %v880_v44  ;;  %v825_v49 = vsel %vm113_vm11, %v2793_v62, %v2794_v22  ;;  %v826_v58 = vsel %vm113_vm11, %v2808_v51, %v2809_v1  ;;  %v1165_v7 = vld [vmem:[%s4381_s4 + $0x150] sm:$0xff]  ;;  %v1154_v43 = vld [vmem:[%s4381_s4 + $0xd8] sm:$0xff]  ;;  %v1155_v44 = vld [vmem:[%s4381_s4 + $0xe0] sm:$0xff] }
 0x27c   :  { %v2797_v8 = vpop.permute.xlu0 %2796  ;;  %1354 = vmatpush.msra.mxu2 %v1227_v4  ;;  %1285 = vmatpush.msra.mxu0 %v1216_v20  ;;  %v883_v52 = vmax.f32 %v3185_v31, %v825_v49  ;;  %v885_v59 = vmax.f32 %v3201_v41, %v826_v58  ;;  %v1209_v41 = vld [vmem:[%s4381_s4 + $0x350] sm:$0xff]  ;;  %v1144_v21 = vld [vmem:[%s4381_s4 + $0x68] sm:$0xff]  ;;  %v1147_v63 = vld [vmem:[%s4381_s4 + $0x80] sm:$0xff] }
 0x27d   :  { %v2799_v3 = vunpack.i.h.bf16 %v2797_v8  ;;  %v2798_v10 = vunpack.i.l.bf16 %v2797_v8  ;;  %1320 = vmatpush.msra.mxu1 %v1217_v9  ;;  %1390 = vmatpush.msra.mxu3 %v1219_v55  ;;  %v1153_v42 = vld [vmem:[%s4381_s4 + $0xd0] sm:$0xff]  ;;  %v1135_v2 = vld [vmem:[%s4381_s4] sm:$0xff]  ;;  %v1136_v4 = vld [vmem:[%s4381_s4 + $0x8] sm:$0xff] }
 0x27e   :  { %1355 = vmatpush.msra.mxu2 %v1218_v6  ;;  %1286 = vmatpush.msra.mxu0 %v1207_v37  ;;  %v1137_v19 = vld [vmem:[%s4381_s4 + $0x10] sm:$0xff]  ;;  %v1138_v8 = vld [vmem:[%s4381_s4 + $0x18] sm:$0xff]  ;;  %v1275_v9 = vld [vmem:[%s4381_s4 + $0x640] sm:$0xff] }
 0x27f   :  { %v823_v50 = vsel %vm113_vm11, %v2798_v10, %v2799_v3  ;;  %v824_v27 = vsel %vm113_vm11, %v2799_v3, %v2793_v62  ;;  %v863_v25 = vsel %vm113_vm11, %v2794_v22, %v2798_v10  ;;  %1321 = vmatpush.msra.mxu1 %v1208_v35  ;;  %v1145_v22 = vld [vmem:[%s4381_s4 + $0x70] sm:$0xff]  ;;  %v1146_v62 = vld [vmem:[%s4381_s4 + $0x78] sm:$0xff]  ;;  %v1276_v3 = vld [vmem:[%s4381_s4 + $0x648] sm:$0xff] }
 0x280   :  { %v881_v26 = vmax.f32 %v3179_v29, %v823_v50  ;;  %v882_v28 = vmax.f32 %v3182_v30, %v824_v27  ;;  %v884_v0 = vmax.f32 %v3188_v32, %v863_v25  ;;  %1356 = vmatpush.msra.mxu2 %v1209_v41  ;;  %v1274_v20 = vld [vmem:[%s4381_s4 + $0x638] sm:$0xff]  ;;  %v1277_v55 = vld [vmem:[%s4381_s4 + $0x650] sm:$0xff]  ;;  %v1267_v27 = vld [vmem:[%s4381_s4 + $0x5e0] sm:$0xff] }
 0x281   :  { %v1265_v49 = vld [vmem:[%s4381_s4 + $0x5d0] sm:$0xff]  ;;  %v1266_v50 = vld [vmem:[%s4381_s4 + $0x5d8] sm:$0xff] }
 0x282   :  { %1017 = vmatmul.f32.gmra.mxu0 %v881_v26  ;;  %1052 = vmatmul.f32.gmra.mxu1 %v882_v28  ;;  %v1268_v26 = vld [vmem:[%s4381_s4 + $0x5e8] sm:$0xff]  ;;  %v1241_v35 = vld [vmem:[%s4381_s4 + $0x4b0] sm:$0xff] }
 0x283   :  { %1087 = vmatmul.f32.gmra.mxu2 %v883_v52  ;;  %1122 = vmatmul.f32.gmra.mxu3 %v884_v0  ;;  %v1256_v28 = vld [vmem:[%s4381_s4 + $0x568] sm:$0xff]  ;;  %v1257_v0 = vld [vmem:[%s4381_s4 + $0x570] sm:$0xff]  ;;  %v1247_v52 = vld [vmem:[%s4381_s4 + $0x500] sm:$0xff] }
 0x284   :  { %v2802_v53 = vpop.permute.xlu1 %2801  ;;  %1357 = vmatpush.msra.mxu2 %v1200_v36 }
 0x285   :  { %v2804_v54 = vunpack.i.h.bf16 %v2802_v53  ;;  %v2803_v57 = vunpack.i.l.bf16 %v2802_v53  ;;  %v1248_v53 = vld [vmem:[%s4381_s4 + $0x508] sm:$0xff] }
 0x286   :  { %1358 = vmatpush.msra.mxu2 %v1191_v15  ;;  %v1221_v15 = vld [vmem:[%s4381_s4 + $0x3d0] sm:$0xff] }
 0x287   :  { %v827_v29 = vsel %vm113_vm11, %v2809_v1, %v2803_v57  ;;  %v828_v30 = vsel %vm113_vm11, %v2803_v57, %v2804_v54  ;;  %v864_v32 = vsel %vm113_vm11, %v2804_v54, %v2808_v51  ;;  %v1258_v1 = vld [vmem:[%s4381_s4 + $0x578] sm:$0xff]  ;;  %v1259_v51 = vld [vmem:[%s4381_s4 + $0x580] sm:$0xff]  ;;  %v1249_v54 = vld [vmem:[%s4381_s4 + $0x510] sm:$0xff] }
 0x288   :  { %v886_v60 = vmax.f32 %v3204_v46, %v827_v29  ;;  %v887_v31 = vmax.f32 %v3207_v47, %v828_v30  ;;  %v888_v61 = vmax.f32 %v3210_v48, %v864_v32  ;;  %v1210_v46 = vld [vmem:[%s4381_s4 + $0x358] sm:$0xff]  ;;  %v1199_v48 = vld [vmem:[%s4381_s4 + $0x2e0] sm:$0xff]  ;;  %1359 = vmatpush.msra.mxu2 %v1182_v17 }
 0x289   :  { %v1198_v47 = vld [vmem:[%s4381_s4 + $0x2d8] sm:$0xff]  ;;  %1391 = vmatpush.msra.mxu3 %v1210_v46  ;;  %1322 = vmatpush.msra.mxu1 %v1199_v48  ;;  %v1229_v46 = vld [vmem:[%s4381_s4 + $0x430] sm:$0xff]  ;;  %v1231_v48 = vld [vmem:[%s4381_s4 + $0x440] sm:$0xff] }
 0x28a   :  { %1020 = vmatmul.f32.gmra.mxu0 %v885_v59  ;;  %1055 = vmatmul.f32.gmra.mxu1 %v886_v60  ;;  %v1250_v57 = vld [vmem:[%s4381_s4 + $0x518] sm:$0xff]  ;;  %v1239_v59 = vld [vmem:[%s4381_s4 + $0x4a0] sm:$0xff]  ;;  %v1240_v60 = vld [vmem:[%s4381_s4 + $0x4a8] sm:$0xff] }
 0x28b   :  { %1090 = vmatmul.f32.gmra.mxu2 %v887_v31  ;;  %1125 = vmatmul.f32.gmra.mxu3 %v888_v61  ;;  %v1238_v32 = vld [vmem:[%s4381_s4 + $0x498] sm:$0xff]  ;;  %v1211_v17 = vld [vmem:[%s4381_s4 + $0x360] sm:$0xff] }
 0x28c   :  { %1287 = vmatpush.msra.mxu0 %v1198_v47  ;;  %1392 = vmatpush.msra.mxu3 %v1201_v38  ;;  %v1230_v47 = vld [vmem:[%s4381_s4 + $0x438] sm:$0xff] }
 0x28d   :  { %1323 = vmatpush.msra.mxu1 %v1190_v11  ;;  %1360 = vmatpush.msra.mxu2 %v1173_v24  ;;  %v1220_v11 = vld [vmem:[%s4381_s4 + $0x3c8] sm:$0xff]  ;;  %v1214_v24 = vld [vmem:[%s4381_s4 + $0x378] sm:$0xff] }
 0x28e   :  { %1288 = vmatpush.msra.mxu0 %v1189_v5  ;;  %1393 = vmatpush.msra.mxu3 %v1192_v16  ;;  %v1232_v5 = vld [vmem:[%s4381_s4 + $0x448] sm:$0xff]  ;;  %v1222_v16 = vld [vmem:[%s4381_s4 + $0x3d8] sm:$0xff] }
 0x28f   :  { %1324 = vmatpush.msra.mxu1 %v1181_v12  ;;  %1361 = vmatpush.msra.mxu2 %v1164_v40  ;;  %v1223_v12 = vld [vmem:[%s4381_s4 + $0x3e0] sm:$0xff] }
 0x290   :  { %1289 = vmatpush.msra.mxu0 %v1180_v13  ;;  %1394 = vmatpush.msra.mxu3 %v1183_v14  ;;  %v1212_v14 = vld [vmem:[%s4381_s4 + $0x368] sm:$0xff]  ;;  %v1203_v40 = vld [vmem:[%s4381_s4 + $0x300] sm:$0xff] }
 0x291   :  { %1325 = vmatpush.msra.mxu1 %v1172_v23  ;;  %1362 = vmatpush.msra.mxu2 %v1155_v44  ;;  %v1213_v23 = vld [vmem:[%s4381_s4 + $0x370] sm:$0xff]  ;;  %v1204_v44 = vld [vmem:[%s4381_s4 + $0x308] sm:$0xff] }
 0x292   :  { %1290 = vmatpush.msra.mxu0 %v1171_v18  ;;  %1395 = vmatpush.msra.mxu3 %v1174_v33 }
 0x293   :  { %1326 = vmatpush.msra.mxu1 %v1163_v39  ;;  %1363 = vmatpush.msra.mxu2 %v1146_v62  ;;  %v1202_v39 = vld [vmem:[%s4381_s4 + $0x2f8] sm:$0xff] }
 0x294   :  { %1291 = vmatpush.msra.mxu0 %v1162_v34  ;;  %1396 = vmatpush.msra.mxu3 %v1165_v7  ;;  %v1194_v62 = vld [vmem:[%s4381_s4 + $0x298] sm:$0xff] }
 0x295   :  { %1327 = vmatpush.msra.mxu1 %v1154_v43  ;;  %1364 = vmatpush.msra.mxu2 %v1137_v19  ;;  %v1196_v19 = vld [vmem:[%s4381_s4 + $0x2a8] sm:$0xff] }
 0x296   :  { %1292 = vmatpush.msra.mxu0 %v1153_v42  ;;  %1397 = vmatpush.msra.mxu3 %v1156_v45  ;;  %v1205_v45 = vld [vmem:[%s4381_s4 + $0x310] sm:$0xff] }
 0x297   :  { %1328 = vmatpush.msra.mxu1 %v1145_v22  ;;  %1489 = vmatpush.msrb.mxu2 %v1276_v3  ;;  %v1193_v22 = vld [vmem:[%s4381_s4 + $0x290] sm:$0xff] }
 0x298   :  { %1293 = vmatpush.msra.mxu0 %v1144_v21  ;;  %1398 = vmatpush.msra.mxu3 %v1147_v63  ;;  %v972_v21 = vpop.permute.xlu2 %971 }
 0x299   :  { %1329 = vmatpush.msra.mxu1 %v1136_v4  ;;  %1490 = vmatpush.msrb.mxu2 %v1267_v27  ;;  %v1195_v4 = vld [vmem:[%s4381_s4 + $0x2a0] sm:$0xff] }
 0x29a   :  { %1294 = vmatpush.msra.mxu0 %v1135_v2  ;;  %1399 = vmatpush.msra.mxu3 %v1138_v8  ;;  %v962_v56 = vpop.permute.xlu0 %961 }
 0x29b   :  { %1454 = vmatpush.msrb.mxu1 %v1275_v9  ;;  %1491 = vmatpush.msrb.mxu2 %v1258_v1  ;;  %v967_v41 = vpop.permute.xlu1 %966  ;;  %v1185_v9 = vld [vmem:[%s4381_s4 + $0x230] sm:$0xff] }
 0x29c   :  { %1419 = vmatpush.msrb.mxu0 %v1274_v20  ;;  %1524 = vmatpush.msrb.mxu3 %v1277_v55  ;;  %v1184_v20 = vld [vmem:[%s4381_s4 + $0x228] sm:$0xff] }
 0x29d   :  { %1455 = vmatpush.msrb.mxu1 %v1266_v50  ;;  %1492 = vmatpush.msrb.mxu2 %v1249_v54  ;;  %v1176_v50 = vld [vmem:[%s4381_s4 + $0x1c8] sm:$0xff] }
 0x29e   :  { %1420 = vmatpush.msrb.mxu0 %v1265_v49  ;;  %1525 = vmatpush.msrb.mxu3 %v1268_v26  ;;  %v1175_v49 = vld [vmem:[%s4381_s4 + $0x1c0] sm:$0xff]  ;;  %v1177_v26 = vld [vmem:[%s4381_s4 + $0x1d0] sm:$0xff] }
 0x29f   :  { %1456 = vmatpush.msrb.mxu1 %v1257_v0  ;;  %1493 = vmatpush.msrb.mxu2 %v1240_v60  ;;  %v1159_v60 = vld [vmem:[%s4381_s4 + $0x100] sm:$0xff] }
 0x2a0   :  { %1421 = vmatpush.msrb.mxu0 %v1256_v28  ;;  %1526 = vmatpush.msrb.mxu3 %v1259_v51  ;;  %v1178_v28 = vld [vmem:[%s4381_s4 + $0x1d8] sm:$0xff] }
 0x2a1   :  { %1457 = vmatpush.msrb.mxu1 %v1248_v53  ;;  %1494 = vmatpush.msrb.mxu2 %v1231_v48  ;;  %v1166_v51 = vld [vmem:[%s4381_s4 + $0x158] sm:$0xff] }
 0x2a2   :  { %1422 = vmatpush.msrb.mxu0 %v1247_v52  ;;  %1527 = vmatpush.msrb.mxu3 %v1250_v57  ;;  %v1167_v52 = vld [vmem:[%s4381_s4 + $0x160] sm:$0xff]  ;;  %v1168_v57 = vld [vmem:[%s4381_s4 + $0x168] sm:$0xff]  ;;  %v1150_v48 = vld [vmem:[%s4381_s4 + $0x98] sm:$0xff] }
 0x2a3   :  { %1458 = vmatpush.msrb.mxu1 %v1239_v59  ;;  %1495 = vmatpush.msrb.mxu2 %v1222_v16  ;;  %v977_v0 = vpop.permute.xlu1 %976 }
 0x2a4   :  { %1423 = vmatpush.msrb.mxu0 %v1238_v32  ;;  %1528 = vmatpush.msrb.mxu3 %v1241_v35  ;;  %v1158_v32 = vld [vmem:[%s4381_s4 + $0xf8] sm:$0xff]  ;;  %v1148_v35 = vld [vmem:[%s4381_s4 + $0x88] sm:$0xff] }
 0x2a5   :  { %1459 = vmatpush.msrb.mxu1 %v1230_v47  ;;  %1496 = vmatpush.msrb.mxu2 %v1213_v23 }
 0x2a6   :  { %1424 = vmatpush.msrb.mxu0 %v1229_v46  ;;  %1529 = vmatpush.msrb.mxu3 %v1232_v5  ;;  %v1139_v5 = vld [vmem:[%s4381_s4 + $0x20] sm:$0xff] }
 0x2a7   :  { %1460 = vmatpush.msrb.mxu1 %v1221_v15  ;;  %1497 = vmatpush.msrb.mxu2 %v1204_v44 }
 0x2a8   :  { %1425 = vmatpush.msrb.mxu0 %v1220_v11  ;;  %1530 = vmatpush.msrb.mxu3 %v1223_v12  ;;  %v1140_v11 = vld [vmem:[%s4381_s4 + $0x28] sm:$0xff]  ;;  %v1141_v12 = vld [vmem:[%s4381_s4 + $0x30] sm:$0xff] }
 0x2a9   :  { %1461 = vmatpush.msrb.mxu1 %v1212_v14  ;;  %1498 = vmatpush.msrb.mxu2 %v1195_v4  ;;  %v1260_v4 = vld [vmem:[%s4381_s4 + $0x588] sm:$0xff] }
 0x2aa   :  { %1426 = vmatpush.msrb.mxu0 %v1211_v17  ;;  %1531 = vmatpush.msrb.mxu3 %v1214_v24  ;;  %v1142_v17 = vld [vmem:[%s4381_s4 + $0x38] sm:$0xff] }
 0x2ab   :  { %1462 = vmatpush.msrb.mxu1 %v1203_v40  ;;  %v987_v40 = vpop.permute.xlu0 %986 }
 0x2ac   :  { %1427 = vmatpush.msrb.mxu0 %v1202_v39  ;;  %1532 = vmatpush.msrb.mxu3 %v1205_v45 }
 0x2ad   :  { %1463 = vmatpush.msrb.mxu1 %v1194_v62  ;;  %v1269_v62 = vld [vmem:[%s4381_s4 + $0x5f0] sm:$0xff] }
 0x2ae   :  { %1428 = vmatpush.msrb.mxu0 %v1193_v22  ;;  %1533 = vmatpush.msrb.mxu3 %v1196_v19  ;;  %v1278_v22 = vld [vmem:[%s4381_s4 + $0x658] sm:$0xff] }
 0x2af   :  { %1464 = vmatpush.msrb.mxu1 %v1185_v9  ;;  %v1251_v9 = vld [vmem:[%s4381_s4 + $0x520] sm:$0xff] }
 0x2b0   :  { %1429 = vmatpush.msrb.mxu0 %v1184_v20 }
 0x2b1   :  { %1465 = vmatpush.msrb.mxu1 %v1176_v50  ;;  %v1188_v50 = vld [vmem:[%s4381_s4 + $0x248] sm:$0xff] }
 0x2b2   :  { %1430 = vmatpush.msrb.mxu0 %v1175_v49  ;;  %v1197_v49 = vld [vmem:[%s4381_s4 + $0x2b0] sm:$0xff] }
 0x2b3   :  { %1466 = vmatpush.msrb.mxu1 %v1167_v52 }
 0x2b4   :  { %1431 = vmatpush.msrb.mxu0 %v1166_v51 }
 0x2b5   :  { %1467 = vmatpush.msrb.mxu1 %v1158_v32 }
 0x2df   :  { %v1006_v10 = vpop.f32.mrf.mxu0  ;;  %v1041_v6 = vpop.f32.mrf.mxu1 }
 0x2e0   :  { %v1007_v25 = vadd.f32 %v1006_v10, %v962_v56  ;;  %v1186_v10 = vld [vmem:[%s4381_s4 + $0x238] sm:$0xff] }
 0x2e1   :  { %1499 = vmatpush.msrb.mxu2 %v1186_v10  ;;  %v1233_v10 = vld [vmem:[%s4381_s4 + $0x450] sm:$0xff] }
 0x2e2   :  { %v1042_v58 = vadd.f32 %v1041_v6, %v1007_v25  ;;  %v1187_v6 = vld [vmem:[%s4381_s4 + $0x240] sm:$0xff] }
 0x2e3   :  { %1534 = vmatpush.msrb.mxu3 %v1187_v6  ;;  %1500 = vmatpush.msrb.mxu2 %v1177_v26  ;;  %v1224_v6 = vld [vmem:[%s4381_s4 + $0x3e8] sm:$0xff]  ;;  %v1161_v26 = vld [vmem:[%s4381_s4 + $0x110] sm:$0xff] }
 0x2e5   :  { %1535 = vmatpush.msrb.mxu3 %v1178_v28  ;;  %1501 = vmatpush.msrb.mxu2 %v1168_v57  ;;  %v1152_v28 = vld [vmem:[%s4381_s4 + $0xa8] sm:$0xff] }
 0x2e6   :  { %v1076_v29 = vpop.f32.mrf.mxu2  ;;  %v1111_v30 = vpop.f32.mrf.mxu3 }
 0x2e7   :  { %v1077_v31 = vadd.f32 %v1076_v29, %v1042_v58  ;;  %v1009_v61 = vpop.f32.mrf.mxu0  ;;  %v1044_v37 = vpop.f32.mrf.mxu1  ;;  %v1169_v58 = vld [vmem:[%s4381_s4 + $0x170] sm:$0xff]  ;;  %1502 = vmatpush.msrb.mxu2 %v1159_v60 }
 0x2e8   :  { %v1010_v38 = vadd.f32 %v1009_v61, %v967_v41  ;;  %1536 = vmatpush.msrb.mxu3 %v1169_v58  ;;  %v1149_v41 = vld [vmem:[%s4381_s4 + $0x90] sm:$0xff] }
 0x2e9   :  { %v1112_v36 = vadd.f32 %v1111_v30, %v1077_v31  ;;  %v1157_v30 = vld [vmem:[%s4381_s4 + $0xf0] sm:$0xff]  ;;  %v1160_v31 = vld [vmem:[%s4381_s4 + $0x108] sm:$0xff]  ;;  %1468 = vmatpush.msrb.mxu1 %v1149_v41  ;;  %1503 = vmatpush.msrb.mxu2 %v1150_v48 }
 0x2ea   :  { %v1045_v18 = vadd.f32 %v1044_v37, %v1010_v38  ;;  %1432 = vmatpush.msrb.mxu0 %v1157_v30  ;;  %v982_v38 = vpop.permute.xlu2 %981  ;;  %1537 = vmatpush.msrb.mxu3 %v1160_v31 }
 0x2eb   :  { %v3693_v13 = vmax.f32 %v1112_v36, 0.0  ;;  %v1151_v36 = vld [vmem:[%s4381_s4 + $0xa0] sm:$0xff]  ;;  %1469 = vmatpush.msrb.mxu1 %v1140_v11  ;;  %1504 = vmatpush.msrb.mxu2 %v1141_v12 }
 0x2ec   :  { %1433 = vmatpush.msrb.mxu0 %v1148_v35  ;;  %1538 = vmatpush.msrb.mxu3 %v1151_v36 }
 0x2ed   :  { %1295 = vmatmul.f32.vlgmr.msra.gmra.mxu0 %v3693_v13  ;;  %1330 = vmatmul.f32.vlgmr.msra.gmra.mxu1 %v3693_v13 }
 0x2ee   :  { %1365 = vmatmul.f32.vlgmr.msra.gmra.mxu2 %v3693_v13  ;;  %1400 = vmatmul.f32.vlgmr.msra.gmra.mxu3 %v3693_v13  ;;  %v1079_v33 = vpop.f32.mrf.mxu2  ;;  %v1114_v34 = vpop.f32.mrf.mxu3 }
 0x2ef   :  { %v1080_v7 = vadd.f32 %v1079_v33, %v1045_v18  ;;  %v1012_v42 = vpop.f32.mrf.mxu0  ;;  %v1047_v43 = vpop.f32.mrf.mxu1  ;;  %1434 = vmatpush.msrb.mxu0 %v1139_v5  ;;  %1539 = vmatpush.msrb.mxu3 %v1142_v17 }
 0x2f0   :  { %v1013_v2 = vadd.f32 %v1012_v42, %v972_v21 }
 0x2f1   :  { %v1115_v63 = vadd.f32 %v1114_v34, %v1080_v7  ;;  %1559 = vmatpush.msra.mxu0 %v1278_v22 }
 0x2f2   :  { %v1048_v3 = vadd.f32 %v1047_v43, %v1013_v2 }
 0x2f3   :  { %v3738_v8 = vmax.f32 %v1115_v63, 0.0  ;;  %1560 = vmatpush.msra.mxu0 %v1269_v62 }
 0x2f5   :  { %1298 = vmatmul.f32.gmra.mxu0 %v3738_v8  ;;  %1333 = vmatmul.f32.gmra.mxu1 %v3738_v8 }
 0x2f6   :  { %1368 = vmatmul.f32.gmra.mxu2 %v3738_v8  ;;  %1403 = vmatmul.f32.gmra.mxu3 %v3738_v8  ;;  %v1082_v55 = vpop.f32.mrf.mxu2  ;;  %v1117_v56 = vpop.f32.mrf.mxu3 }
 0x2f7   :  { %v1083_v27 = vadd.f32 %v1082_v55, %v1048_v3  ;;  %v1015_v25 = vpop.f32.mrf.mxu0  ;;  %v1050_v1 = vpop.f32.mrf.mxu1  ;;  %1561 = vmatpush.msra.mxu0 %v1260_v4  ;;  %v1242_v3 = vld [vmem:[%s4381_s4 + $0x4b8] sm:$0xff]  ;;  %v1215_v55 = vld [vmem:[%s4381_s4 + $0x380] sm:$0xff] }
 0x2f8   :  { %v1016_v54 = vadd.f32 %v1015_v25, %v977_v0  ;;  %v1170_v25 = vld [vmem:[%s4381_s4 + $0x178] sm:$0xff]  ;;  %v1143_v0 = vld [vmem:[%s4381_s4 + $0x40] sm:$0xff] }
 0x2f9   :  { %v1118_v53 = vadd.f32 %v1117_v56, %v1083_v27  ;;  %1562 = vmatpush.msra.mxu0 %v1251_v9  ;;  %v1206_v56 = vld [vmem:[%s4381_s4 + $0x318] sm:$0xff]  ;;  %v1179_v27 = vld [vmem:[%s4381_s4 + $0x1e0] sm:$0xff]  ;;  %v1649_v9 = vld [vmem:[%s4378_s1 + $0xc8] sm:$0xff] }
 0x2fa   :  { %v1051_v59 = vadd.f32 %v1050_v1, %v1016_v54 }
 0x2fb   :  { %v3780_v29 = vmax.f32 %v1118_v53, 0.0  ;;  %1563 = vmatpush.msra.mxu0 %v1242_v3  ;;  %v1652_v3 = vld [vmem:[%s4378_s1 + $0xe0] sm:$0xff] }
 0x2fd   :  { %1301 = vmatmul.f32.gmra.mxu0 %v3780_v29  ;;  %1336 = vmatmul.f32.gmra.mxu1 %v3780_v29 }
 0x2fe   :  { %1371 = vmatmul.f32.gmra.mxu2 %v3780_v29  ;;  %1406 = vmatmul.f32.gmra.mxu3 %v3780_v29  ;;  %v1085_v61 = vpop.f32.mrf.mxu2  ;;  %v1120_v37 = vpop.f32.mrf.mxu3 }
 0x2ff   :  { %v1086_v46 = vadd.f32 %v1085_v61, %v1051_v59  ;;  %v1018_v47 = vpop.f32.mrf.mxu0  ;;  %v1053_v14 = vpop.f32.mrf.mxu1  ;;  %1564 = vmatpush.msra.mxu0 %v1233_v10 }
 0x300   :  { %v1019_v16 = vadd.f32 %v1018_v47, %v982_v38 }
 0x301   :  { %v1121_v15 = vadd.f32 %v1120_v37, %v1086_v46  ;;  %1565 = vmatpush.msra.mxu0 %v1224_v6 }
 0x302   :  { %v1054_v23 = vadd.f32 %v1053_v14, %v1019_v16 }
 0x303   :  { %v3822_v18 = vmax.f32 %v1121_v15, 0.0  ;;  %1566 = vmatpush.msra.mxu0 %v1215_v55  ;;  %v1653_v55 = vld [vmem:[%s4378_s1 + $0xe8] sm:$0xff] }
 0x305   :  { %1304 = vmatmul.f32.gmra.mxu0 %v3822_v18  ;;  %1339 = vmatmul.f32.gmra.mxu1 %v3822_v18 }
 0x306   :  { %1374 = vmatmul.f32.gmra.mxu2 %v3822_v18  ;;  %1409 = vmatmul.f32.gmra.mxu3 %v3822_v18  ;;  %v1088_v24 = vpop.f32.mrf.mxu2  ;;  %v1123_v33 = vpop.f32.mrf.mxu3 }
 0x307   :  { %v1089_v34 = vadd.f32 %v1088_v24, %v1054_v23  ;;  %v1021_v39 = vpop.f32.mrf.mxu0  ;;  %v1056_v44 = vpop.f32.mrf.mxu1  ;;  %1567 = vmatpush.msra.mxu0 %v1206_v56  ;;  %v1650_v56 = vld [vmem:[%s4378_s1 + $0xd0] sm:$0xff] }
 0x308   :  { %v1022_v42 = vadd.f32 %v1021_v39, %v987_v40 }
 0x309   :  { %v1124_v7 = vadd.f32 %v1123_v33, %v1089_v34  ;;  %1568 = vmatpush.msra.mxu0 %v1197_v49  ;;  %v1656_v49 = vld [vmem:[%s4378_s1 + $0x100] sm:$0xff] }
 0x30a   :  { %v1057_v45 = vadd.f32 %v1056_v44, %v1022_v42 }
 0x30b   :  { %v3828_v43 = vmax.f32 %v1124_v7, 0.0  ;;  %1569 = vmatpush.msra.mxu0 %v1188_v50 }
 0x30d   :  { %1307 = vmatmul.f32.gmra.mxu0 %v3828_v43  ;;  %1342 = vmatmul.f32.gmra.mxu1 %v3828_v43 }
 0x30e   :  { %1377 = vmatmul.f32.gmra.mxu2 %v3828_v43  ;;  %1412 = vmatmul.f32.gmra.mxu3 %v3828_v43  ;;  %v1091_v21 = vpop.f32.mrf.mxu2  ;;  %v1126_v2 = vpop.f32.mrf.mxu3 }
 0x30f   :  { %v1092_v63 = vadd.f32 %v1091_v21, %v1057_v45  ;;  %1570 = vmatpush.msra.mxu0 %v1179_v27  ;;  %v1657_v27 = vld [vmem:[%s4378_s1 + $0x108] sm:$0xff] }
 0x311   :  { %v1127_v19 = vadd.f32 %v1126_v2, %v1092_v63  ;;  %1571 = vmatpush.msra.mxu0 %v1170_v25  ;;  %v1654_v25 = vld [vmem:[%s4378_s1 + $0xf0] sm:$0xff] }
 0x313   :  { %v3843_v20 = vmax.f32 %v1127_v19, 0.0  ;;  %1572 = vmatpush.msra.mxu0 %v1161_v26  ;;  %v1648_v19 = vld [vmem:[%s4378_s1 + $0xc0] sm:$0xff] }
 0x314   :  { %v1660_v26 = vld [vmem:[%s4378_s1 + $0x120] sm:$0xff] }
 0x315   :  { %1310 = vmatmul.f32.gmra.mxu0 %v3843_v20  ;;  %1345 = vmatmul.f32.gmra.mxu1 %v3843_v20 }
 0x316   :  { %1380 = vmatmul.f32.gmra.mxu2 %v3843_v20  ;;  %1415 = vmatmul.f32.gmra.mxu3 %v3843_v20 }
 0x317   :  { %1573 = vmatpush.msra.mxu0 %v1152_v28 }
 0x319   :  { %1574 = vmatpush.msra.mxu0 %v1143_v0  ;;  %v1661_v0 = vld [vmem:[%s4378_s1 + $0x128] sm:$0xff] }
 0x31d   :  { %1435 = vmatmul.f32.vlgmr.msrb.gmra.mxu0 %v3693_v13  ;;  %1470 = vmatmul.f32.vlgmr.msrb.gmra.mxu1 %v3693_v13 }
 0x31e   :  { %1505 = vmatmul.f32.vlgmr.msrb.gmra.mxu2 %v3693_v13  ;;  %1540 = vmatmul.f32.vlgmr.msrb.gmra.mxu3 %v3693_v13 }
 0x325   :  { %1438 = vmatmul.f32.gmra.mxu0 %v3738_v8  ;;  %1473 = vmatmul.f32.gmra.mxu1 %v3738_v8 }
 0x326   :  { %1508 = vmatmul.f32.gmra.mxu2 %v3738_v8  ;;  %1543 = vmatmul.f32.gmra.mxu3 %v3738_v8 }
 0x32d   :  { %1441 = vmatmul.f32.gmra.mxu0 %v3780_v29  ;;  %1476 = vmatmul.f32.gmra.mxu1 %v3780_v29 }
 0x32e   :  { %1511 = vmatmul.f32.gmra.mxu2 %v3780_v29  ;;  %1546 = vmatmul.f32.gmra.mxu3 %v3780_v29 }
 0x335   :  { %1444 = vmatmul.f32.gmra.mxu0 %v3822_v18  ;;  %1479 = vmatmul.f32.gmra.mxu1 %v3822_v18 }
 0x336   :  { %1514 = vmatmul.f32.gmra.mxu2 %v3822_v18  ;;  %1549 = vmatmul.f32.gmra.mxu3 %v3822_v18 }
 0x33d   :  { %1447 = vmatmul.f32.gmra.mxu0 %v3828_v43  ;;  %1482 = vmatmul.f32.gmra.mxu1 %v3828_v43 }
 0x33e   :  { %1517 = vmatmul.f32.gmra.mxu2 %v3828_v43  ;;  %1552 = vmatmul.f32.gmra.mxu3 %v3828_v43 }
 0x345   :  { %1450 = vmatmul.f32.gmra.mxu0 %v3843_v20  ;;  %1485 = vmatmul.f32.gmra.mxu1 %v3843_v20 }
 0x346   :  { %1520 = vmatmul.f32.gmra.mxu2 %v3843_v20  ;;  %1555 = vmatmul.f32.gmra.mxu3 %v3843_v20 }
 0x34d   :  { %1575 = vmatmul.f32.vlgmr.msra.gmra.mxu0 %v3693_v13 }
 0x355   :  { %1578 = vmatmul.f32.gmra.mxu0 %v3738_v8 }
 0x35d   :  { %1581 = vmatmul.f32.gmra.mxu0 %v3780_v29 }
 0x365   :  { %1584 = vmatmul.f32.gmra.mxu0 %v3822_v18 }
 0x36a   :  { %v1296_v1 = vpop.f32.mrf.mxu0  ;;  %v1331_v51 = vpop.f32.mrf.mxu1 }
 0x36d   :  { %1587 = vmatmul.f32.gmra.mxu0 %v3828_v43 }
 0x371   :  { %v1366_v52 = vpop.f32.mrf.mxu2  ;;  %v3917_v53 = vpop.f32.mrf.mxu3 }
 0x372   :  { %v1299_v54 = vpop.f32.mrf.mxu0  ;;  %v1334_v57 = vpop.f32.mrf.mxu1 }
 0x375   :  { %1590 = vmatmul.f32.gmra.mxu0 %v3843_v20 }
 0x379   :  { %v1369_v58 = vpop.f32.mrf.mxu2  ;;  %v3920_v30 = vpop.f32.mrf.mxu3 }
 0x37a   :  { %v1302_v13 = vpop.f32.mrf.mxu0  ;;  %v1337_v8 = vpop.f32.mrf.mxu1 }
 0x381   :  { %v1372_v32 = vpop.f32.mrf.mxu2  ;;  %v3922_v29 = vpop.f32.mrf.mxu3 }
 0x382   :  { %v1305_v59 = vpop.f32.mrf.mxu0  ;;  %v1340_v60 = vpop.f32.mrf.mxu1 }
 0x389   :  { %v1375_v31 = vpop.f32.mrf.mxu2  ;;  %v1410_v61 = vpop.f32.mrf.mxu3 }
 0x38a   :  { %1745 = vmatpush.msra.mxu1 %v1375_v31  ;;  %v1308_v37 = vpop.f32.mrf.mxu0  ;;  %v1343_v35 = vpop.f32.mrf.mxu1 }
 0x38c   :  { %1746 = vmatpush.msra.mxu1 %v1372_v32  ;;  %v1670_v32 = vld [vmem:[%s4378_s1 + $0x170] sm:$0xff] }
 0x38e   :  { %1747 = vmatpush.msra.mxu1 %v1369_v58  ;;  %v1655_v58 = vld [vmem:[%s4378_s1 + $0xf8] sm:$0xff] }
 0x390   :  { %1748 = vmatpush.msra.mxu1 %v1366_v52  ;;  %v1651_v52 = vld [vmem:[%s4378_s1 + $0xd8] sm:$0xff] }
 0x391   :  { %v3924_v41 = vpop.f32.mrf.mxu2  ;;  %v1413_v46 = vpop.f32.mrf.mxu3 }
 0x392   :  { %v1311_v47 = vpop.f32.mrf.mxu0  ;;  %v1346_v48 = vpop.f32.mrf.mxu1 }
 0x393   :  { %1749 = vmatpush.msra.mxu1 %v1346_v48 }
 0x395   :  { %1750 = vmatpush.msra.mxu1 %v1343_v35 }
 0x397   :  { %1751 = vmatpush.msra.mxu1 %v1340_v60  ;;  %v1671_v60 = vld [vmem:[%s4378_s1 + $0x178] sm:$0xff] }
 0x399   :  { %v1381_v36 = vpop.f32.mrf.mxu2  ;;  %v1416_v38 = vpop.f32.mrf.mxu3  ;;  %1752 = vmatpush.msra.mxu1 %v1337_v8  ;;  %v1659_v8 = vld [vmem:[%s4378_s1 + $0x118] sm:$0xff] }
 0x39a   :  { %v1436_v5 = vpop.f32.mrf.mxu0  ;;  %v1471_v11 = vpop.f32.mrf.mxu1 }
 0x39b   :  { %1753 = vmatpush.msra.mxu1 %v1334_v57  ;;  %v1668_v57 = vld [vmem:[%s4378_s1 + $0x160] sm:$0xff] }
 0x39d   :  { %1754 = vmatpush.msra.mxu1 %v1331_v51  ;;  %v1664_v51 = vld [vmem:[%s4378_s1 + $0x140] sm:$0xff] }
 0x39f   :  { %1755 = vmatpush.msra.mxu1 %v1311_v47 }
 0x3a1   :  { %v1541_v15 = vpop.f32.mrf.mxu3  ;;  %1756 = vmatpush.msra.mxu1 %v1308_v37  ;;  %v1506_v17 = vpop.f32.mrf.mxu2 }
 0x3a2   :  { %v1439_v16 = vpop.f32.mrf.mxu0  ;;  %v1474_v12 = vpop.f32.mrf.mxu1 }
 0x3a3   :  { %1757 = vmatpush.msra.mxu1 %v1305_v59  ;;  %1780 = vmatpush.msra.mxu2 %v1474_v12  ;;  %v1667_v59 = vld [vmem:[%s4378_s1 + $0x158] sm:$0xff] }
 0x3a5   :  { %1758 = vmatpush.msra.mxu1 %v1302_v13  ;;  %1781 = vmatpush.msra.mxu2 %v1471_v11  ;;  %v1666_v13 = vld [vmem:[%s4378_s1 + $0x150] sm:$0xff] }
 0x3a7   :  { %1759 = vmatpush.msra.mxu1 %v1299_v54  ;;  %v1662_v54 = vld [vmem:[%s4378_s1 + $0x130] sm:$0xff] }
 0x3a9   :  { %v1544_v14 = vpop.f32.mrf.mxu3  ;;  %1760 = vmatpush.msra.mxu1 %v1296_v1  ;;  %v1509_v23 = vpop.f32.mrf.mxu2  ;;  %v1658_v1 = vld [vmem:[%s4378_s1 + $0x110] sm:$0xff] }
 0x3aa   :  { %v1442_v18 = vpop.f32.mrf.mxu0  ;;  %v1477_v44 = vpop.f32.mrf.mxu1  ;;  %1761 = vmatmul.f32.vlgmr.msra.gmra.mxu1 %v1648_v19 }
 0x3b1   :  { %v1547_v24 = vpop.f32.mrf.mxu3  ;;  %v1512_v34 = vpop.f32.mrf.mxu2 }
 0x3b2   :  { %v1445_v33 = vpop.f32.mrf.mxu0  ;;  %v1480_v62 = vpop.f32.mrf.mxu1  ;;  %1764 = vmatmul.f32.gmra.mxu1 %v1652_v3 }
 0x3b9   :  { %v1550_v39 = vpop.f32.mrf.mxu3  ;;  %v1515_v7 = vpop.f32.mrf.mxu2 }
 0x3ba   :  { %v1448_v40 = vpop.f32.mrf.mxu0  ;;  %v1483_v4 = vpop.f32.mrf.mxu1  ;;  %1767 = vmatmul.f32.gmra.mxu1 %v1656_v49 }
 0x3c1   :  { %v1553_v42 = vpop.f32.mrf.mxu3  ;;  %v1518_v22 = vpop.f32.mrf.mxu2 }
 0x3c2   :  { %v1451_v43 = vpop.f32.mrf.mxu0  ;;  %v1486_v10 = vpop.f32.mrf.mxu1  ;;  %1770 = vmatmul.f32.gmra.mxu1 %v1660_v26 }
 0x3c3   :  { %1782 = vmatpush.msra.mxu2 %v1451_v43 }
 0x3c5   :  { %1783 = vmatpush.msra.mxu2 %v1448_v40 }
 0x3c7   :  { %1784 = vmatpush.msra.mxu2 %v1445_v33 }
 0x3c9   :  { %v1556_v45 = vpop.f32.mrf.mxu3  ;;  %1785 = vmatpush.msra.mxu2 %v1442_v18  ;;  %v1521_v2 = vpop.f32.mrf.mxu2 }
 0x3ca   :  { %1815 = vmatpush.msra.mxu3 %v1556_v45  ;;  %v3926_v21 = vpop.f32.mrf.mxu0  ;;  %1773 = vmatmul.f32.gmra.mxu1 %v1664_v51 }
 0x3cb   :  { %1786 = vmatpush.msra.mxu2 %v1439_v16 }
 0x3cc   :  { %1816 = vmatpush.msra.mxu3 %v1553_v42 }
 0x3cd   :  { %1787 = vmatpush.msra.mxu2 %v1436_v5 }
 0x3ce   :  { %1817 = vmatpush.msra.mxu3 %v1550_v39 }
 0x3cf   :  { %1788 = vmatpush.msra.mxu2 %v1416_v38 }
 0x3d0   :  { %1818 = vmatpush.msra.mxu3 %v1547_v24 }
 0x3d1   :  { %1789 = vmatpush.msra.mxu2 %v1413_v46 }
 0x3d2   :  { %1819 = vmatpush.msra.mxu3 %v1544_v14  ;;  %v1579_v63 = vpop.f32.mrf.mxu0  ;;  %1776 = vmatmul.f32.gmra.mxu1 %v1668_v57  ;;  %v1948_v57 = vld [vmem:[%s4380_s2 + $0x48] sm:$0xff] }
 0x3d3   :  { %1790 = vmatpush.msra.mxu2 %v1410_v61 }
 0x3d4   :  { %1820 = vmatpush.msra.mxu3 %v1541_v15 }
 0x3d5   :  { %1791 = vmatpush.msra.mxu2 %v3922_v29  ;;  %v1663_v29 = vld [vmem:[%s4378_s1 + $0x138] sm:$0xff] }
 0x3d6   :  { %1821 = vmatpush.msra.mxu3 %v1521_v2 }
 0x3d7   :  { %1792 = vmatpush.msra.mxu2 %v3920_v30  ;;  %v1669_v30 = vld [vmem:[%s4378_s1 + $0x168] sm:$0xff] }
 0x3d8   :  { %1822 = vmatpush.msra.mxu3 %v1518_v22 }
 0x3d9   :  { %1793 = vmatpush.msra.mxu2 %v3917_v53  ;;  %v1665_v53 = vld [vmem:[%s4378_s1 + $0x148] sm:$0xff] }
 0x3da   :  { %1823 = vmatpush.msra.mxu3 %v1515_v7  ;;  %v1582_v20 = vpop.f32.mrf.mxu0 }
 0x3db   :  { %1794 = vmatpush.msra.mxu2 %v1381_v36 }
 0x3dc   :  { %1824 = vmatpush.msra.mxu3 %v1512_v34 }
 0x3dd   :  { %1795 = vmatpush.msra.mxu2 %v3924_v41 }
 0x3de   :  { %1825 = vmatpush.msra.mxu3 %v1509_v23  ;;  %1796 = vmatmul.f32.vlgmr.msra.gmra.mxu2 %v1649_v9 }
 0x3e0   :  { %1826 = vmatpush.msra.mxu3 %v1506_v17 }
 0x3e2   :  { %1827 = vmatpush.msra.mxu3 %v1486_v10  ;;  %v1585_v6 = vpop.f32.mrf.mxu0 }
 0x3e4   :  { %1828 = vmatpush.msra.mxu3 %v1483_v4 }
 0x3e6   :  { %1829 = vmatpush.msra.mxu3 %v1480_v62  ;;  %1799 = vmatmul.f32.gmra.mxu2 %v1653_v55  ;;  %v1945_v55 = vld [vmem:[%s4380_s2 + $0x30] sm:$0xff] }
 0x3e8   :  { %1830 = vmatpush.msra.mxu3 %v1477_v44 }
 0x3e9   :  { %1831 = vmatmul.f32.vlgmr.msra.gmra.mxu3 %v1650_v56 }
 0x3ea   :  { %v1588_v50 = vpop.f32.mrf.mxu0 }
 0x3ee   :  { %1802 = vmatmul.f32.gmra.mxu2 %v1657_v27  ;;  %v1947_v27 = vld [vmem:[%s4380_s2 + $0x40] sm:$0xff] }
 0x3f1   :  { %1834 = vmatmul.f32.gmra.mxu3 %v1654_v25 }
 0x3f2   :  { %v1591_v28 = vpop.f32.mrf.mxu0 }
 0x3f3   :  { %1860 = vmatpush.msrb.mxu0 %v1591_v28 }
 0x3f5   :  { %1861 = vmatpush.msrb.mxu0 %v1588_v50 }
 0x3f6   :  { %1805 = vmatmul.f32.gmra.mxu2 %v1661_v0  ;;  %v1946_v0 = vld [vmem:[%s4380_s2 + $0x38] sm:$0xff] }
 0x3f7   :  { %1862 = vmatpush.msrb.mxu0 %v1585_v6 }
 0x3f9   :  { %1863 = vmatpush.msrb.mxu0 %v1582_v20  ;;  %1837 = vmatmul.f32.gmra.mxu3 %v1658_v1 }
 0x3fb   :  { %1864 = vmatpush.msrb.mxu0 %v1579_v63 }
 0x3fd   :  { %1865 = vmatpush.msrb.mxu0 %v3926_v21 }
 0x3fe   :  { %2505 = vmatmul.msk.f32.vlgmr.msrb.gmra.mxu0 %vm1726_vm15, %v1651_v52  ;;  %1808 = vmatmul.f32.gmra.mxu2 %v1665_v53  ;;  %v1950_v52 = vld [vmem:[%s4380_s2 + $0x58] sm:$0xff] }
 0x401   :  { %1840 = vmatmul.f32.gmra.mxu3 %v1662_v54 }
 0x406   :  { %2506 = vmatmul.msk.f32.gmra.mxu0 %vm1726_vm15, %v1655_v58  ;;  %1811 = vmatmul.f32.gmra.mxu2 %v1669_v30  ;;  %v2266_v58 = vld [vmem:[%s4380_s2 + $0x88] sm:$0xff] }
 0x409   :  { %1843 = vmatmul.f32.gmra.mxu3 %v1666_v13  ;;  %v2263_v13 = vld [vmem:[%s4380_s2 + $0x70] sm:$0xff] }
 0x40e   :  { %2507 = vmatmul.msk.f32.gmra.mxu0 %vm1726_vm15, %v1659_v8  ;;  %v1949_v8 = vld [vmem:[%s4380_s2 + $0x50] sm:$0xff] }
 0x411   :  { %1846 = vmatmul.f32.gmra.mxu3 %v1670_v32 }
 0x416   :  { %2508 = vmatmul.msk.f32.gmra.mxu0 %vm1726_vm15, %v1663_v29  ;;  %v2428_v29 = vld [vmem:[%s4380_s2 + $0xa0] sm:$0xff] }
 0x41e   :  { %2509 = vmatmul.msk.f32.gmra.mxu0 %vm1726_vm15, %v1667_v59 }
 0x426   :  { %2510 = vmatmul.msk.f32.gmra.mxu0 %vm1726_vm15, %v1671_v60  ;;  %v2268_v60 = vld [vmem:[%s4380_s2 + $0x98] sm:$0xff] }
 0x427   :  { %v1762_v31 = vpop.f32.mrf.mxu1 }
 0x42f   :  { %v1765_v35 = vpop.f32.mrf.mxu1 }
 0x437   :  { %v1768_v36 = vpop.f32.mrf.mxu1 }
 0x43f   :  { %v1771_v23 = vpop.f32.mrf.mxu1 }
 0x447   :  { %v1774_v42 = vpop.f32.mrf.mxu1 }
 0x44f   :  { %v1777_v2 = vpop.f32.mrf.mxu1 }
 0x461   :  { %v1797_v61 = vpop.f32.mrf.mxu2 }
 0x462   :  { %v1798_v46 = vadd.f32 %v1797_v61, %v1762_v31  ;;  %v2053_v31 = vld [vmem:[%s4381_s4 + $0x660] sm:$0xff]  ;;  %v2054_v61 = vld [vmem:[%s4381_s4 + $0x668] sm:$0xff] }
 0x463   :  { %2057 = vmatpush.msrb.mxu1 %v2053_v31  ;;  %2092 = vmatpush.msrb.mxu2 %v2054_v61  ;;  %v2007_v31 = vld [vmem:[%s4381_s4 + $0x190] sm:$0xff]  ;;  %v2008_v61 = vld [vmem:[%s4381_s4 + $0x198] sm:$0xff] }
 0x469   :  { %v1800_v41 = vpop.f32.mrf.mxu2 }
 0x46a   :  { %v1801_v15 = vadd.f32 %v1800_v41, %v1765_v35  ;;  %v2056_v35 = vld [vmem:[%s4381_s4 + $0x678] sm:$0xff] }
 0x46b   :  { %v2049_v41 = vld [vmem:[%s4381_s4 + $0x5f8] sm:$0xff]  ;;  %2162 = vmatpush.msra.mxu0 %v2056_v35  ;;  %v2002_v35 = vld [vmem:[%s4381_s4 + $0x120] sm:$0xff] }
 0x46c   :  { %v1832_v37 = vpop.f32.mrf.mxu3  ;;  %2058 = vmatpush.msrb.mxu1 %v2049_v41  ;;  %v2003_v41 = vld [vmem:[%s4381_s4 + $0x128] sm:$0xff] }
 0x46d   :  { %v1833_v48 = vadd.f32 %v1832_v37, %v1798_v46  ;;  %v2055_v37 = vld [vmem:[%s4381_s4 + $0x670] sm:$0xff]  ;;  %v2050_v46 = vld [vmem:[%s4381_s4 + $0x600] sm:$0xff] }
 0x46e   :  { %2127 = vmatpush.msrb.mxu3 %v2055_v37  ;;  %2093 = vmatpush.msrb.mxu2 %v2050_v46  ;;  %v2001_v37 = vld [vmem:[%s4381_s4 + $0x118] sm:$0xff]  ;;  %v2004_v46 = vld [vmem:[%s4381_s4 + $0x130] sm:$0xff] }
 0x471   :  { %v1803_v5 = vpop.f32.mrf.mxu2 }
 0x472   :  { %v1804_v18 = vadd.f32 %v1803_v5, %v1768_v36  ;;  %v2045_v36 = vld [vmem:[%s4381_s4 + $0x590] sm:$0xff]  ;;  %v2047_v5 = vld [vmem:[%s4381_s4 + $0x5a0] sm:$0xff] }
 0x473   :  { %2059 = vmatpush.msrb.mxu1 %v2045_v36  ;;  %v1999_v36 = vld [vmem:[%s4381_s4 + $0xc0] sm:$0xff] }
 0x474   :  { %v1835_v47 = vpop.f32.mrf.mxu3 }
 0x475   :  { %v1836_v12 = vadd.f32 %v1835_v47, %v1801_v15  ;;  %v2051_v47 = vld [vmem:[%s4381_s4 + $0x608] sm:$0xff] }
 0x476   :  { %2128 = vmatpush.msrb.mxu3 %v2051_v47  ;;  %v2041_v15 = vld [vmem:[%s4381_s4 + $0x528] sm:$0xff]  ;;  %v1997_v47 = vld [vmem:[%s4381_s4 + $0xb0] sm:$0xff] }
 0x477   :  { %2060 = vmatpush.msrb.mxu1 %v2041_v15  ;;  %v1995_v15 = vld [vmem:[%s4381_s4 + $0x58] sm:$0xff] }
 0x478   :  { %2129 = vmatpush.msrb.mxu3 %v2047_v5  ;;  %v1993_v5 = vld [vmem:[%s4381_s4 + $0x48] sm:$0xff] }
 0x479   :  { %v1806_v24 = vpop.f32.mrf.mxu2 }
 0x47a   :  { %v1807_v7 = vadd.f32 %v1806_v24, %v1771_v23  ;;  %v2044_v23 = vld [vmem:[%s4381_s4 + $0x540] sm:$0xff] }
 0x47b   :  { %v1867_v38 = vpop.f32.mrf.mxu0  ;;  %v2037_v24 = vld [vmem:[%s4381_s4 + $0x4c0] sm:$0xff] }
 0x47c   :  { %v1868_v11 = vadd.f32 %v1867_v38, %v1833_v48  ;;  %v1838_v16 = vpop.f32.mrf.mxu3  ;;  %v2052_v48 = vld [vmem:[%s4381_s4 + $0x610] sm:$0xff]  ;;  %v2046_v38 = vld [vmem:[%s4381_s4 + $0x598] sm:$0xff]  ;;  %2061 = vmatpush.msrb.mxu1 %v2037_v24 }
 0x47d   :  { %v1839_v33 = vadd.f32 %v1838_v16, %v1804_v18  ;;  %v2267_v16 = vld [vmem:[%s4380_s2 + $0x90] sm:$0xff]  ;;  %2163 = vmatpush.msra.mxu0 %v2052_v48  ;;  %2094 = vmatpush.msrb.mxu2 %v2046_v38  ;;  %v2043_v18 = vld [vmem:[%s4381_s4 + $0x538] sm:$0xff]  ;;  %v2000_v38 = vld [vmem:[%s4381_s4 + $0xc8] sm:$0xff] }
 0x47e   :  { %1891 = vrot.lane.b32.xlu1 %v1868_v11, %s2824_s13  ;;  %2130 = vmatpush.msrb.mxu3 %v2043_v18  ;;  %v1998_v48 = vld [vmem:[%s4381_s4 + $0xb8] sm:$0xff] }
 0x481   :  { %v1809_v43 = vpop.f32.mrf.mxu2 }
 0x482   :  { %v1810_v62 = vadd.f32 %v1809_v43, %v1774_v42  ;;  %v2261_v42 = vld [vmem:[%s4380_s2 + $0x60] sm:$0xff]  ;;  %v2429_v43 = vld [vmem:[%s4380_s2 + $0xa8] sm:$0xff] }
 0x483   :  { %v1870_v17 = vpop.f32.mrf.mxu0 }
 0x484   :  { %v1871_v14 = vadd.f32 %v1870_v17, %v1836_v12  ;;  %v1841_v34 = vpop.f32.mrf.mxu3  ;;  %v2431_v12 = vld [vmem:[%s4380_s2 + $0xb8] sm:$0xff]  ;;  %v2265_v17 = vld [vmem:[%s4380_s2 + $0x80] sm:$0xff] }
 0x485   :  { %v1842_v44 = vadd.f32 %v1841_v34, %v1807_v7  ;;  %v2039_v34 = vld [vmem:[%s4381_s4 + $0x4d0] sm:$0xff]  ;;  %v2262_v7 = vld [vmem:[%s4380_s2 + $0x68] sm:$0xff] }
 0x486   :  { %1893 = vrot.lane.b32.xlu2 %v1871_v14, %s2824_s13  ;;  %2131 = vmatpush.msrb.mxu3 %v2039_v34 }
 0x489   :  { %v1812_v4 = vpop.f32.mrf.mxu2 }
 0x48a   :  { %v1813_v9 = vadd.f32 %v1812_v4, %v1777_v2  ;;  %v2030_v2 = vld [vmem:[%s4381_s4 + $0x3f8] sm:$0xff]  ;;  %v2031_v4 = vld [vmem:[%s4381_s4 + $0x400] sm:$0xff] }
 0x48b   :  { %v1873_v39 = vpop.f32.mrf.mxu0 }
 0x48c   :  { %v1874_v40 = vadd.f32 %v1873_v39, %v1839_v33  ;;  %v1844_v21 = vpop.f32.mrf.mxu3  ;;  %v2038_v33 = vld [vmem:[%s4381_s4 + $0x4c8] sm:$0xff]  ;;  %v2040_v39 = vld [vmem:[%s4381_s4 + $0x4d8] sm:$0xff] }
 0x48d   :  { %v1845_v63 = vadd.f32 %v1844_v21, %v1810_v62  ;;  %v2034_v21 = vld [vmem:[%s4381_s4 + $0x460] sm:$0xff]  ;;  %v2036_v62 = vld [vmem:[%s4381_s4 + $0x470] sm:$0xff] }
 0x48e   :  { %1895 = vrot.lane.b32.xlu0 %v1874_v40, %s2824_s13 }
 0x493   :  { %v1876_v45 = vpop.f32.mrf.mxu0 }
 0x494   :  { %v1877_v22 = vadd.f32 %v1876_v45, %v1842_v44  ;;  %v1847_v3 = vpop.f32.mrf.mxu3  ;;  %v2430_v44 = vld [vmem:[%s4380_s2 + $0xb0] sm:$0xff]  ;;  %v2033_v45 = vld [vmem:[%s4381_s4 + $0x458] sm:$0xff] }
 0x495   :  { %v1848_v10 = vadd.f32 %v1847_v3, %v1813_v9  ;;  %2062 = vmatpush.msrb.mxu1 %v2033_v45  ;;  %v2026_v9 = vld [vmem:[%s4381_s4 + $0x390] sm:$0xff]  ;;  %v2027_v3 = vld [vmem:[%s4381_s4 + $0x398] sm:$0xff] }
 0x496   :  { %1897 = vrot.lane.b32.xlu1 %v1877_v22, %s2824_s13 }
 0x49b   :  { %v1879_v19 = vpop.f32.mrf.mxu0 }
 0x49c   :  { %v1880_v20 = vadd.f32 %v1879_v19, %v1845_v63  ;;  %v2029_v63 = vld [vmem:[%s4381_s4 + $0x3f0] sm:$0xff]  ;;  %v2032_v19 = vld [vmem:[%s4381_s4 + $0x408] sm:$0xff] }
 0x49d   :  { %2063 = vmatpush.msrb.mxu1 %v2029_v63 }
 0x49e   :  { %1899 = vrot.lane.b32.xlu2 %v1880_v20, %s2824_s13 }
 0x4a3   :  { %v1882_v6 = vpop.f32.mrf.mxu0 }
 0x4a4   :  { %v1883_v56 = vadd.f32 %v1882_v6, %v1848_v10  ;;  %v2028_v10 = vld [vmem:[%s4381_s4 + $0x3a0] sm:$0xff] }
 0x4a5   :  { %v2021_v6 = vld [vmem:[%s4381_s4 + $0x320] sm:$0xff] }
 0x4a6   :  { %1901 = vrot.lane.b32.xlu0 %v1883_v56, %s2824_s13  ;;  %1953 = vperm.xlu2 %2812, %v1945_v55   ;;  %v2022_v55 = vld [vmem:[%s4381_s4 + $0x328] sm:$0xff] }
 0x4e0   :  { %v1894_v49 = vpop.permute.xlu2 %1893 }
 0x4e1   :  { %v4020_v50 = vmax.f32 %v1871_v14, %v1894_v49  ;;  %v2042_v14 = vld [vmem:[%s4381_s4 + $0x530] sm:$0xff]  ;;  %v2024_v49 = vld [vmem:[%s4381_s4 + $0x338] sm:$0xff] }
 0x4e2   :  { %2095 = vmatpush.msrb.mxu2 %v2042_v14 }
 0x4e3   :  { %1923 = vrot.lane.b32.xlu0 %v4020_v50, %s2829_s18 }
 0x4e4   :  { %2096 = vmatpush.msrb.mxu2 %v2038_v33 }
 0x4e6   :  { %2097 = vmatpush.msrb.mxu2 %v2034_v21 }
 0x4e8   :  { %2098 = vmatpush.msrb.mxu2 %v2030_v2 }
 0x4ea   :  { %2099 = vmatpush.msrb.mxu2 %v2026_v9 }
 0x4eb   :  { %1963 = vperm.xlu0 %2810, %v1947_v27   ;;  %v2017_v27 = vld [vmem:[%s4381_s4 + $0x2b8] sm:$0xff] }
 0x4ec   :  { %2100 = vmatpush.msrb.mxu2 %v2022_v55 }
 0x4f0   :  { %v1892_v25 = vpop.permute.xlu1 %1891 }
 0x4f1   :  { %v4027_v26 = vmax.f32 %v1868_v11, %v1892_v25  ;;  %v2048_v11 = vld [vmem:[%s4381_s4 + $0x5a8] sm:$0xff]  ;;  %v2018_v25 = vld [vmem:[%s4381_s4 + $0x2c0] sm:$0xff] }
 0x4f2   :  { %2164 = vmatpush.msra.mxu0 %v2048_v11  ;;  %2101 = vmatpush.msrb.mxu2 %v2018_v25  ;;  %v1994_v11 = vld [vmem:[%s4381_s4 + $0x50] sm:$0xff] }
 0x4f3   :  { %1921 = vrot.lane.b32.xlu1 %v4027_v26, %s2829_s18 }
 0x4f4   :  { %2165 = vmatpush.msra.mxu0 %v2044_v23 }
 0x4f6   :  { %2166 = vmatpush.msra.mxu0 %v2040_v39 }
 0x4f8   :  { %v1900_v28 = vpop.permute.xlu2 %1899  ;;  %2167 = vmatpush.msra.mxu0 %v2036_v62 }
 0x4f9   :  { %v4034_v1 = vmax.f32 %v1880_v20, %v1900_v28  ;;  %v2025_v20 = vld [vmem:[%s4381_s4 + $0x388] sm:$0xff] }
 0x4fa   :  { %2168 = vmatpush.msra.mxu0 %v2032_v19  ;;  %2064 = vmatpush.msrb.mxu1 %v2025_v20  ;;  %v2019_v28 = vld [vmem:[%s4381_s4 + $0x2c8] sm:$0xff] }
 0x4fb   :  { %1929 = vrot.lane.b32.xlu0 %v4034_v1, %s2829_s18  ;;  %1958 = vperm.xlu1 %2811, %v1946_v0   ;;  %v2020_v0 = vld [vmem:[%s4381_s4 + $0x2d0] sm:$0xff] }
 0x4fc   :  { %2169 = vmatpush.msra.mxu0 %v2028_v10  ;;  %2065 = vmatpush.msrb.mxu1 %v2021_v6 }
 0x4fe   :  { %2170 = vmatpush.msra.mxu0 %v2024_v49  ;;  %2066 = vmatpush.msrb.mxu1 %v2017_v27 }
 0x500   :  { %v1896_v51 = vpop.permute.xlu0 %1895  ;;  %2171 = vmatpush.msra.mxu0 %v2020_v0  ;;  %v1954_v14 = vpop.permute.xlu2 %1953 }
 0x501   :  { %v4041_v53 = vmax.f32 %v1874_v40, %v1896_v51  ;;  %v2264_v40 = vld [vmem:[%s4380_s2 + $0x78] sm:$0xff]  ;;  %v2013_v51 = vld [vmem:[%s4381_s4 + $0x250] sm:$0xff] }
 0x502   :  { %2067 = vmatpush.msrb.mxu1 %v2013_v51 }
 0x503   :  { %1925 = vrot.lane.b32.xlu2 %v4041_v53, %s2829_s18  ;;  %1978 = vperm.xlu0 %2810, %v1950_v52   ;;  %v2014_v52 = vld [vmem:[%s4381_s4 + $0x258] sm:$0xff] }
 0x504   :  { %2102 = vmatpush.msrb.mxu2 %v2014_v52 }
 0x508   :  { %v1898_v54 = vpop.permute.xlu1 %1897 }
 0x509   :  { %v4051_v30 = vmax.f32 %v1877_v22, %v1898_v54  ;;  %v2035_v22 = vld [vmem:[%s4381_s4 + $0x468] sm:$0xff]  ;;  %v2015_v54 = vld [vmem:[%s4381_s4 + $0x260] sm:$0xff] }
 0x50a   :  { %2132 = vmatpush.msrb.mxu3 %v2035_v22 }
 0x50b   :  { %1968 = vperm.xlu2 %2812, %v1948_v57   ;;  %2296 = vperm.xlu0 %2810, %v2266_v58   ;;  %v2016_v57 = vld [vmem:[%s4381_s4 + $0x268] sm:$0xff] }
 0x50c   :  { %1927 = vrot.lane.b32.xlu1 %v4051_v30, %s2829_s18  ;;  %2133 = vmatpush.msrb.mxu3 %v2031_v4  ;;  %v2009_v58 = vld [vmem:[%s4381_s4 + $0x1e8] sm:$0xff] }
 0x50d   :  { %2172 = vmatpush.msra.mxu0 %v2016_v57  ;;  %2068 = vmatpush.msrb.mxu1 %v2009_v58 }
 0x50e   :  { %2134 = vmatpush.msrb.mxu3 %v2027_v3 }
 0x513   :  { %2281 = vperm.xlu0 %2810, %v2263_v13   ;;  %v2010_v13 = vld [vmem:[%s4381_s4 + $0x1f0] sm:$0xff] }
 0x514   :  { %1973 = vperm.xlu1 %2811, %v1949_v8   ;;  %v2011_v8 = vld [vmem:[%s4381_s4 + $0x1f8] sm:$0xff]  ;;  %2103 = vmatpush.msrb.mxu2 %v2010_v13 }
 0x518   :  { %v1902_v32 = vpop.permute.xlu0 %1901 }
 0x519   :  { %v4064_v59 = vmax.f32 %v1883_v56, %v1902_v32  ;;  %v2023_v56 = vld [vmem:[%s4381_s4 + $0x330] sm:$0xff]  ;;  %v2012_v32 = vld [vmem:[%s4381_s4 + $0x200] sm:$0xff] }
 0x51a   :  { %2135 = vmatpush.msrb.mxu3 %v2023_v56  ;;  %2173 = vmatpush.msra.mxu0 %v2012_v32 }
 0x51b   :  { %1931 = vrot.lane.b32.xlu2 %v4064_v59, %s2829_s18  ;;  %2434 = vperm.xlu0 %2810, %v2428_v29   ;;  %v2005_v29 = vld [vmem:[%s4381_s4 + $0x180] sm:$0xff] }
 0x51c   :  { %2306 = vperm.xlu1 %2811, %v2268_v60   ;;  %2136 = vmatpush.msrb.mxu3 %v2019_v28  ;;  %v2006_v60 = vld [vmem:[%s4381_s4 + $0x188] sm:$0xff] }
 0x51d   :  { %2069 = vmatpush.msrb.mxu1 %v2005_v29  ;;  %2104 = vmatpush.msrb.mxu2 %v2006_v60 }
 0x51e   :  { %2137 = vmatpush.msrb.mxu3 %v2015_v54  ;;  %2174 = vmatpush.msra.mxu0 %v2008_v61 }
 0x51f   :  { %2070 = vmatpush.msrb.mxu1 %v2001_v37  ;;  %2105 = vmatpush.msrb.mxu2 %v2002_v35  ;;  %v2222_v35 = vld [vmem:[%s4378_s1 + $0x188] sm:$0xff] }
 0x520   :  { %2138 = vmatpush.msrb.mxu3 %v2011_v8  ;;  %2175 = vmatpush.msra.mxu0 %v2004_v46  ;;  %v2224_v46 = vld [vmem:[%s4378_s1 + $0x1a8] sm:$0xff] }
 0x521   :  { %2071 = vmatpush.msrb.mxu1 %v1997_v47  ;;  %2106 = vmatpush.msrb.mxu2 %v1998_v48  ;;  %v2221_v47 = vld [vmem:[%s4378_s1 + $0x180] sm:$0xff]  ;;  %v2226_v48 = vld [vmem:[%s4378_s1 + $0x1c8] sm:$0xff] }
 0x522   :  { %2139 = vmatpush.msrb.mxu3 %v2007_v31  ;;  %2176 = vmatpush.msra.mxu0 %v2000_v38  ;;  %v2228_v38 = vld [vmem:[%s4378_s1 + $0x1e8] sm:$0xff] }
 0x523   :  { %2301 = vperm.xlu2 %2812, %v2267_v16   ;;  %2449 = vperm.xlu0 %2810, %v2431_v12   ;;  %v1996_v16 = vld [vmem:[%s4381_s4 + $0x60] sm:$0xff] }
 0x524   :  { %2291 = vperm.xlu1 %2811, %v2265_v17   ;;  %2140 = vmatpush.msrb.mxu3 %v2003_v41 }
 0x525   :  { %2072 = vmatpush.msrb.mxu1 %v1993_v5  ;;  %2107 = vmatpush.msrb.mxu2 %v1994_v11  ;;  %v2225_v5 = vld [vmem:[%s4378_s1 + $0x1c0] sm:$0xff]  ;;  %v2230_v11 = vld [vmem:[%s4378_s1 + $0x208] sm:$0xff] }
 0x526   :  { %2141 = vmatpush.msrb.mxu3 %v1999_v36  ;;  %2177 = vmatpush.msra.mxu0 %v1996_v16  ;;  %v2223_v36 = vld [vmem:[%s4378_s1 + $0x1a0] sm:$0xff]  ;;  %v2232_v16 = vld [vmem:[%s4378_s1 + $0x228] sm:$0xff] }
 0x528   :  { %2142 = vmatpush.msrb.mxu3 %v1995_v15  ;;  %v2227_v15 = vld [vmem:[%s4378_s1 + $0x1e0] sm:$0xff] }
 0x52b   :  { %2286 = vperm.xlu2 %2812, %v2264_v40  }
 0x52c   :  { %2276 = vperm.xlu1 %2811, %v2262_v7  }
 0x533   :  { %2271 = vperm.xlu2 %2812, %v2261_v42  }
 0x534   :  { %2439 = vperm.xlu1 %2811, %v2429_v43  }
 0x53b   :  { %2444 = vperm.xlu2 %2812, %v2430_v44  }
 0x555   :  { %v1924_v23 = vpop.permute.xlu0 %1923 }
 0x556   :  { %v1940_v33 = vmax.f32 %v4020_v50, %v1924_v23  ;;  %v2233_v23 = vld [vmem:[%s4378_s1 + $0x240] sm:$0xff] }
 0x55d   :  { %v1926_v40 = vpop.permute.xlu2 %1925  ;;  %v1964_v43 = vpop.permute.xlu0 %1963 }
 0x55e   :  { %v1941_v7 = vmax.f32 %v4041_v53, %v1926_v40 }
 0x565   :  { %v1922_v12 = vpop.permute.xlu1 %1921  ;;  %v1969_v21 = vpop.permute.xlu2 %1968 }
 0x566   :  { %v1939_v17 = vmax.f32 %v4027_v26, %v1922_v12  ;;  %v1983_v26 = vadd.f32 %v1964_v43, %v1941_v7  ;;  %v2229_v12 = vld [vmem:[%s4378_s1 + $0x200] sm:$0xff] }
 0x568   :  { %v1981_v18 = vadd.f32 %v1954_v14, %v1939_v17  ;;  %v1989_v44 = vmax.f32 %v1983_v26, 0.0  ;;  %v2234_v17 = vld [vmem:[%s4378_s1 + $0x248] sm:$0xff]  ;;  %v2231_v14 = vld [vmem:[%s4378_s1 + $0x220] sm:$0xff] }
 0x56a   :  { %v1987_v24 = vmax.f32 %v1981_v18, 0.0  ;;  %v2236_v18 = vld [vmem:[%s4378_s1 + $0x268] sm:$0xff] }
 0x56c   :  { %2073 = vmatmul.f32.vlgmr.msrb.gmra.mxu1 %v1987_v24  ;;  %2108 = vmatmul.f32.vlgmr.msrb.gmra.mxu2 %v1987_v24 }
 0x56d   :  { %2143 = vmatmul.f32.vlgmr.msrb.gmra.mxu3 %v1987_v24  ;;  %2178 = vmatmul.f32.vlgmr.msra.gmra.mxu0 %v1987_v24  ;;  %v1959_v34 = vpop.permute.xlu1 %1958  ;;  %v1930_v62 = vpop.permute.xlu0 %1929  ;;  %v2235_v24 = vld [vmem:[%s4378_s1 + $0x260] sm:$0xff] }
 0x56e   :  { %v1982_v39 = vadd.f32 %v1959_v34, %v1940_v33  ;;  %v1943_v53 = vmax.f32 %v4034_v1, %v1930_v62 }
 0x570   :  { %v1988_v42 = vmax.f32 %v1982_v39, 0.0 }
 0x574   :  { %2076 = vmatmul.f32.gmra.mxu1 %v1988_v42  ;;  %2111 = vmatmul.f32.gmra.mxu2 %v1988_v42 }
 0x575   :  { %2146 = vmatmul.f32.gmra.mxu3 %v1988_v42  ;;  %2181 = vmatmul.f32.gmra.mxu0 %v1988_v42  ;;  %v1932_v19 = vpop.permute.xlu2 %1931  ;;  %v1979_v3 = vpop.permute.xlu0 %1978 }
 0x576   :  { %v1944_v20 = vmax.f32 %v4064_v59, %v1932_v19 }
 0x57c   :  { %2079 = vmatmul.f32.gmra.mxu1 %v1989_v44  ;;  %2114 = vmatmul.f32.gmra.mxu2 %v1989_v44 }
 0x57d   :  { %2149 = vmatmul.f32.gmra.mxu3 %v1989_v44  ;;  %2184 = vmatmul.f32.gmra.mxu0 %v1989_v44  ;;  %v2302_v33 = vpop.permute.xlu2 %2301 }
 0x57e   :  { %v1928_v50 = vpop.permute.xlu1 %1927 }
 0x57f   :  { %v1942_v45 = vmax.f32 %v4051_v30, %v1928_v50  ;;  %v1986_v30 = vadd.f32 %v1979_v3, %v1944_v20 }
 0x581   :  { %v1984_v22 = vadd.f32 %v1969_v21, %v1942_v45  ;;  %v1992_v10 = vmax.f32 %v1986_v30, 0.0 }
 0x583   :  { %v1990_v63 = vmax.f32 %v1984_v22, 0.0 }
 0x585   :  { %2082 = vmatmul.f32.gmra.mxu1 %v1990_v63  ;;  %2117 = vmatmul.f32.gmra.mxu2 %v1990_v63  ;;  %v2287_v34 = vpop.permute.xlu2 %2286 }
 0x586   :  { %2152 = vmatmul.f32.gmra.mxu3 %v1990_v63  ;;  %2187 = vmatmul.f32.gmra.mxu0 %v1990_v63  ;;  %v1974_v2 = vpop.permute.xlu1 %1973 }
 0x587   :  { %v1985_v4 = vadd.f32 %v1974_v2, %v1943_v53 }
 0x589   :  { %v1991_v9 = vmax.f32 %v1985_v4, 0.0 }
 0x58d   :  { %2085 = vmatmul.f32.gmra.mxu1 %v1991_v9  ;;  %2120 = vmatmul.f32.gmra.mxu2 %v1991_v9  ;;  %v2272_v40 = vpop.permute.xlu2 %2271 }
 0x58e   :  { %2155 = vmatmul.f32.gmra.mxu3 %v1991_v9  ;;  %2190 = vmatmul.f32.gmra.mxu0 %v1991_v9  ;;  %v2307_v4 = vpop.permute.xlu1 %2306  ;;  %v2297_v9 = vpop.permute.xlu0 %2296 }
 0x595   :  { %2088 = vmatmul.f32.gmra.mxu1 %v1992_v10  ;;  %2123 = vmatmul.f32.gmra.mxu2 %v1992_v10 }
 0x596   :  { %2158 = vmatmul.f32.gmra.mxu3 %v1992_v10  ;;  %2193 = vmatmul.f32.gmra.mxu0 %v1992_v10  ;;  %v2292_v3 = vpop.permute.xlu1 %2291 }
 0x5e9   :  { %v2074_v56 = vpop.f32.mrf.mxu1 }
 0x5ea   :  { %v2179_v1 = vpop.f32.mrf.mxu0 }
 0x5ef   :  { %v2109_v6 = vpop.f32.mrf.mxu2 }
 0x5f0   :  { %v2144_v55 = vpop.f32.mrf.mxu3 }
 0x5f1   :  { %v2077_v28 = vpop.f32.mrf.mxu1 }
 0x5f2   :  { %v2182_v49 = vpop.f32.mrf.mxu0 }
 0x5f7   :  { %v2112_v27 = vpop.f32.mrf.mxu2 }
 0x5f8   :  { %v2147_v25 = vpop.f32.mrf.mxu3 }
 0x5f9   :  { %v2080_v54 = vpop.f32.mrf.mxu1 }
 0x5fa   :  { %v2185_v59 = vpop.f32.mrf.mxu0 }
 0x5ff   :  { %v2115_v0 = vpop.f32.mrf.mxu2 }
 0x600   :  { %v2150_v51 = vpop.f32.mrf.mxu3 }
 0x602   :  { %v2083_v8 = vpop.f32.mrf.mxu1 }
 0x603   :  { %v2188_v52 = vpop.f32.mrf.mxu0 }
 0x608   :  { %v2118_v57 = vpop.f32.mrf.mxu2 }
 0x609   :  { %v2153_v58 = vpop.f32.mrf.mxu3 }
 0x60a   :  { %2334 = vmatpush.msra.mxu1 %v2153_v58  ;;  %v2086_v61 = vpop.f32.mrf.mxu1 }
 0x60b   :  { %v2191_v13 = vpop.f32.mrf.mxu0 }
 0x60c   :  { %2335 = vmatpush.msra.mxu1 %v2150_v51 }
 0x60e   :  { %2336 = vmatpush.msra.mxu1 %v2147_v25 }
 0x610   :  { %2337 = vmatpush.msra.mxu1 %v2144_v55  ;;  %v2121_v32 = vpop.f32.mrf.mxu2 }
 0x611   :  { %v2156_v60 = vpop.f32.mrf.mxu3 }
 0x612   :  { %v2089_v41 = vpop.f32.mrf.mxu1 }
 0x613   :  { %v2194_v29 = vpop.f32.mrf.mxu0 }
 0x614   :  { %2383 = vmatpush.msra.mxu2 %v2194_v29 }
 0x616   :  { %2384 = vmatpush.msra.mxu2 %v2191_v13 }
 0x618   :  { %2385 = vmatpush.msra.mxu2 %v2188_v52  ;;  %v2124_v31 = vpop.f32.mrf.mxu2 }
 0x619   :  { %2338 = vmatpush.msra.mxu1 %v2124_v31  ;;  %v2159_v37 = vpop.f32.mrf.mxu3 }
 0x61a   :  { %2386 = vmatpush.msra.mxu2 %v2185_v59 }
 0x61b   :  { %2339 = vmatpush.msra.mxu1 %v2121_v32 }
 0x61c   :  { %2387 = vmatpush.msra.mxu2 %v2182_v49 }
 0x61d   :  { %2340 = vmatpush.msra.mxu1 %v2118_v57  ;;  %v2277_v57 = vpop.permute.xlu1 %2276 }
 0x61e   :  { %2388 = vmatpush.msra.mxu2 %v2179_v1 }
 0x61f   :  { %2341 = vmatpush.msra.mxu1 %v2115_v0  ;;  %v2282_v0 = vpop.permute.xlu0 %2281 }
 0x620   :  { %2389 = vmatpush.msra.mxu2 %v2159_v37 }
 0x621   :  { %2342 = vmatpush.msra.mxu1 %v2112_v27 }
 0x622   :  { %2390 = vmatpush.msra.mxu2 %v2156_v60 }
 0x623   :  { %2343 = vmatpush.msra.mxu1 %v2109_v6  ;;  %2511 = vmatmul.msk.f32.vlgmr.msra.gmra.mxu2 %vm2309_vm0, %v2222_v35 }
 0x625   :  { %2344 = vmatpush.msra.mxu1 %v2089_v41  ;;  %v2424_v41 = vld [vmem:[%s4378_s1 + $0x280] sm:$0xff] }
 0x627   :  { %2345 = vmatpush.msra.mxu1 %v2086_v61 }
 0x629   :  { %2346 = vmatpush.msra.mxu1 %v2083_v8 }
 0x62b   :  { %2347 = vmatpush.msra.mxu1 %v2080_v54  ;;  %2512 = vmatmul.msk.f32.gmra.mxu2 %vm2309_vm0, %v2224_v46  ;;  %v2425_v46 = vld [vmem:[%s4378_s1 + $0x2a0] sm:$0xff] }
 0x62d   :  { %2348 = vmatpush.msra.mxu1 %v2077_v28 }
 0x62f   :  { %2349 = vmatpush.msra.mxu1 %v2074_v56 }
 0x630   :  { %2350 = vmatmul.f32.vlgmr.msra.gmra.mxu1 %v2221_v47  ;;  %v2426_v47 = vld [vmem:[%s4378_s1 + $0x2c0] sm:$0xff] }
 0x633   :  { %2513 = vmatmul.msk.f32.gmra.mxu2 %vm2309_vm0, %v2226_v48  ;;  %v2427_v48 = vld [vmem:[%s4378_s1 + $0x2e0] sm:$0xff] }
 0x638   :  { %2353 = vmatmul.f32.gmra.mxu1 %v2223_v36  ;;  %v2435_v36 = vpop.permute.xlu0 %2434 }
 0x63b   :  { %2514 = vmatmul.msk.f32.gmra.mxu2 %vm2309_vm0, %v2228_v38 }
 0x640   :  { %2356 = vmatmul.f32.gmra.mxu1 %v2225_v5 }
 0x643   :  { %2515 = vmatmul.msk.f32.gmra.mxu2 %vm2309_vm0, %v2230_v11 }
 0x648   :  { %2359 = vmatmul.f32.gmra.mxu1 %v2227_v15  ;;  %v2440_v15 = vpop.permute.xlu1 %2439 }
 0x64b   :  { %2516 = vmatmul.msk.f32.gmra.mxu2 %vm2309_vm0, %v2232_v16 }
 0x650   :  { %2362 = vmatmul.f32.gmra.mxu1 %v2229_v12 }
 0x653   :  { %2517 = vmatmul.msk.f32.gmra.mxu2 %vm2309_vm0, %v2234_v17 }
 0x658   :  { %2365 = vmatmul.f32.gmra.mxu1 %v2231_v14  ;;  %v2445_v14 = vpop.permute.xlu2 %2444 }
 0x65b   :  { %2518 = vmatmul.msk.f32.gmra.mxu2 %vm2309_vm0, %v2236_v18 }
 0x660   :  { %2368 = vmatmul.f32.gmra.mxu1 %v2233_v23 }
 0x668   :  { %2371 = vmatmul.f32.gmra.mxu1 %v2235_v24 }
 0x6a6   :  { %v2392_v39 = vpop.f32.mrf.mxu2 }
 0x6ad   :  { %v2351_v7 = vpop.f32.mrf.mxu1 }
 0x6ae   :  { %v2352_v42 = vadd.f32 %v2351_v7, %v2272_v40  ;;  %v2395_v43 = vpop.f32.mrf.mxu2 }
 0x6b0   :  { %v2393_v26 = vadd.f32 %v2392_v39, %v2352_v42 }
 0x6b2   :  { %v2416_v35 = vmax.f32 %v2393_v26, 0.0 }
 0x6b5   :  { %v2354_v44 = vpop.f32.mrf.mxu1 }
 0x6b6   :  { %v2398_v50 = vpop.f32.mrf.mxu2  ;;  %v2355_v58 = vadd.f32 %v2354_v44, %v2277_v57 }
 0x6b8   :  { %v2396_v60 = vadd.f32 %v2395_v43, %v2355_v58 }
 0x6ba   :  { %v2417_v37 = vmax.f32 %v2396_v60, 0.0 }
 0x6bd   :  { %v2357_v45 = vpop.f32.mrf.mxu1 }
 0x6be   :  { %v2401_v21 = vpop.f32.mrf.mxu2  ;;  %v2358_v51 = vadd.f32 %v2357_v45, %v2282_v0 }
 0x6c0   :  { %v2399_v32 = vadd.f32 %v2398_v50, %v2358_v51 }
 0x6c2   :  { %v2418_v61 = vmax.f32 %v2399_v32, 0.0 }
 0x6c5   :  { %v2360_v22 = vpop.f32.mrf.mxu1 }
 0x6c6   :  { %v2404_v62 = vpop.f32.mrf.mxu2  ;;  %v2361_v25 = vadd.f32 %v2360_v22, %v2287_v34 }
 0x6c8   :  { %v2402_v13 = vadd.f32 %v2401_v21, %v2361_v25 }
 0x6ca   :  { %v2419_v31 = vmax.f32 %v2402_v13, 0.0 }
 0x6cd   :  { %v2363_v63 = vpop.f32.mrf.mxu1 }
 0x6ce   :  { %v2407_v53 = vpop.f32.mrf.mxu2  ;;  %v2364_v56 = vadd.f32 %v2363_v63, %v2292_v3 }
 0x6d0   :  { %v2405_v52 = vadd.f32 %v2404_v62, %v2364_v56 }
 0x6d2   :  { %v2420_v29 = vmax.f32 %v2405_v52, 0.0 }
 0x6d5   :  { %v2366_v2 = vpop.f32.mrf.mxu1 }
 0x6d6   :  { %v2410_v19 = vpop.f32.mrf.mxu2  ;;  %v2367_v6 = vadd.f32 %v2366_v2, %v2297_v9 }
 0x6d8   :  { %v2408_v59 = vadd.f32 %v2407_v53, %v2367_v6 }
 0x6da   :  { %v2421_v8 = vmax.f32 %v2408_v59, 0.0 }
 0x6dd   :  { %v2369_v20 = vpop.f32.mrf.mxu1 }
 0x6de   :  { %v2370_v30 = vadd.f32 %v2369_v20, %v2302_v33  ;;  %v2413_v1 = vpop.f32.mrf.mxu2  ;;  %v2450_v33 = vpop.permute.xlu0 %2449 }
 0x6e0   :  { %v2411_v49 = vadd.f32 %v2410_v19, %v2370_v30 }
 0x6e2   :  { %v2422_v54 = vmax.f32 %v2411_v49, 0.0 }
 0x6e5   :  { %v2372_v10 = vpop.f32.mrf.mxu1 }
 0x6e6   :  { %v2373_v55 = vadd.f32 %v2372_v10, %v2307_v4 }
 0x6e8   :  { %v2414_v27 = vadd.f32 %v2413_v1, %v2373_v55 }
 0x6ea   :  { %v2423_v28 = vmax.f32 %v2414_v27, 0.0 }
 0x6ec   :  { %2472 = vmatpush.msra.mxu3 %v2423_v28 }
 0x6ee   :  { %2473 = vmatpush.msra.mxu3 %v2422_v54 }
 0x6f0   :  { %2474 = vmatpush.msra.mxu3 %v2421_v8 }
 0x6f2   :  { %2475 = vmatpush.msra.mxu3 %v2420_v29 }
 0x6f4   :  { %2476 = vmatpush.msra.mxu3 %v2419_v31 }
 0x6f6   :  { %2477 = vmatpush.msra.mxu3 %v2418_v61 }
 0x6f8   :  { %2478 = vmatpush.msra.mxu3 %v2417_v37 }
 0x6fa   :  { %2479 = vmatpush.msra.mxu3 %v2416_v35 }
 0x6fb   :  { %2519 = vmatmul.msk.f32.vlgmr.msra.gmra.mxu3 %vm2309_vm0, %v2424_v41 }
 0x703   :  { %2520 = vmatmul.msk.f32.gmra.mxu3 %vm2309_vm0, %v2425_v46 }
 0x70b   :  { %2521 = vmatmul.msk.f32.gmra.mxu3 %vm2309_vm0, %v2426_v47 }
 0x713   :  { %2522 = vmatmul.msk.f32.gmra.mxu3 %vm2309_vm0, %v2427_v48 }
 0x77e   :  { %v2481_v38 = vpop.f32.mrf.mxu3 }
 0x77f   :  { %v2482_v5 = vadd.f32 %v2481_v38, %v2435_v36 }
 0x781   :  { %v2493_v11 = vmax.f32 %v2482_v5, 0.0 }
 0x783   :  { %2497 = vst [vmem:[%s4382_s5] sm:$0xff] %v2493_v11 }
 0x786   :  { %v2484_v16 = vpop.f32.mrf.mxu3 }
 0x787   :  { %v2485_v12 = vadd.f32 %v2484_v16, %v2440_v15 }
 0x789   :  { %v2494_v17 = vmax.f32 %v2485_v12, 0.0 }
 0x78b   :  { %2498 = vst [vmem:[%s4382_s5 + $0x8] sm:$0xff] %v2494_v17 }
 0x78e   :  { %v2487_v18 = vpop.f32.mrf.mxu3 }
 0x78f   :  { %v2488_v23 = vadd.f32 %v2487_v18, %v2445_v14 }
 0x791   :  { %v2495_v24 = vmax.f32 %v2488_v23, 0.0 }
 0x793   :  { %2499 = vst [vmem:[%s4382_s5 + $0x10] sm:$0xff] %v2495_v24 }
 0x796   :  { %v2490_v34 = vpop.f32.mrf.mxu3 }
 0x797   :  { %v2491_v39 = vadd.f32 %v2490_v34, %v2450_v33 }
 0x799   :  { %v2496_v40 = vmax.f32 %v2491_v39, 0.0 }
 0x79b   :  { %2500 = vst [vmem:[%s4382_s5 + $0x18] sm:$0xff] %v2496_v40 }

</bundles_post_ra>
